<compile_context>
chip_gen: v7x
topology: tpu7x:2x2x1
jax: 0.10.0
libtpu: 0.0.40
codegen_flags: <defaults>
</compile_context>

<pallas_src>
import functools

import jax
import jax.numpy as jnp
from jax import lax
from jax.experimental import pallas as pl
from jax.experimental.pallas import tpu as pltpu

_LANES = 128
_SUBLANES = 8
_ROW_CHUNK = 512      # rows per in-kernel reduction chunk (multiple of 32 ->
                      # valid sublane alignment for f32 / bf16 / int8 / bool)
_PAD_LOGIT = -1e9     # padded logit; with target 0 it contributes exactly 0


def _wbce_kernel(params_ref, x_ref, t_ref, part_ref, *, chunk):
    """One grid step: reduce a (tm, 128) tile to an (8, 128) partial sum.

    params_ref (SMEM, scalar prefetch):
        [0] w0  = weights[0]
        [1] dw  = weights[1] - weights[0]
        [2] pw1 = penalty_factor * weights[1]
    For binary targets t in {0, 1}:
        weights[t] * (1 + penalty_factor * fn) == w0 + dw*t + pw1*(t*(x<=0))
    """
    w0 = params_ref[0]
    dw = params_ref[1]
    pw1 = params_ref[2]

    n_chunks = x_ref.shape[0] // chunk

    def body(c, acc):
        r = pl.multiple_of(c * chunk, chunk)
        x = x_ref[pl.ds(r, chunk), :].astype(jnp.float32)
        t = t_ref[pl.ds(r, chunk), :].astype(jnp.float32)

        # Numerically stable BCE-with-logits (reduction='none').
        bce = jnp.maximum(x, 0.0) - x * t + jnp.log1p(jnp.exp(-jnp.abs(x)))

        # sigmoid(x) <= 0.5  <=>  x <= 0 (exact); fold class weight and
        # false-negative penalty into one multiplicative factor.
        ind = t * (x <= 0.0).astype(jnp.float32)
        factor = w0 + dw * t + pw1 * ind

        total = bce * factor

        # Lane/sublane-parallel partial reduction: (chunk,128) -> (8,128).
        part = total.reshape(chunk // _SUBLANES, _SUBLANES, _LANES).sum(axis=0)
        return acc + part

    acc = lax.fori_loop(0, n_chunks, body,
                        jnp.zeros((_SUBLANES, _LANES), jnp.float32))
    part_ref[...] = acc.reshape(1, _SUBLANES, _LANES)


def _round_up(a, b):
    return ((a + b - 1) // b) * b


def _choose_tiling(m_rows, max_tm):
    """Pick (grid, tm): tm a multiple of _ROW_CHUNK, grid*tm >= m_rows."""
    max_tm = max(_ROW_CHUNK, (int(max_tm) // _ROW_CHUNK) * _ROW_CHUNK)
    grid = max(1, -(-m_rows // max_tm))
    # With a single tile the "parallel" axis has nothing to shard across the
    # two v7x TensorCores; split once there is enough work to justify it.
    if grid == 1 and m_rows > 2 * _ROW_CHUNK:
        grid = 2
    tm = _round_up(-(-m_rows // grid), _ROW_CHUNK)
    return grid, tm


def weighted_bce_loss(outputs, targets, weights, penalty_factor=2.0, *,
                      max_tm=8192):
    """Mean weighted BCE-with-logits loss via a Pallas TPU kernel.

    Contract: `targets` must be binary {0, 1} (any dtype), exactly as the
    PyTorch module assumes through `weights[targets.long()]`.  Narrow dtypes
    (bf16 logits, int8/bool targets) are streamed natively and cast to f32
    inside the kernel, cutting HBM traffic for this memory-bound loss.
    """
    assert outputs.shape == targets.shape
    n_elems = outputs.size
    assert n_elems > 0

    # Keep native (possibly narrow) dtypes; only fold >32-bit down to f32.
    if outputs.dtype.itemsize > 4:
        outputs = outputs.astype(jnp.float32)
    if targets.dtype.itemsize > 4:
        targets = targets.astype(jnp.float32)

    x_flat = outputs.reshape(-1)
    t_flat = targets.reshape(-1)

    m_rows = -(-n_elems // _LANES)
    grid, tm = _choose_tiling(m_rows, max_tm)
    n_padded = grid * tm * _LANES

    # Pad so padded elements contribute exactly 0 to the sum:
    #   x = -1e9, t = 0  ->  bce = 0, factor = w0, total = 0.
    pad = n_padded - n_elems
    if pad:
        x_flat = jnp.concatenate(
            [x_flat, jnp.full((pad,), _PAD_LOGIT, dtype=x_flat.dtype)])
        t_flat = jnp.concatenate(
            [t_flat, jnp.zeros((pad,), dtype=t_flat.dtype)])

    x2d = x_flat.reshape(grid * tm, _LANES)
    t2d = t_flat.reshape(grid * tm, _LANES)

    # Fold weights + penalty into three SMEM scalars (scalar prefetch).
    w = weights.astype(jnp.float32).reshape(-1)
    pf = jnp.float32(penalty_factor)
    params = jnp.stack([w[0], w[1] - w[0], pf * w[1]])

    kernel = functools.partial(_wbce_kernel, chunk=_ROW_CHUNK)

    x_bytes = x2d.size * x2d.dtype.itemsize
    t_bytes = t2d.size * t2d.dtype.itemsize
    out_bytes = grid * _SUBLANES * _LANES * 4
    cost = pl.CostEstimate(
        flops=10 * n_padded,
        transcendentals=2 * n_padded,
        bytes_accessed=x_bytes + t_bytes + out_bytes,
    )

    # Double-buffered input blocks + slack for in-kernel temporaries; raise
    # the scoped-VMEM limit explicitly so v5e's 16 MiB default never blocks
    # the larger tiles, while staying well under v7x's 64 MiB/TC VMEM.
    x_block = tm * _LANES * x2d.dtype.itemsize
    t_block = tm * _LANES * t2d.dtype.itemsize
    vmem_need = 2 * (x_block + t_block) + (4 << 20)
    vmem_limit = int(min(56 << 20, max(vmem_need, 16 << 20)))

    partials = pl.pallas_call(
        kernel,
        out_shape=jax.ShapeDtypeStruct((grid, _SUBLANES, _LANES), jnp.float32),
        grid_spec=pltpu.PrefetchScalarGridSpec(
            num_scalar_prefetch=1,
            grid=(grid,),
            in_specs=[
                pl.BlockSpec((tm, _LANES), lambda i, p: (i, 0)),   # logits
                pl.BlockSpec((tm, _LANES), lambda i, p: (i, 0)),   # targets
            ],
            out_specs=pl.BlockSpec((1, _SUBLANES, _LANES),
                                   lambda i, p: (i, 0, 0)),
        ),
        compiler_params=pltpu.CompilerParams(
            dimension_semantics=("parallel",),
            vmem_limit_bytes=vmem_limit,
        ),
        cost_estimate=cost,
    )(params, x2d, t2d)

    # Tiny final cross-lane reduction + mean in plain JAX (tree-style sum).
    return jnp.sum(partials) / jnp.float32(n_elems)


def _reference(outputs, targets, weights, penalty_factor=2.0):
    x = outputs.astype(jnp.float32)
    t = targets.astype(jnp.float32)
    bce = jnp.maximum(x, 0.0) - x * t + jnp.log1p(jnp.exp(-jnp.abs(x)))
    w = weights.astype(jnp.float32)[t.astype(jnp.int32)]
    weighted = bce * w
    prob = jax.nn.sigmoid(x)
    fn = jnp.logical_and(prob <= 0.5, t == 1.0)
    total = weighted + jnp.where(fn, weighted * penalty_factor, 0.0)
    return jnp.mean(total)


if __name__ == "__main__":
    key = jax.random.PRNGKey(0)
    k1, k2, k3, k4 = jax.random.split(key, 4)

    weights = jnp.array([1.0, 3.0], dtype=jnp.float32)
    penalty_factor = 2.0

    # Case 1: f32 logits / f32 targets, logistic-regression-style shape that
    # is not a multiple of 128 (exercises the zero-contribution padding path).
    out1 = jax.random.normal(k1, (200, 1), dtype=jnp.float32)
    tgt1 = jax.random.bernoulli(k2, p=0.3, shape=(200, 1)).astype(jnp.float32)
    loss1 = jax.block_until_ready(
        weighted_bce_loss(out1, tgt1, weights, penalty_factor))
    ref1 = _reference(out1, tgt1, weights, penalty_factor)
    assert jnp.allclose(loss1, ref1, rtol=1e-5, atol=1e-6), (loss1, ref1)

    # Case 2: narrow dtypes (bf16 logits, int8 targets) -> ~2.6x less HBM
    # traffic; kernel casts to f32 internally, so it matches the reference
    # computed on the same cast values.
    out2 = jax.random.normal(k3, (128, 130), dtype=jnp.float32).astype(jnp.bfloat16)
    tgt2 = jax.random.bernoulli(k4, p=0.5, shape=(128, 130)).astype(jnp.int8)
    loss2 = jax.block_until_ready(
        weighted_bce_loss(out2, tgt2, weights, penalty_factor))
    ref2 = _reference(out2, tgt2, weights, penalty_factor)
    assert jnp.allclose(loss2, ref2, rtol=1e-5, atol=1e-6), (loss2, ref2)

    print("KERNEL_OK")
</pallas_src>

<mosaic_0001>
module attributes {stable_mosaic.version = 11 : i64} {
  func.func @_wbce_kernel(%arg0: i32, %arg1: memref<3xf32, #tpu.memory_space<smem>>, %arg2: memref<512x128xf32, #tpu.memory_space<vmem>>, %arg3: memref<512x128xf32, #tpu.memory_space<vmem>>, %arg4: memref<1x8x128xf32, #tpu.memory_space<vmem>>) attributes {dimension_semantics = [#tpu.dimension_semantics<parallel>], iteration_bounds = array<i64: 1>, scalar_prefetch = 1 : i64, scratch_operands = 0 : i64, tpu.core_type = #tpu.core_type<tc>, window_params = [{transform_indices = @transform_0, window_bounds = array<i64: 512, 128>}, {transform_indices = @transform_1, window_bounds = array<i64: 512, 128>}, {transform_indices = @transform_2, window_bounds = array<i64: 1, 8, 128>}]} {
    %c0 = arith.constant 0 : index
    %0 = memref.load %arg1[%c0] : memref<3xf32, #tpu.memory_space<smem>>
    %c1 = arith.constant 1 : index
    %1 = memref.load %arg1[%c1] : memref<3xf32, #tpu.memory_space<smem>>
    %c2 = arith.constant 2 : index
    %2 = memref.load %arg1[%c2] : memref<3xf32, #tpu.memory_space<smem>>
    %cst = arith.constant 0.000000e+00 : f32
    %3 = vector.broadcast %cst : f32 to vector<8x128xf32>
    %c0_i32 = arith.constant 0 : i32
    %c512_i32 = arith.constant 512 : i32
    %4 = arith.muli %c0_i32, %c512_i32 : i32
    %5 = tpu.assume_multiple %4, 512 : i32
    %6 = arith.index_cast %5 : i32 to index
    %c0_0 = arith.constant 0 : index
    %7 = vector.load %arg2[%6, %c0_0] : memref<512x128xf32, #tpu.memory_space<vmem>>, vector<512x128xf32>
    %8 = arith.index_cast %5 : i32 to index
    %c0_1 = arith.constant 0 : index
    %9 = vector.load %arg3[%8, %c0_1] : memref<512x128xf32, #tpu.memory_space<vmem>>, vector<512x128xf32>
    %cst_2 = arith.constant 0.000000e+00 : f32
    %10 = vector.broadcast %cst_2 : f32 to vector<512x128xf32>
    %11 = arith.maximumf %7, %10 : vector<512x128xf32>
    %12 = arith.mulf %7, %9 : vector<512x128xf32>
    %13 = arith.subf %11, %12 : vector<512x128xf32>
    %14 = math.absf %7 : vector<512x128xf32>
    %cst_3 = arith.constant 0.000000e+00 : f32
    %15 = vector.broadcast %cst_3 : f32 to vector<512x128xf32>
    %16 = arith.subf %15, %14 : vector<512x128xf32>
    %17 = math.exp %16 : vector<512x128xf32>
    %18 = math.log1p %17 : vector<512x128xf32>
    %19 = arith.addf %13, %18 : vector<512x128xf32>
    %cst_4 = arith.constant 0.000000e+00 : f32
    %20 = vector.broadcast %cst_4 : f32 to vector<512x128xf32>
    %21 = arith.cmpf ole, %7, %20 : vector<512x128xf32>
    %22 = arith.extui %21 : vector<512x128xi1> to vector<512x128xi32>
    %23 = arith.sitofp %22 : vector<512x128xi32> to vector<512x128xf32>
    %24 = arith.mulf %9, %23 : vector<512x128xf32>
    %25 = vector.broadcast %1 : f32 to vector<512x128xf32>
    %26 = arith.mulf %25, %9 : vector<512x128xf32>
    %27 = vector.broadcast %0 : f32 to vector<512x128xf32>
    %28 = arith.addf %27, %26 : vector<512x128xf32>
    %29 = vector.broadcast %2 : f32 to vector<512x128xf32>
    %30 = arith.mulf %29, %24 : vector<512x128xf32>
    %31 = arith.addf %28, %30 : vector<512x128xf32>
    %32 = arith.mulf %19, %31 : vector<512x128xf32>
    %33 = vector.shape_cast %32 : vector<512x128xf32> to vector<64x8x128xf32>
    %cst_5 = arith.constant dense<0.000000e+00> : vector<8x128xf32>
    %34 = vector.multi_reduction <add>, %33, %cst_5 [0] : vector<64x8x128xf32> to vector<8x128xf32>
    %35 = arith.addf %3, %34 : vector<8x128xf32>
    %c1_i32 = arith.constant 1 : i32
    %36 = vector.shape_cast %35 : vector<8x128xf32> to vector<1x8x128xf32>
    %c0_6 = arith.constant 0 : index
    %c0_7 = arith.constant 0 : index
    %c0_8 = arith.constant 0 : index
    %37 = vector.load %arg4[%c0_6, %c0_7, %c0_8] : memref<1x8x128xf32, #tpu.memory_space<vmem>>, vector<1x8x128xf32>
    tpu.vector_store %arg4[%c0_6, %c0_7, %c0_8], %36 {strides = array<i32>} : memref<1x8x128xf32, #tpu.memory_space<vmem>>, vector<1x8x128xf32>,
    return
  }
  func.func @transform_0(%arg0: i32, %arg1: memref<3xf32, #tpu.memory_space<smem>>) -> (i32, i32) {
    %c0_i32 = arith.constant 0 : i32
    %c0_i32_0 = arith.constant 0 : i32
    return %arg0, %c0_i32 : i32, i32
  }
  func.func @transform_1(%arg0: i32, %arg1: memref<3xf32, #tpu.memory_space<smem>>) -> (i32, i32) {
    %c0_i32 = arith.constant 0 : i32
    %c0_i32_0 = arith.constant 0 : i32
    return %arg0, %c0_i32 : i32, i32
  }
  func.func @transform_2(%arg0: i32, %arg1: memref<3xf32, #tpu.memory_space<smem>>) -> (i32, i32, i32) {
    %c0_i32 = arith.constant 0 : i32
    %c0_i32_0 = arith.constant 0 : i32
    %c0_i32_1 = arith.constant 0 : i32
    return %arg0, %c0_i32, %c0_i32_0 : i32, i32, i32
  }
}

</mosaic_0001>

<bundles_post_ra>
// kernel: tpu_custom_call.1
= control target key start
LH: loop header
LB: loop body
LE: loop exit
PB: predicated region body
PF: predicated region fallthrough
CT: control target
= control target key end

     0   :  { %s6128_s0 = inlined_call_operand.hbm [shape: f32[3], index: 0, kind: input, shape index: {}]   ;;  %s6129_s1 = inlined_call_operand.hbm [shape: f32[512,128], index: 1, kind: input, shape index: {}]   ;;  %s6130_s2 = inlined_call_operand.hbm [shape: f32[512,128], index: 2, kind: input, shape index: {}]   ;;  %s6131_s3 = inlined_call_operand.hbm [shape: f32[1,8,128], index: 3, kind: output, shape index: {}]  }
   0x1   :  { %s2381_s14 = scalar_lea.hbm %s6128_s0, 16 }
   0x2   :  { %p2382_p0 = scmp.ne.s32.totalorder %s6128_s0, %s2381_s14  ;;  %p2385_p1 = scmp.lt.u32.totalorder %s2381_s14, %s6128_s0 }
   0x4   :  { %p2387_p2 = pnand %p2385_p1, %p2382_p0 }
   0x6   :  { %2390 = shalt.err (!%p2387_p2)  }
   0x7   :  { %s2465_s19 = smov [#allocation3]  }
   0x8   :  { %9 = dma.hbm_to_smem %s6128_s0, 16, %s2465_s19, [#allocation2] }
   0x9   :  { %2457 = dma.done.wait [#allocation2], 16 }
   0xa   :  { %2458 = vsyncadd [#allocation2], 4294967280 }
   0xb   :  { %11 = sfence }
   0xc   :  { %12 = vsyncpa [#allocation5], 0 }
   0xd   :  { %13 = vsyncpa [#allocation8], 0 }
   0xe   :  { %14 = vsyncpa [#allocation6], 0  ;;  %s2466_s22 = smov [#allocation4]   ;;  %s2391_s26 = scalar_lea.hbm %s6129_s1, 8192 }
   0xf   :  { %s20_s23 = sshll.u32 %s2466_s22, 4  ;;  %p2392_p3 = scmp.ne.s32.totalorder %s6129_s1, %s2391_s26  ;;  %s21_s23 = int_to_ptr.vmem [resolvable:$true] %s20_s23 }
  0x10   :  { %p2395_p4 = scmp.lt.u32.totalorder %s2391_s26, %s6129_s1 }
  0x12   :  { %p2397_p5 = pnand %p2395_p4, %p2392_p3 }
  0x14   :  { %2400 = shalt.err (!%p2397_p5)
}
  0x15   :  { %s2401_s0 = scalar_lea.vmem %s21_s23, 8192  ;;  %p2406_p7 = scmp.lt.s32.totalorder %s21_s23, %s21_s23 }
  0x16   :  { %p2402_p6 = scmp.ne.s32.totalorder %s21_s23, %s2401_s0  ;;  %p2407_p8 = scmp.lt.s32.totalorder %s2401_s0, %s2401_s0 }
  0x18   :  { %p2408_p9 = por %p2407_p8, %p2406_p7 }
  0x1a   :  { %p2409_p10 = pnand %p2408_p9, %p2402_p6 }
  0x1c   :  { %2412 = shalt.err (!%p2409_p10)
}
  0x1d   :  { %s2467_s4 = smov 128   ;;  %s2468_s5 = smov 8  }
  0x1e   :  { %26 = dma.hbm_to_vmem [thread:$0]  %s6129_s1, 8192, %s21_s23, [#allocation5], %s2467_s4, %s2467_s4, %s2468_s5  }
  0x1f   :  { %s2469_s8 = smov [#allocation7]   ;;  %s2413_s12 = scalar_lea.hbm %s6130_s2, 8192 }
  0x20   :  { %s32_s9 = sshll.u32 %s2469_s8, 4  ;;  %p2414_p11 = scmp.ne.s32.totalorder %s6130_s2, %s2413_s12  ;;  %s33_s9 = int_to_ptr.vmem [resolvable:$true] %s32_s9 }
  0x21   :  { %p2417_p12 = scmp.lt.u32.totalorder %s2413_s12, %s6130_s2 }
  0x23   :  { %p2419_p13 = pnand %p2417_p12, %p2414_p11 }
  0x25   :  { %2422 = shalt.err (!%p2419_p13)
}
  0x26   :  { %s2423_s17 = scalar_lea.vmem %s33_s9, 8192  ;;  %p2428_p1 = scmp.lt.s32.totalorder %s33_s9, %s33_s9 }
  0x27   :  { %p2424_p0 = scmp.ne.s32.totalorder %s33_s9, %s2423_s17  ;;  %p2429_p2 = scmp.lt.s32.totalorder %s2423_s17, %s2423_s17 }
  0x29   :  { %p2430_p3 = por %p2429_p2, %p2428_p1 }
  0x2b   :  { %p2431_p4 = pnand %p2430_p3, %p2424_p0 }
  0x2d   :  { %2434 = shalt.err (!%p2431_p4)
}
  0x2e   :  { %38 = dma.hbm_to_vmem [thread:$0]  %s6130_s2, 8192, %s33_s9, [#allocation8], %s2467_s4, %s2467_s4, %s2468_s5  }
  0x2f   :  { %2459 = dma.done.wait [#allocation5], 8192  }
  0x30   :  { %2460 = vsyncadd [#allocation5], 4294959104 }
  0x31   :  { %2461 = dma.done.wait [#allocation8], 8192  }
  0x32   :  { %2462 = vsyncadd [#allocation8], 4294959104  ;;  %v2528_v0 = vld [vmem:[#allocation4] sm:$0xff]  ;;  %v2530_v1 = vld [vmem:[#allocation4 + $0x8] sm:$0xff]  ;;  %s4592_s2 = sld [smem:[#allocation3 + $0x1]]  ;;  %s4596_s19 = sld [smem:[#allocation3]] }
  0x33   :  { %6487 = vst [vmem:[#allocation14_spill] sm:$0xff] %v2528_v0  ;;  %6488 = vst [vmem:[#allocation15_spill] sm:$0xff] %v2530_v1  ;;  %v2532_v2 = vld [vmem:[#allocation4 + $0x10] sm:$0xff]  ;;  %v2534_v3 = vld [vmem:[#allocation4 + $0x18] sm:$0xff]  ;;  %s4944_s20 = sld [smem:[#allocation3 + $0x2]]  ;;  %s2471_s21 = smov [#allocation9]  }
  0x34   :  { %6489 = vst [vmem:[#allocation16_spill] sm:$0xff] %v2532_v2  ;;  %6490 = vst [vmem:[#allocation17_spill] sm:$0xff] %v2534_v3  ;;  %v2536_v4 = vld [vmem:[#allocation4 + $0x20] sm:$0xff]  ;;  %v2538_v5 = vld [vmem:[#allocation4 + $0x28] sm:$0xff]  ;;  %s1914_s22 = sshll.u32 %s2471_s21, 4  ;;  %s1915_s22 = int_to_ptr.vmem [resolvable:$true] %s1914_s22 }
  0x35   :  { %6491 = vst [vmem:[#allocation18_spill] sm:$0xff] %v2536_v4  ;;  %6492 = vst [vmem:[#allocation19_spill] sm:$0xff] %v2538_v5  ;;  %v2540_v6 = vld [vmem:[#allocation4 + $0x30] sm:$0xff]  ;;  %v2542_v7 = vld [vmem:[#allocation4 + $0x38] sm:$0xff]  ;;  %s2435_s23 = scalar_lea.vmem %s1915_s22, 128  ;;  %p2440_p6 = scmp.lt.s32.totalorder %s1915_s22, %s1915_s22 }
  0x36   :  { %6493 = vst [vmem:[#allocation20_spill] sm:$0xff] %v2540_v6  ;;  %6494 = vst [vmem:[#allocation21_spill] sm:$0xff] %v2542_v7  ;;  %v2544_v8 = vld [vmem:[#allocation4 + $0x40] sm:$0xff]  ;;  %v2546_v9 = vld [vmem:[#allocation4 + $0x48] sm:$0xff]  ;;  %p2436_p5 = scmp.ne.s32.totalorder %s1915_s22, %s2435_s23  ;;  %p2441_p7 = scmp.lt.s32.totalorder %s2435_s23, %s2435_s23 }
  0x37   :  { %6495 = vst [vmem:[#allocation22_spill] sm:$0xff] %v2544_v8  ;;  %6496 = vst [vmem:[#allocation23_spill] sm:$0xff] %v2546_v9  ;;  %v2548_v10 = vld [vmem:[#allocation4 + $0x50] sm:$0xff]  ;;  %v2552_v13 = vld [vmem:[#allocation4 + $0x58] sm:$0xff] }
  0x38   :  { %6497 = vst [vmem:[#allocation24_spill] sm:$0xff] %v2548_v10  ;;  %6498 = vst [vmem:[#allocation25_spill] sm:$0xff] %v2552_v13  ;;  %v2554_v14 = vld [vmem:[#allocation4 + $0x60] sm:$0xff]  ;;  %v2556_v15 = vld [vmem:[#allocation4 + $0x68] sm:$0xff]  ;;  %p2442_p8 = por %p2441_p7, %p2440_p6 }
  0x39   :  { %6499 = vst [vmem:[#allocation26_spill] sm:$0xff] %v2554_v14  ;;  %v2561_v19 = vld [vmem:[#allocation4 + $0x70] sm:$0xff]  ;;  %v2563_v20 = vld [vmem:[#allocation4 + $0x78] sm:$0xff]  ;;  %v2565_v21 = vld [vmem:[#allocation4 + $0x80] sm:$0xff] }
  0x3a   :  { %6500 = vst [vmem:[#allocation27_spill] sm:$0xff] %v2561_v19  ;;  %6501 = vst [vmem:[#allocation28_spill] sm:$0xff] %v2565_v21  ;;  %v2570_v25 = vld [vmem:[#allocation4 + $0x88] sm:$0xff]  ;;  %v2572_v26 = vld [vmem:[#allocation4 + $0x90] sm:$0xff]  ;;  %p2443_p9 = pnand %p2442_p8, %p2436_p5 }
  0x3b   :  { %v2574_v27 = vld [vmem:[#allocation4 + $0x98] sm:$0xff]  ;;  %v2579_v31 = vld [vmem:[#allocation4 + $0xa0] sm:$0xff]  ;;  %v2581_v32 = vld [vmem:[#allocation4 + $0xa8] sm:$0xff] }
  0x3c   :  { %6502 = vst [vmem:[#allocation29_spill] sm:$0xff] %v2574_v27  ;;  %6503 = vst [vmem:[#allocation30_spill] sm:$0xff] %v2579_v31  ;;  %v2583_v33 = vld [vmem:[#allocation4 + $0xb0] sm:$0xff]  ;;  %v2588_v37 = vld [vmem:[#allocation4 + $0xb8] sm:$0xff] }
  0x3d   :  { %6504 = vst [vmem:[#allocation31_spill] sm:$0xff] %v2583_v33  ;;  %6505 = vst [vmem:[#allocation32_spill] sm:$0xff] %v2588_v37  ;;  %v2590_v38 = vld [vmem:[#allocation4 + $0xc0] sm:$0xff]  ;;  %v2592_v39 = vld [vmem:[#allocation4 + $0xc8] sm:$0xff] }
  0x3e   :  { %6506 = vst [vmem:[#allocation33_spill] sm:$0xff] %v2592_v39  ;;  %v2597_v43 = vld [vmem:[#allocation4 + $0xd0] sm:$0xff]  ;;  %v2599_v44 = vld [vmem:[#allocation4 + $0xd8] sm:$0xff]  ;;  %v2601_v45 = vld [vmem:[#allocation4 + $0xe0] sm:$0xff] }
  0x3f   :  { %6507 = vst [vmem:[#allocation34_spill] sm:$0xff] %v2601_v45  ;;  %v2606_v49 = vld [vmem:[#allocation4 + $0xe8] sm:$0xff]  ;;  %v2608_v50 = vld [vmem:[#allocation4 + $0xf0] sm:$0xff]  ;;  %v2610_v51 = vld [vmem:[#allocation4 + $0xf8] sm:$0xff] }
  0x40   :  { %6508 = vst [vmem:[#allocation35_spill] sm:$0xff] %v2606_v49  ;;  %6509 = vst [vmem:[#allocation36_spill] sm:$0xff] %v2608_v50  ;;  %v2615_v55 = vld [vmem:[#allocation4 + $0x100] sm:$0xff]  ;;  %v2617_v56 = vld [vmem:[#allocation4 + $0x108] sm:$0xff] }
  0x41   :  { %6510 = vst [vmem:[#allocation37_spill] sm:$0xff] %v2610_v51  ;;  %6511 = vst [vmem:[#allocation38_spill] sm:$0xff] %v2615_v55  ;;  %v2619_v57 = vld [vmem:[#allocation4 + $0x110] sm:$0xff]  ;;  %v2624_v61 = vld [vmem:[#allocation4 + $0x118] sm:$0xff] }
  0x42   :  { %6512 = vst [vmem:[#allocation39_spill] sm:$0xff] %v2619_v57  ;;  %6513 = vst [vmem:[#allocation40_spill] sm:$0xff] %v2624_v61  ;;  %v2626_v62 = vld [vmem:[#allocation4 + $0x120] sm:$0xff]  ;;  %v2628_v63 = vld [vmem:[#allocation4 + $0x128] sm:$0xff] }
  0x43   :  { %6514 = vst [vmem:[#allocation41_spill] sm:$0xff] %v2626_v62  ;;  %6515 = vst [vmem:[#allocation42_spill] sm:$0xff] %v2628_v63  ;;  %v2633_v48 = vld [vmem:[#allocation4 + $0x130] sm:$0xff]  ;;  %v2635_v47 = vld [vmem:[#allocation4 + $0x138] sm:$0xff] }
  0x44   :  { %6516 = vst [vmem:[#allocation43_spill] sm:$0xff] %v2633_v48  ;;  %6517 = vst [vmem:[#allocation44_spill] sm:$0xff] %v2635_v47  ;;  %v2637_v58 = vld [vmem:[#allocation4 + $0x140] sm:$0xff]  ;;  %v2642_v42 = vld [vmem:[#allocation4 + $0x148] sm:$0xff] }
  0x45   :  { %6518 = vst [vmem:[#allocation45_spill] sm:$0xff] %v2637_v58  ;;  %6519 = vst [vmem:[#allocation46_spill] sm:$0xff] %v2642_v42  ;;  %v2644_v41 = vld [vmem:[#allocation4 + $0x150] sm:$0xff]  ;;  %v2646_v54 = vld [vmem:[#allocation4 + $0x158] sm:$0xff] }
  0x46   :  { %6520 = vst [vmem:[#allocation47_spill] sm:$0xff] %v2644_v41  ;;  %6521 = vst [vmem:[#allocation48_spill] sm:$0xff] %v2646_v54  ;;  %v2651_v36 = vld [vmem:[#allocation4 + $0x160] sm:$0xff]  ;;  %v2653_v35 = vld [vmem:[#allocation4 + $0x168] sm:$0xff] }
  0x47   :  { %6522 = vst [vmem:[#allocation49_spill] sm:$0xff] %v2651_v36  ;;  %6523 = vst [vmem:[#allocation50_spill] sm:$0xff] %v2653_v35  ;;  %v2655_v60 = vld [vmem:[#allocation4 + $0x170] sm:$0xff]  ;;  %v2660_v30 = vld [vmem:[#allocation4 + $0x178] sm:$0xff] }
  0x48   :  { %6524 = vst [vmem:[#allocation51_spill] sm:$0xff] %v2655_v60  ;;  %6525 = vst [vmem:[#allocation52_spill] sm:$0xff] %v2660_v30  ;;  %v2662_v29 = vld [vmem:[#allocation4 + $0x180] sm:$0xff]  ;;  %v2664_v52 = vld [vmem:[#allocation4 + $0x188] sm:$0xff] }
  0x49   :  { %6526 = vst [vmem:[#allocation53_spill] sm:$0xff] %v2662_v29  ;;  %6527 = vst [vmem:[#allocation54_spill] sm:$0xff] %v2664_v52  ;;  %v2669_v24 = vld [vmem:[#allocation4 + $0x190] sm:$0xff]  ;;  %v2671_v23 = vld [vmem:[#allocation4 + $0x198] sm:$0xff] }
  0x4a   :  { %6528 = vst [vmem:[#allocation55_spill] sm:$0xff] %v2669_v24  ;;  %6529 = vst [vmem:[#allocation56_spill] sm:$0xff] %v2671_v23  ;;  %v2673_v46 = vld [vmem:[#allocation4 + $0x1a0] sm:$0xff]  ;;  %v2678_v18 = vld [vmem:[#allocation4 + $0x1a8] sm:$0xff] }
  0x4b   :  { %6530 = vst [vmem:[#allocation57_spill] sm:$0xff] %v2673_v46  ;;  %6531 = vst [vmem:[#allocation58_spill] sm:$0xff] %v2678_v18  ;;  %v2680_v17 = vld [vmem:[#allocation4 + $0x1b0] sm:$0xff]  ;;  %v2682_v40 = vld [vmem:[#allocation4 + $0x1b8] sm:$0xff] }
  0x4c   :  { %6532 = vst [vmem:[#allocation59_spill] sm:$0xff] %v2680_v17  ;;  %6533 = vst [vmem:[#allocation60_spill] sm:$0xff] %v2682_v40  ;;  %v2687_v12 = vld [vmem:[#allocation4 + $0x1c0] sm:$0xff]  ;;  %v2689_v11 = vld [vmem:[#allocation4 + $0x1c8] sm:$0xff] }
  0x4d   :  { %6534 = vst [vmem:[#allocation61_spill] sm:$0xff] %v2687_v12  ;;  %6535 = vst [vmem:[#allocation62_spill] sm:$0xff] %v2689_v11  ;;  %v2691_v34 = vld [vmem:[#allocation4 + $0x1d0] sm:$0xff]  ;;  %v112_v59 = vld [vmem:[#allocation7] sm:$0xff] }
  0x4e   :  { %6536 = vst [vmem:[#allocation63_spill] sm:$0xff] %v2691_v34  ;;  %v2696_v42 = vld [vmem:[#allocation4 + $0x1d8] sm:$0xff]  ;;  %v2698_v28 = vld [vmem:[#allocation4 + $0x1e0] sm:$0xff]  ;;  %v113_v53 = vld [vmem:[#allocation7 + $0x8] sm:$0xff]  ;;  %v240_v46 = vmul.f32 %v112_v59, %v2528_v0 }
  0x4f   :  { %6537 = vst [vmem:[#allocation64_spill] sm:$0xff] %v2696_v42  ;;  %6538 = vst [vmem:[#allocation65_spill] sm:$0xff] %v2698_v28  ;;  %v2703_v36 = vld [vmem:[#allocation4 + $0x1e8] sm:$0xff]  ;;  %v2705_v58 = vld [vmem:[#allocation4 + $0x1f0] sm:$0xff]  ;;  %v241_v40 = vmul.f32 %v113_v53, %v2530_v1 }
  0x50   :  { %6539 = vst [vmem:[#allocation66_spill] sm:$0xff] %v2703_v36  ;;  %6540 = vst [vmem:[#allocation67_spill] sm:$0xff] %v2705_v58  ;;  %v114_v22 = vld [vmem:[#allocation7 + $0x10] sm:$0xff]  ;;  %v2710_v29 = vld [vmem:[#allocation4 + $0x1f8] sm:$0xff]  ;;  %v6542_v58 = vmax.f32 %v2528_v0, 0.0 }
  0x51   :  { %6541 = vst [vmem:[#allocation68_spill] sm:$0xff] %v2710_v29  ;;  %v115_v30 = vld [vmem:[#allocation7 + $0x18] sm:$0xff]  ;;  %v116_v47 = vld [vmem:[#allocation7 + $0x20] sm:$0xff]  ;;  %v117_v23 = vld [vmem:[#allocation7 + $0x28] sm:$0xff]  ;;  %v242_v35 = vmul.f32 %v114_v22, %v2532_v2 }
  0x52   :  { %v118_v24 = vld [vmem:[#allocation7 + $0x30] sm:$0xff]  ;;  %v119_v48 = vld [vmem:[#allocation7 + $0x38] sm:$0xff]  ;;  %v120_v17 = vld [vmem:[#allocation7 + $0x40] sm:$0xff]  ;;  %v243_v41 = vmul.f32 %v115_v30, %v2534_v3  ;;  %v244_v52 = vmul.f32 %v116_v47, %v2536_v4  ;;  %v245_v60 = vmul.f32 %v117_v23, %v2538_v5  ;;  %v2732_v63 = vsub.f32 %v6542_v58, %v240_v46 }
  0x53   :  { %v121_v18 = vld [vmem:[#allocation7 + $0x48] sm:$0xff]  ;;  %v122_v16 = vld [vmem:[#allocation7 + $0x50] sm:$0xff]  ;;  %v123_v34 = vld [vmem:[#allocation7 + $0x58] sm:$0xff]  ;;  %v246_v22 = vmul.f32 %v118_v24, %v2540_v6  ;;  %v247_v59 = vmul.f32 %v119_v48, %v2542_v7  ;;  %v248_v47 = vmul.f32 %v120_v17, %v2544_v8  ;;  %v6544_v23 = vmax.f32 %v2530_v1, 0.0 }
  0x54   :  { %v124_v11 = vld [vmem:[#allocation7 + $0x60] sm:$0xff]  ;;  %v125_v12 = vld [vmem:[#allocation7 + $0x68] sm:$0xff]  ;;  %v126_v36 = vld [vmem:[#allocation7 + $0x70] sm:$0xff]  ;;  %6543 = vst [vmem:[#allocation69_spill] sm:$0xff] %v2732_v63  ;;  %v249_v53 = vmul.f32 %v121_v18, %v2546_v9  ;;  %v2737_v62 = vmul.f32 %v122_v16, %v2548_v10  ;;  %v2744_v46 = vmul.f32 %v123_v34, %v2552_v13  ;;  %v6546_v18 = vmax.f32 %v2532_v2, 0.0 }
  0x55   :  { %v127_v28 = vld [vmem:[#allocation7 + $0x78] sm:$0xff]  ;;  %v128_v42 = vld [vmem:[#allocation7 + $0x80] sm:$0xff]  ;;  %v129_v54 = vld [vmem:[#allocation7 + $0x88] sm:$0xff]  ;;  %v2741_v61 = vsub.f32 %v6544_v23, %v241_v40  ;;  %v2747_v58 = vmul.f32 %v124_v11, %v2554_v14  ;;  %v2750_v17 = vmul.f32 %v125_v12, %v2556_v15  ;;  %v2757_v23 = vmul.f32 %v126_v36, %v2561_v19 }
  0x56   :  { %v130_v29 = vld [vmem:[#allocation7 + $0x90] sm:$0xff]  ;;  %v131_v30 = vld [vmem:[#allocation7 + $0x98] sm:$0xff]  ;;  %v132_v24 = vld [vmem:[#allocation7 + $0xa0] sm:$0xff]  ;;  %v2754_v16 = vsub.f32 %v6546_v18, %v242_v35  ;;  %v2763_v34 = vmul.f32 %v128_v42, %v2565_v21  ;;  %v6548_v11 = vmax.f32 %v2534_v3, 0.0  ;;  %v2770_v18 = vmul.f32 %v129_v54, %v2570_v25 }
  0x57   :  { %6545 = vst [vmem:[#allocation70_spill] sm:$0xff] %v2741_v61  ;;  %v133_v48 = vld [vmem:[#allocation7 + $0xa8] sm:$0xff]  ;;  %v134_v57 = vld [vmem:[#allocation7 + $0xb0] sm:$0xff]  ;;  %v135_v63 = vld [vmem:[#allocation7 + $0xb8] sm:$0xff]  ;;  %v2760_v61 = vmul.f32 %v127_v28, %v2563_v20  ;;  %v2776_v36 = vmul.f32 %v131_v30, %v2574_v27  ;;  %v6550_v28 = vmax.f32 %v2536_v4, 0.0 }
  0x58   :  { %6547 = vst [vmem:[#allocation71_spill] sm:$0xff] %v2754_v16  ;;  %v136_v1 = vld [vmem:[#allocation7 + $0xc0] sm:$0xff]  ;;  %v137_v40 = vld [vmem:[#allocation7 + $0xc8] sm:$0xff]  ;;  %v2767_v12 = vsub.f32 %v6548_v11, %v243_v41  ;;  %v138_v0 = vld [vmem:[#allocation7 + $0xd0] sm:$0xff]  ;;  %v2773_v16 = vmul.f32 %v130_v29, %v2572_v26  ;;  %v2783_v11 = vmul.f32 %v132_v24, %v2579_v31  ;;  %v2789_v54 = vmul.f32 %v134_v57, %v2583_v33 }
  0x59   :  { %v139_v2 = vld [vmem:[#allocation7 + $0xd8] sm:$0xff]  ;;  %v140_v35 = vld [vmem:[#allocation7 + $0xe0] sm:$0xff]  ;;  %v2780_v42 = vsub.f32 %v6550_v28, %v244_v52  ;;  %v141_v21 = vld [vmem:[#allocation7 + $0xe8] sm:$0xff]  ;;  %v6552_v29 = vmax.f32 %v2538_v5, 0.0  ;;  %v2796_v28 = vmul.f32 %v135_v63, %v2588_v37  ;;  %v2802_v24 = vmul.f32 %v137_v40, %v2592_v39 }
  0x5a   :  { %6549 = vst [vmem:[#allocation72_spill] sm:$0xff] %v2767_v12  ;;  %v142_v3 = vld [vmem:[#allocation7 + $0xf0] sm:$0xff]  ;;  %v143_v41 = vld [vmem:[#allocation7 + $0xf8] sm:$0xff]  ;;  %v2786_v12 = vmul.f32 %v133_v48, %v2581_v32  ;;  %v144_v27 = vld [vmem:[#allocation7 + $0x100] sm:$0xff]  ;;  %v6554_v48 = vmax.f32 %v2540_v6, 0.0  ;;  %v2815_v63 = vmul.f32 %v140_v35, %v2601_v45 }
  0x5b   :  { %6551 = vst [vmem:[#allocation73_spill] sm:$0xff] %v2780_v42  ;;  %v2793_v30 = vsub.f32 %v6552_v29, %v245_v60  ;;  %v145_v4 = vld [vmem:[#allocation7 + $0x108] sm:$0xff]  ;;  %v146_v52 = vld [vmem:[#allocation7 + $0x110] sm:$0xff]  ;;  %v2799_v42 = vmul.f32 %v136_v1, %v2590_v38  ;;  %v147_v33 = vld [vmem:[#allocation7 + $0x118] sm:$0xff]  ;;  %v2809_v29 = vmul.f32 %v138_v0, %v2597_v43  ;;  %v6556_v1 = vmax.f32 %v2542_v7, 0.0 }
  0x5c   :  { %v2806_v57 = vsub.f32 %v6554_v48, %v246_v22  ;;  %v148_v5 = vld [vmem:[#allocation7 + $0x120] sm:$0xff]  ;;  %v149_v60 = vld [vmem:[#allocation7 + $0x128] sm:$0xff]  ;;  %v150_v39 = vld [vmem:[#allocation7 + $0x130] sm:$0xff]  ;;  %v2822_v48 = vmul.f32 %v141_v21, %v2606_v49  ;;  %v2828_v0 = vmul.f32 %v143_v41, %v2610_v51 }
  0x5d   :  { %6553 = vst [vmem:[#allocation74_spill] sm:$0xff] %v2793_v30  ;;  %v2812_v30 = vmul.f32 %v139_v2, %v2599_v44  ;;  %v2819_v40 = vsub.f32 %v6556_v1, %v247_v59  ;;  %v151_v6 = vld [vmem:[#allocation7 + $0x138] sm:$0xff]  ;;  %v152_v22 = vld [vmem:[#allocation7 + $0x140] sm:$0xff]  ;;  %v6559_v2 = vmax.f32 %v2544_v8, 0.0  ;;  %v153_v45 = vld [vmem:[#allocation7 + $0x148] sm:$0xff]  ;;  %v2835_v1 = vmul.f32 %v144_v27, %v2615_v55 }
  0x5e   :  { %6555 = vst [vmem:[#allocation75_spill] sm:$0xff] %v2806_v57  ;;  %v2825_v57 = vmul.f32 %v142_v3, %v2608_v50  ;;  %6558 = vst [vmem:[#allocation77_spill] sm:$0xff] %v2828_v0  ;;  %v154_v7 = vld [vmem:[#allocation7 + $0x150] sm:$0xff]  ;;  %v155_v59 = vld [vmem:[#allocation7 + $0x158] sm:$0xff]  ;;  %v6563_v3 = vmax.f32 %v2546_v9, 0.0 }
  0x5f   :  { %6557 = vst [vmem:[#allocation76_spill] sm:$0xff] %v2819_v40  ;;  %v2832_v35 = vsub.f32 %v6559_v2, %v248_v47  ;;  %v2838_v40 = vmul.f32 %v145_v4, %v2617_v56  ;;  %v6561_v21 = vld [vmem:[#allocation39_spill] sm:$0xff]  ;;  %v156_v51 = vld [vmem:[#allocation7 + $0x160] sm:$0xff]  ;;  %v157_v8 = vld [vmem:[#allocation7 + $0x168] sm:$0xff]  ;;  %v6569_v4 = vmax.f32 %v2548_v10, 0.0 }
  0x60   :  { %v2841_v49 = vmul.f32 %v146_v52, %v6561_v21  ;;  %v2845_v41 = vsub.f32 %v6563_v3, %v249_v53  ;;  %v158_v47 = vld [vmem:[#allocation7 + $0x170] sm:$0xff]  ;;  %v6565_v2 = vld [vmem:[#allocation40_spill] sm:$0xff]  ;;  %v6566_v0 = vld [vmem:[#allocation41_spill] sm:$0xff] }
  0x61   :  { %6560 = vst [vmem:[#allocation78_spill] sm:$0xff] %v2832_v35  ;;  %v2848_v35 = vmul.f32 %v147_v33, %v6565_v2  ;;  %v2851_v50 = vmul.f32 %v148_v5, %v6566_v0  ;;  %v6567_v27 = vld [vmem:[#allocation42_spill] sm:$0xff]  ;;  %v2859_v52 = vsub.f32 %v6569_v4, %v2737_v62  ;;  %v159_v9 = vld [vmem:[#allocation7 + $0x178] sm:$0xff]  ;;  %v160_v53 = vld [vmem:[#allocation7 + $0x180] sm:$0xff] }
  0x62   :  { %6562 = vst [vmem:[#allocation79_spill] sm:$0xff] %v2841_v49  ;;  %6564 = vst [vmem:[#allocation80_spill] sm:$0xff] %v2845_v41  ;;  %v2854_v55 = vmul.f32 %v149_v60, %v6567_v27  ;;  %v161_v3 = vld [vmem:[#allocation7 + $0x188] sm:$0xff]  ;;  %v6571_v41 = vld [vmem:[#allocation43_spill] sm:$0xff]  ;;  %v6575_v60 = vmax.f32 %v2552_v13, 0.0 }
  0x63   :  { %6570 = vst [vmem:[#allocation82_spill] sm:$0xff] %v2859_v52  ;;  %v2862_v21 = vmul.f32 %v150_v39, %v6571_v41  ;;  %v6572_v49 = vld [vmem:[#allocation44_spill] sm:$0xff]  ;;  %v6573_v2 = vld [vmem:[#allocation45_spill] sm:$0xff]  ;;  %v162_v10 = vld [vmem:[#allocation7 + $0x190] sm:$0xff] }
  0x64   :  { %6568 = vst [vmem:[#allocation81_spill] sm:$0xff] %v2854_v55  ;;  %v2865_v33 = vmul.f32 %v151_v6, %v6572_v49  ;;  %v2868_v5 = vmul.f32 %v152_v22, %v6573_v2  ;;  %v2873_v27 = vsub.f32 %v6575_v60, %v2744_v46  ;;  %v163_v62 = vld [vmem:[#allocation7 + $0x198] sm:$0xff]  ;;  %v164_v4 = vld [vmem:[#allocation7 + $0x1a0] sm:$0xff]  ;;  %v6577_v52 = vld [vmem:[#allocation46_spill] sm:$0xff]  ;;  %v6581_v22 = vmax.f32 %v2554_v14, 0.0 }
  0x65   :  { %v2876_v55 = vmul.f32 %v153_v45, %v6577_v52  ;;  %v6578_v0 = vld [vmem:[#allocation47_spill] sm:$0xff]  ;;  %v6579_v41 = vld [vmem:[#allocation48_spill] sm:$0xff]  ;;  %v165_v13 = vld [vmem:[#allocation7 + $0x1a8] sm:$0xff] }
  0x66   :  { %6574 = vst [vmem:[#allocation83_spill] sm:$0xff] %v2868_v5  ;;  %6576 = vst [vmem:[#allocation84_spill] sm:$0xff] %v2873_v27  ;;  %v2879_v39 = vmul.f32 %v154_v7, %v6578_v0  ;;  %v2882_v6 = vmul.f32 %v155_v59, %v6579_v41  ;;  %v2887_v2 = vsub.f32 %v6581_v22, %v2747_v58  ;;  %v166_v46 = vld [vmem:[#allocation7 + $0x1b0] sm:$0xff]  ;;  %v167_v60 = vld [vmem:[#allocation7 + $0x1b8] sm:$0xff]  ;;  %v6588_v59 = vmax.f32 %v2556_v15, 0.0 }
  0x67   :  { %v6583_v27 = vld [vmem:[#allocation49_spill] sm:$0xff]  ;;  %v6584_v49 = vld [vmem:[#allocation50_spill] sm:$0xff]  ;;  %v6586_v52 = vld [vmem:[#allocation51_spill] sm:$0xff] }
  0x68   :  { %6580 = vst [vmem:[#allocation85_spill] sm:$0xff] %v2882_v6  ;;  %6582 = vst [vmem:[#allocation86_spill] sm:$0xff] %v2887_v2  ;;  %v2890_v5 = vmul.f32 %v156_v51, %v6583_v27  ;;  %v2893_v45 = vmul.f32 %v157_v8, %v6584_v49  ;;  %v2896_v7 = vmul.f32 %v158_v47, %v6586_v52  ;;  %v168_v14 = vld [vmem:[#allocation7 + $0x1c0] sm:$0xff]  ;;  %v169_v58 = vld [vmem:[#allocation7 + $0x1c8] sm:$0xff]  ;;  %v6595_v47 = vmax.f32 %v2561_v19, 0.0 }
  0x69   :  { %v2901_v41 = vsub.f32 %v6588_v59, %v2750_v17  ;;  %v170_v22 = vld [vmem:[#allocation7 + $0x1d0] sm:$0xff]  ;;  %v6590_v2 = vld [vmem:[#allocation52_spill] sm:$0xff]  ;;  %v6591_v0 = vld [vmem:[#allocation53_spill] sm:$0xff] }
  0x6a   :  { %6585 = vst [vmem:[#allocation87_spill] sm:$0xff] %v2893_v45  ;;  %6587 = vst [vmem:[#allocation88_spill] sm:$0xff] %v2896_v7  ;;  %v2904_v6 = vmul.f32 %v159_v9, %v6590_v2  ;;  %v2907_v51 = vmul.f32 %v160_v53, %v6591_v0  ;;  %v6593_v27 = vld [vmem:[#allocation54_spill] sm:$0xff]  ;;  %v2915_v52 = vsub.f32 %v6595_v47, %v2757_v23  ;;  %v171_v7 = vld [vmem:[#allocation7 + $0x1d8] sm:$0xff] }
  0x6b   :  { %6589 = vst [vmem:[#allocation89_spill] sm:$0xff] %v2901_v41  ;;  %v2910_v8 = vmul.f32 %v161_v3, %v6593_v27  ;;  %v172_v17 = vld [vmem:[#allocation7 + $0x1e0] sm:$0xff]  ;;  %v173_v59 = vld [vmem:[#allocation7 + $0x1e8] sm:$0xff]  ;;  %v6597_v41 = vld [vmem:[#allocation55_spill] sm:$0xff]  ;;  %v6601_v3 = vmax.f32 %v2563_v20, 0.0 }
  0x6c   :  { %6592 = vst [vmem:[#allocation90_spill] sm:$0xff] %v2907_v51  ;;  %6596 = vst [vmem:[#allocation92_spill] sm:$0xff] %v2915_v52  ;;  %v2918_v49 = vmul.f32 %v162_v10, %v6597_v41  ;;  %v6598_v45 = vld [vmem:[#allocation56_spill] sm:$0xff]  ;;  %v6599_v2 = vld [vmem:[#allocation57_spill] sm:$0xff] }
  0x6d   :  { %6594 = vst [vmem:[#allocation91_spill] sm:$0xff] %v2910_v8  ;;  %v2921_v9 = vmul.f32 %v163_v62, %v6598_v45  ;;  %v2924_v53 = vmul.f32 %v164_v4, %v6599_v2  ;;  %v2929_v27 = vsub.f32 %v6601_v3, %v2760_v61  ;;  %v174_v8 = vld [vmem:[#allocation7 + $0x1f0] sm:$0xff]  ;;  %v175_v23 = vld [vmem:[#allocation7 + $0x1f8] sm:$0xff]  ;;  %v6603_v47 = vld [vmem:[#allocation58_spill] sm:$0xff] }
  0x6e   :  { %v2932_v52 = vmul.f32 %v165_v13, %v6603_v47  ;;  %v6604_v0 = vld [vmem:[#allocation59_spill] sm:$0xff]  ;;  %v6605_v10 = vld [vmem:[#allocation60_spill] sm:$0xff]  ;;  %v6611_v61 = vld [vmem:[#allocation62_spill] sm:$0xff] }
  0x6f   :  { %6600 = vst [vmem:[#allocation93_spill] sm:$0xff] %v2924_v53  ;;  %6602 = vst [vmem:[#allocation94_spill] sm:$0xff] %v2929_v27  ;;  %v2935_v51 = vmul.f32 %v166_v46, %v6604_v0  ;;  %v2938_v41 = vmul.f32 %v167_v60, %v6605_v10  ;;  %v6607_v62 = vld [vmem:[#allocation28_spill] sm:$0xff]  ;;  %v6610_v53 = vld [vmem:[#allocation61_spill] sm:$0xff]  ;;  %v2949_v3 = vmul.f32 %v169_v58, %v6611_v61  ;;  %v6614_v46 = vmax.f32 %v2570_v25, 0.0 }
  0x70   :  { %v6608_v4 = vmax.f32 %v6607_v62, 0.0  ;;  %v2946_v45 = vmul.f32 %v168_v14, %v6610_v53  ;;  %v6612_v27 = vld [vmem:[#allocation63_spill] sm:$0xff]  ;;  %v6616_v60 = vld [vmem:[#allocation64_spill] sm:$0xff]  ;;  %v6621_v58 = vmax.f32 %v2572_v26, 0.0 }
  0x71   :  { %6606 = vst [vmem:[#allocation95_spill] sm:$0xff] %v2938_v41  ;;  %v2952_v13 = vmul.f32 %v170_v22, %v6612_v27  ;;  %v2957_v0 = vsub.f32 %v6614_v46, %v2770_v18  ;;  %v2960_v10 = vmul.f32 %v171_v7, %v6616_v60  ;;  %v6617_v41 = vld [vmem:[#allocation65_spill] sm:$0xff]  ;;  %v6623_v22 = vld [vmem:[#allocation67_spill] sm:$0xff]  ;;  %v6718_v19 = vld [vmem:[#allocation88_spill] sm:$0xff] }
  0x72   :  { %v2943_v2 = vsub.f32 %v6608_v4, %v2763_v34  ;;  %v2963_v34 = vmul.f32 %v172_v17, %v6617_v41  ;;  %v6619_v4 = vld [vmem:[#allocation66_spill] sm:$0xff]  ;;  %v2974_v27 = vmul.f32 %v174_v8, %v6623_v22  ;;  %v6627_v7 = vld [vmem:[#allocation29_spill] sm:$0xff]  ;;  %v6630_v17 = vmax.f32 %v2579_v31, 0.0  ;;  %v6634_v8 = vld [vmem:[#allocation31_spill] sm:$0xff] }
  0x73   :  { %6613 = vst [vmem:[#allocation96_spill] sm:$0xff] %v2952_v13  ;;  %6615 = vst [vmem:[#allocation97_spill] sm:$0xff] %v2957_v0  ;;  %v2966_v14 = vmul.f32 %v173_v59, %v6619_v4  ;;  %v6625_v13 = vld [vmem:[#allocation68_spill] sm:$0xff]  ;;  %v6628_v46 = vmax.f32 %v6627_v7, 0.0  ;;  %v6725_v31 = vld [vmem:[#allocation90_spill] sm:$0xff] }
  0x74   :  { %6609 = vst [vmem:[#allocation28_spill] sm:$0xff] %v2943_v2  ;;  %6618 = vst [vmem:[#allocation98_spill] sm:$0xff] %v2963_v34  ;;  %v2971_v2 = vsub.f32 %v6621_v58, %v2773_v16  ;;  %v2977_v18 = vmul.f32 %v175_v23, %v6625_v13  ;;  %v2987_v59 = vsub.f32 %v6630_v17, %v2783_v11  ;;  %v6632_v16 = vmax.f32 %v2581_v32, 0.0  ;;  %v6641_v17 = vld [vmem:[#allocation33_spill] sm:$0xff]  ;;  %v6762_v22 = vld [vmem:[#allocation14_spill] sm:$0xff] }
  0x75   :  { %6620 = vst [vmem:[#allocation99_spill] sm:$0xff] %v2966_v14  ;;  %6624 = vst [vmem:[#allocation101_spill] sm:$0xff] %v2974_v27  ;;  %v2982_v0 = vsub.f32 %v6628_v46, %v2776_v36  ;;  %v6635_v27 = vmax.f32 %v6634_v8, 0.0  ;;  %v6639_v46 = vmax.f32 %v2590_v38, 0.0  ;;  %v6642_v14 = vmax.f32 %v6641_v17, 0.0  ;;  %v6706_v34 = vld [vmem:[#allocation85_spill] sm:$0xff] }
  0x76   :  { %6622 = vst [vmem:[#allocation100_spill] sm:$0xff] %v2971_v2  ;;  %6626 = vst [vmem:[#allocation102_spill] sm:$0xff] %v2977_v18  ;;  %v2992_v58 = vsub.f32 %v6632_v16, %v2786_v12  ;;  %v6637_v18 = vmax.f32 %v2588_v37, 0.0  ;;  %v6644_v16 = vmax.f32 %v2597_v43, 0.0  ;;  %v6714_v2 = vld [vmem:[#allocation87_spill] sm:$0xff] }
  0x77   :  { %6629 = vst [vmem:[#allocation29_spill] sm:$0xff] %v2982_v0  ;;  %6631 = vst [vmem:[#allocation103_spill] sm:$0xff] %v2987_v59  ;;  %v2997_v23 = vsub.f32 %v6635_v27, %v2789_v54  ;;  %v3007_v11 = vsub.f32 %v6639_v46, %v2799_v42  ;;  %v3012_v12 = vsub.f32 %v6642_v14, %v2802_v24  ;;  %v6646_v27 = vmax.f32 %v2599_v44, 0.0  ;;  %v6651_v46 = vld [vmem:[#allocation35_spill] sm:$0xff]  ;;  %v6654_v14 = vld [vmem:[#allocation36_spill] sm:$0xff] }
  0x78   :  { %6633 = vst [vmem:[#allocation104_spill] sm:$0xff] %v2992_v58  ;;  %v3002_v36 = vsub.f32 %v6637_v18, %v2796_v28  ;;  %v3017_v54 = vsub.f32 %v6644_v16, %v2809_v29  ;;  %v6648_v18 = vld [vmem:[#allocation34_spill] sm:$0xff]  ;;  %v6657_v16 = vld [vmem:[#allocation77_spill] sm:$0xff]  ;;  %v6687_v59 = vld [vmem:[#allocation83_spill] sm:$0xff] }
  0x79   :  { %6636 = vst [vmem:[#allocation31_spill] sm:$0xff] %v2997_v23  ;;  %6640 = vst [vmem:[#allocation106_spill] sm:$0xff] %v3007_v11  ;;  %v3022_v28 = vsub.f32 %v6646_v27, %v2812_v30  ;;  %v6652_v11 = vmax.f32 %v6651_v46, 0.0  ;;  %v6661_v27 = vld [vmem:[#allocation38_spill] sm:$0xff]  ;;  %v6729_v37 = vld [vmem:[#allocation91_spill] sm:$0xff] }
  0x7a   :  { %6638 = vst [vmem:[#allocation105_spill] sm:$0xff] %v3002_v36  ;;  %6643 = vst [vmem:[#allocation33_spill] sm:$0xff] %v3012_v12  ;;  %v6649_v36 = vmax.f32 %v6648_v18, 0.0  ;;  %v6655_v12 = vmax.f32 %v6654_v14, 0.0 }
  0x7b   :  { %6645 = vst [vmem:[#allocation107_spill] sm:$0xff] %v3017_v54  ;;  %6647 = vst [vmem:[#allocation108_spill] sm:$0xff] %v3022_v28  ;;  %v3032_v24 = vsub.f32 %v6652_v11, %v2822_v48  ;;  %v6658_v54 = vld [vmem:[#allocation37_spill] sm:$0xff]  ;;  %v6662_v28 = vmax.f32 %v6661_v27, 0.0  ;;  %v6666_v11 = vld [vmem:[#allocation79_spill] sm:$0xff] }
  0x7c   :  { %v3027_v42 = vsub.f32 %v6649_v36, %v2815_v63  ;;  %v3037_v29 = vsub.f32 %v6655_v12, %v2825_v57  ;;  %v6659_v23 = vmax.f32 %v6658_v54, 0.0  ;;  %v6664_v36 = vmax.f32 %v2617_v56, 0.0  ;;  %v6670_v12 = vld [vmem:[#allocation40_spill] sm:$0xff]  ;;  %v6739_v27 = vld [vmem:[#allocation93_spill] sm:$0xff] }
  0x7d   :  { %6653 = vst [vmem:[#allocation35_spill] sm:$0xff] %v3032_v24  ;;  %v3047_v63 = vsub.f32 %v6662_v28, %v2835_v1  ;;  %v6667_v24 = vld [vmem:[#allocation39_spill] sm:$0xff]  ;;  %v6676_v28 = vld [vmem:[#allocation81_spill] sm:$0xff] }
  0x7e   :  { %6650 = vst [vmem:[#allocation34_spill] sm:$0xff] %v3027_v42  ;;  %6656 = vst [vmem:[#allocation36_spill] sm:$0xff] %v3037_v29  ;;  %v3042_v30 = vsub.f32 %v6659_v23, %v6657_v16  ;;  %v3052_v48 = vsub.f32 %v6664_v36, %v2838_v40  ;;  %v6668_v42 = vmax.f32 %v6667_v24, 0.0  ;;  %v6671_v29 = vmax.f32 %v6670_v12, 0.0  ;;  %v6673_v16 = vld [vmem:[#allocation41_spill] sm:$0xff]  ;;  %v6680_v36 = vld [vmem:[#allocation43_spill] sm:$0xff] }
  0x7f   :  { %6663 = vst [vmem:[#allocation37_spill] sm:$0xff] %v3047_v63  ;;  %v6677_v63 = vld [vmem:[#allocation42_spill] sm:$0xff] }
  0x80   :  { %6660 = vst [vmem:[#allocation77_spill] sm:$0xff] %v3042_v30  ;;  %6665 = vst [vmem:[#allocation109_spill] sm:$0xff] %v3052_v48  ;;  %v3057_v57 = vsub.f32 %v6668_v42, %v6666_v11  ;;  %v3062_v23 = vsub.f32 %v6671_v29, %v2848_v35  ;;  %v6674_v30 = vmax.f32 %v6673_v16, 0.0  ;;  %v6678_v58 = vmax.f32 %v6677_v63, 0.0  ;;  %v6683_v11 = vld [vmem:[#allocation44_spill] sm:$0xff] }
  0x81   :  { %v6681_v48 = vmax.f32 %v6680_v36, 0.0 }
  0x82   :  { %6669 = vst [vmem:[#allocation79_spill] sm:$0xff] %v3057_v57  ;;  %6672 = vst [vmem:[#allocation39_spill] sm:$0xff] %v3062_v23  ;;  %v3067_v1 = vsub.f32 %v6674_v30, %v2851_v50  ;;  %v3072_v40 = vsub.f32 %v6678_v58, %v6676_v28  ;;  %v6684_v57 = vmax.f32 %v6683_v11, 0.0  ;;  %v6688_v50 = vld [vmem:[#allocation45_spill] sm:$0xff]  ;;  %v6703_v58 = vld [vmem:[#allocation23_spill] sm:$0xff] }
  0x83   :  { %v3077_v42 = vsub.f32 %v6681_v48, %v2862_v21  ;;  %v6689_v30 = vmax.f32 %v6688_v50, 0.0  ;;  %v6694_v21 = vld [vmem:[#allocation46_spill] sm:$0xff]  ;;  %v6704_v28 = vld [vmem:[#allocation24_spill] sm:$0xff] }
  0x84   :  { %6675 = vst [vmem:[#allocation40_spill] sm:$0xff] %v3067_v1  ;;  %6679 = vst [vmem:[#allocation41_spill] sm:$0xff] %v3072_v40  ;;  %v3082_v35 = vsub.f32 %v6684_v57, %v2865_v33  ;;  %v6695_v48 = vmax.f32 %v6694_v21, 0.0  ;;  %v6697_v33 = vld [vmem:[#allocation20_spill] sm:$0xff]  ;;  %v6710_v57 = vld [vmem:[#allocation26_spill] sm:$0xff] }
  0x85   :  { %6682 = vst [vmem:[#allocation81_spill] sm:$0xff] %v3077_v42  ;;  %v3088_v1 = vsub.f32 %v6689_v30, %v6687_v59  ;;  %v6700_v59 = vld [vmem:[#allocation47_spill] sm:$0xff] }
  0x86   :  { %6685 = vst [vmem:[#allocation42_spill] sm:$0xff] %v3082_v35  ;;  %v3096_v42 = vsub.f32 %v6695_v48, %v2876_v55  ;;  %v6698_v35 = vld [vmem:[#allocation21_spill] sm:$0xff]  ;;  %v6701_v30 = vmax.f32 %v6700_v59, 0.0  ;;  %v6707_v55 = vld [vmem:[#allocation48_spill] sm:$0xff] }
  0x87   :  { %6690 = vst [vmem:[#allocation43_spill] sm:$0xff] %v3088_v1  ;;  %v6708_v48 = vmax.f32 %v6707_v55, 0.0 }
  0x88   :  { %6696 = vst [vmem:[#allocation44_spill] sm:$0xff] %v3096_v42  ;;  %v3104_v1 = vsub.f32 %v6701_v30, %v2879_v39  ;;  %v6711_v39 = vld [vmem:[#allocation49_spill] sm:$0xff] }
  0x89   :  { %v3112_v42 = vsub.f32 %v6708_v48, %v6706_v34  ;;  %v6712_v30 = vmax.f32 %v6711_v39, 0.0  ;;  %v6715_v34 = vld [vmem:[#allocation50_spill] sm:$0xff] }
  0x8a   :  { %6702 = vst [vmem:[#allocation83_spill] sm:$0xff] %v3104_v1  ;;  %v6716_v48 = vmax.f32 %v6715_v34, 0.0 }
  0x8b   :  { %6709 = vst [vmem:[#allocation45_spill] sm:$0xff] %v3112_v42  ;;  %v3120_v1 = vsub.f32 %v6712_v30, %v2890_v5  ;;  %v6719_v5 = vld [vmem:[#allocation51_spill] sm:$0xff] }
  0x8c   :  { %v3128_v42 = vsub.f32 %v6716_v48, %v6714_v2  ;;  %v6720_v30 = vmax.f32 %v6719_v5, 0.0  ;;  %v6722_v2 = vld [vmem:[#allocation52_spill] sm:$0xff] }
  0x8d   :  { %6713 = vst [vmem:[#allocation46_spill] sm:$0xff] %v3120_v1  ;;  %v6723_v48 = vmax.f32 %v6722_v2, 0.0 }
  0x8e   :  { %6717 = vst [vmem:[#allocation20_spill] sm:$0xff] %v3128_v42  ;;  %v3136_v1 = vsub.f32 %v6720_v30, %v6718_v19  ;;  %v6726_v19 = vld [vmem:[#allocation53_spill] sm:$0xff] }
  0x8f   :  { %v3144_v42 = vsub.f32 %v6723_v48, %v2904_v6  ;;  %v6727_v30 = vmax.f32 %v6726_v19, 0.0  ;;  %v6730_v6 = vld [vmem:[#allocation54_spill] sm:$0xff] }
  0x90   :  { %6721 = vst [vmem:[#allocation21_spill] sm:$0xff] %v3136_v1  ;;  %v6731_v48 = vmax.f32 %v6730_v6, 0.0 }
  0x91   :  { %6724 = vst [vmem:[#allocation47_spill] sm:$0xff] %v3144_v42  ;;  %v3152_v1 = vsub.f32 %v6727_v30, %v6725_v31  ;;  %v6733_v31 = vld [vmem:[#allocation55_spill] sm:$0xff] }
  0x92   :  { %v3160_v42 = vsub.f32 %v6731_v48, %v6729_v37  ;;  %v6734_v30 = vmax.f32 %v6733_v31, 0.0  ;;  %v6736_v37 = vld [vmem:[#allocation56_spill] sm:$0xff] }
  0x93   :  { %6728 = vst [vmem:[#allocation23_spill] sm:$0xff] %v3152_v1  ;;  %v6737_v48 = vmax.f32 %v6736_v37, 0.0 }
  0x94   :  { %6732 = vst [vmem:[#allocation24_spill] sm:$0xff] %v3160_v42  ;;  %v3168_v1 = vsub.f32 %v6734_v30, %v2918_v49  ;;  %v6740_v49 = vld [vmem:[#allocation57_spill] sm:$0xff] }
  0x95   :  { %v3176_v42 = vsub.f32 %v6737_v48, %v2921_v9  ;;  %v6741_v30 = vmax.f32 %v6740_v49, 0.0  ;;  %v6743_v9 = vmax.f32 %v6603_v47, 0.0 }
  0x96   :  { %6735 = vst [vmem:[#allocation85_spill] sm:$0xff] %v3168_v1 }
  0x97   :  { %6738 = vst [vmem:[#allocation48_spill] sm:$0xff] %v3176_v42  ;;  %v3184_v1 = vsub.f32 %v6741_v30, %v6739_v27  ;;  %v3192_v48 = vsub.f32 %v6743_v9, %v2932_v52  ;;  %v6745_v27 = vld [vmem:[#allocation59_spill] sm:$0xff]  ;;  %v6749_v52 = vld [vmem:[#allocation60_spill] sm:$0xff] }
  0x98   :  { %v6746_v30 = vmax.f32 %v6745_v27, 0.0  ;;  %v6748_v42 = vld [vmem:[#allocation95_spill] sm:$0xff]  ;;  %v6750_v9 = vmax.f32 %v6749_v52, 0.0 }
  0x99   :  { %6742 = vst [vmem:[#allocation26_spill] sm:$0xff] %v3184_v1  ;;  %6744 = vst [vmem:[#allocation49_spill] sm:$0xff] %v3192_v48  ;;  %v6776_v27 = vld [vmem:[#allocation19_spill] sm:$0xff] }
  0x9a   :  { %v3200_v1 = vsub.f32 %v6746_v30, %v2935_v51  ;;  %v3208_v48 = vsub.f32 %v6750_v9, %v6748_v42  ;;  %v6752_v51 = vmax.f32 %v6610_v53, 0.0  ;;  %v6754_v42 = vmax.f32 %v6611_v61, 0.0  ;;  %v6768_v61 = vld [vmem:[#allocation15_spill] sm:$0xff]  ;;  %v6772_v53 = vld [vmem:[#allocation17_spill] sm:$0xff] }
  0x9b   :  { %v6773_v23 = vand.u32 2147483647, %v6772_v53  ;;  %v6783_v53 = vand.u32 2147483647, %v6704_v28  ;;  %v6791_v28 = vand.u32 2147483647, %v6607_v62 }
  0x9c   :  { %6747 = vst [vmem:[#allocation87_spill] sm:$0xff] %v3200_v1  ;;  %6751 = vst [vmem:[#allocation50_spill] sm:$0xff] %v3208_v48  ;;  %v3216_v30 = vsub.f32 %v6752_v51, %v2946_v45  ;;  %v3224_v9 = vsub.f32 %v6754_v42, %v2949_v3  ;;  %v6756_v48 = vld [vmem:[#allocation96_spill] sm:$0xff]  ;;  %v6757_v45 = vld [vmem:[#allocation63_spill] sm:$0xff]  ;;  %v6760_v3 = vmax.f32 %v6616_v60, 0.0 }
  0x9d   :  { %v6758_v51 = vmax.f32 %v6757_v45, 0.0  ;;  %v6769_v60 = vand.u32 2147483647, %v6768_v61  ;;  %v435_v4 = vsub.f32 0.0, %v6773_v23  ;;  %v6779_v45 = vand.u32 2147483647, %v6698_v35 }
  0x9e   :  { %6753 = vst [vmem:[#allocation88_spill] sm:$0xff] %v3216_v30  ;;  %6755 = vst [vmem:[#allocation51_spill] sm:$0xff] %v3224_v9  ;;  %v3240_v42 = vsub.f32 %v6760_v3, %v2960_v10  ;;  %v6763_v9 = vand.u32 2147483647, %v6762_v22  ;;  %v6770_v3 = vld [vmem:[#allocation16_spill] sm:$0xff]  ;;  %v6774_v22 = vld [vmem:[#allocation18_spill] sm:$0xff] }
  0x9f   :  { %v3232_v30 = vsub.f32 %v6758_v51, %v6756_v48  ;;  %v6764_v48 = vld [vmem:[#allocation98_spill] sm:$0xff]  ;;  %v6765_v51 = vmax.f32 %v6617_v41, 0.0  ;;  %v433_v10 = vsub.f32 0.0, %v6769_v60  ;;  %v6777_v41 = vand.u32 2147483647, %v6776_v27 }
  0xa0   :  { %6761 = vst [vmem:[#allocation90_spill] sm:$0xff] %v3240_v42  ;;  %v432_v1 = vsub.f32 0.0, %v6763_v9  ;;  %v6771_v42 = vand.u32 2147483647, %v6770_v3  ;;  %v6775_v9 = vand.u32 2147483647, %v6774_v22 }
  0xa1   :  { %6759 = vst [vmem:[#allocation52_spill] sm:$0xff] %v3232_v30  ;;  %v3249_v0 = vsub.f32 %v6765_v51, %v6764_v48  ;;  %v437_v48 = vsub.f32 0.0, %v6777_v41  ;;  %v6778_v51 = vand.u32 2147483647, %v6697_v33  ;;  %v6780_v61 = vld [vmem:[#allocation22_spill] sm:$0xff]  ;;  %v442_v23 = vsub.f32 0.0, %v6783_v53 }
  0xa2   :  { %v434_v29 = vsub.f32 0.0, %v6771_v42  ;;  %v436_v52 = vsub.f32 0.0, %v6775_v9  ;;  %v6781_v60 = vand.u32 2147483647, %v6780_v61  ;;  %v6782_v42 = vand.u32 2147483647, %v6703_v58 }
  0xa3   :  { %6766 = vst [vmem:[#allocation53_spill] sm:$0xff] %v3249_v0  ;;  %v438_v30 = vsub.f32 0.0, %v6778_v51  ;;  %v439_v0 = vsub.f32 0.0, %v6779_v45  ;;  %v6784_v22 = vld [vmem:[#allocation25_spill] sm:$0xff]  ;;  %v6786_v41 = vand.u32 2147483647, %v6710_v57 }
  0xa4   :  { %v440_v13 = vsub.f32 0.0, %v6781_v60  ;;  %v441_v3 = vsub.f32 0.0, %v6782_v42  ;;  %v6785_v9 = vand.u32 2147483647, %v6784_v22  ;;  %v496_v33 = vmul.f32 1.442695, %v432_v1 }
  0xa5   :  { %v444_v27 = vsub.f32 0.0, %v6786_v41  ;;  %v6787_v51 = vand.u32 2147483647, %v2556_v15  ;;  %v6788_v45 = vld [vmem:[#allocation27_spill] sm:$0xff]  ;;  %v6790_v60 = vand.u32 2147483647, %v2563_v20 }
  0xa6   :  { %v443_v40 = vsub.f32 0.0, %v6785_v9  ;;  %v6789_v47 = vand.u32 2147483647, %v6788_v45  ;;  %v498_v42 = vmul.f32 1.442695, %v433_v10  ;;  %v448_v53 = vsub.f32 0.0, %v6791_v28 }
  0xa7   :  { %v445_v35 = vsub.f32 0.0, %v6787_v51  ;;  %v447_v58 = vsub.f32 0.0, %v6790_v60  ;;  %v6792_v22 = vand.u32 2147483647, %v2570_v25  ;;  %v6793_v57 = vand.u32 2147483647, %v2572_v26 }
  0xa8   :  { %v446_v61 = vsub.f32 0.0, %v6789_v47  ;;  %v500_v15 = vmul.f32 1.442695, %v434_v29  ;;  %v6794_v41 = vand.u32 2147483647, %v6627_v7  ;;  %v6795_v47 = vld [vmem:[#allocation30_spill] sm:$0xff]  ;;  %1997 = vpow2.f32 %v496_v33 }
  0xa9   :  { %v3287_v9 = vsub.f32 0.0, %v6792_v22  ;;  %v3291_v1 = vsub.f32 0.0, %v6793_v57  ;;  %v6796_v20 = vand.u32 2147483647, %v6795_v47  ;;  %v6797_v62 = vand.u32 2147483647, %v2581_v32 }
  0xaa   :  { %v3295_v51 = vsub.f32 0.0, %v6794_v41  ;;  %v502_v25 = vmul.f32 1.442695, %v435_v4  ;;  %v6798_v60 = vand.u32 2147483647, %v6634_v8  ;;  %v6799_v26 = vld [vmem:[#allocation32_spill] sm:$0xff]  ;;  %1999 = vpow2.f32 %v498_v42 }
  0xab   :  { %v3299_v45 = vsub.f32 0.0, %v6796_v20  ;;  %v3303_v10 = vsub.f32 0.0, %v6797_v62  ;;  %v6800_v22 = vand.u32 2147483647, %v6799_v26  ;;  %v504_v7 = vmul.f32 1.442695, %v436_v52 }
  0xac   :  { %v3307_v28 = vsub.f32 0.0, %v6798_v60  ;;  %v6801_v57 = vand.u32 2147483647, %v2590_v38  ;;  %v6802_v47 = vand.u32 2147483647, %v6641_v17  ;;  %2001 = vpow2.f32 %v500_v15  ;;  %v6809_v15 = vld [vmem:[#allocation38_spill] sm:$0xff] }
  0xad   :  { %v3311_v29 = vsub.f32 0.0, %v6800_v22  ;;  %v506_v4 = vmul.f32 1.442695, %v437_v48  ;;  %v6803_v8 = vand.u32 2147483647, %v2597_v43  ;;  %2003 = vpow2.f32 %v502_v25 }
  0xae   :  { %v3315_v41 = vsub.f32 0.0, %v6801_v57  ;;  %v3319_v32 = vsub.f32 0.0, %v6802_v47  ;;  %v6804_v62 = vand.u32 2147483647, %v2599_v44  ;;  %v508_v52 = vmul.f32 1.442695, %v438_v30 }
  0xaf   :  { %v3323_v20 = vsub.f32 0.0, %v6803_v8  ;;  %v6805_v38 = vand.u32 2147483647, %v6648_v18  ;;  %v6806_v17 = vand.u32 2147483647, %v6651_v46  ;;  %2005 = vpow2.f32 %v504_v7 }
  0xb0   :  { %v3327_v60 = vsub.f32 0.0, %v6804_v62  ;;  %v510_v48 = vmul.f32 1.442695, %v439_v0  ;;  %v6807_v43 = vand.u32 2147483647, %v6654_v14  ;;  %2007 = vpow2.f32 %v506_v4 }
  0xb1   :  { %v3331_v33 = vsub.f32 0.0, %v6805_v38  ;;  %v3335_v26 = vsub.f32 0.0, %v6806_v17  ;;  %v6808_v44 = vand.u32 2147483647, %v6658_v54  ;;  %v512_v30 = vmul.f32 1.442695, %v440_v13 }
  0xb2   :  { %v3339_v42 = vsub.f32 0.0, %v6807_v43  ;;  %v6810_v18 = vand.u32 2147483647, %v6809_v15  ;;  %v6811_v46 = vand.u32 2147483647, %v2617_v56  ;;  %2009 = vpow2.f32 %v508_v52 }
  0xb3   :  { %v3343_v22 = vsub.f32 0.0, %v6808_v44  ;;  %v514_v0 = vmul.f32 1.442695, %v441_v3  ;;  %v6812_v14 = vand.u32 2147483647, %v6667_v24  ;;  %2011 = vpow2.f32 %v510_v48  ;;  %v3385_v48 = vpop.eup %1997 }
  0xb4   :  { %v3347_v57 = vsub.f32 0.0, %v6810_v18  ;;  %v3351_v47 = vsub.f32 0.0, %v6811_v46  ;;  %v6813_v54 = vand.u32 2147483647, %v6670_v12  ;;  %v516_v13 = vmul.f32 1.442695, %v442_v23 }
  0xb5   :  { %v3355_v25 = vsub.f32 0.0, %v6812_v14  ;;  %v6814_v7 = vand.u32 2147483647, %v6673_v16  ;;  %v6815_v56 = vand.u32 2147483647, %v6677_v63  ;;  %2013 = vpow2.f32 %v512_v30 }
  0xb6   :  { %v3359_v8 = vsub.f32 0.0, %v6813_v54  ;;  %v518_v3 = vmul.f32 1.442695, %v443_v40  ;;  %v6816_v24 = vand.u32 2147483647, %v6680_v36  ;;  %2015 = vpow2.f32 %v514_v0 }
  0xb7   :  { %v3363_v62 = vsub.f32 0.0, %v6814_v7  ;;  %v3367_v38 = vsub.f32 0.0, %v6815_v56  ;;  %v6817_v12 = vand.u32 2147483647, %v6683_v11  ;;  %v520_v23 = vmul.f32 1.442695, %v444_v27  ;;  %v3395_v27 = vpop.eup %1999 }
  0xb8   :  { %v3371_v4 = vsub.f32 0.0, %v6816_v24  ;;  %v6818_v16 = vand.u32 2147483647, %v6688_v50  ;;  %v6819_v63 = vand.u32 2147483647, %v6694_v21  ;;  %2017 = vpow2.f32 %v516_v13  ;;  %v3405_v46 = vpop.eup %2001 }
  0xb9   :  { %v3375_v17 = vsub.f32 0.0, %v6817_v12  ;;  %v522_v40 = vmul.f32 1.442695, %v445_v35  ;;  %v6820_v36 = vand.u32 2147483647, %v6700_v59  ;;  %2019 = vpow2.f32 %v518_v3  ;;  %v3415_v54 = vpop.eup %2003 }
  0xba   :  { %v3379_v52 = vsub.f32 0.0, %v6818_v16  ;;  %v3383_v43 = vsub.f32 0.0, %v6819_v63  ;;  %v6821_v11 = vand.u32 2147483647, %v6707_v55  ;;  %v524_v50 = vmul.f32 1.442695, %v446_v61  ;;  %v3426_v56 = vpop.eup %2005 }
  0xbb   :  { %v3389_v44 = vsub.f32 0.0, %v6820_v36  ;;  %v6822_v21 = vand.u32 2147483647, %v6711_v39  ;;  %v6823_v35 = vand.u32 2147483647, %v6715_v34  ;;  %2021 = vpow2.f32 %v520_v23  ;;  %v3437_v12 = vpop.eup %2007 }
  0xbc   :  { %v3393_v30 = vsub.f32 0.0, %v6821_v11  ;;  %v526_v59 = vmul.f32 1.442695, %v447_v58  ;;  %v6824_v55 = vand.u32 2147483647, %v6719_v5  ;;  %2023 = vpow2.f32 %v522_v40  ;;  %v3448_v40 = vpop.eup %2009 }
  0xbd   :  { %v3399_v15 = vsub.f32 0.0, %v6822_v21  ;;  %v3403_v18 = vsub.f32 0.0, %v6823_v35  ;;  %v6825_v61 = vand.u32 2147483647, %v6722_v2  ;;  %v528_v39 = vmul.f32 1.442695, %v448_v53  ;;  %v3459_v35 = vpop.eup %2011 }
  0xbe   :  { %v3409_v0 = vsub.f32 0.0, %v6824_v55  ;;  %v6826_v34 = vand.u32 2147483647, %v6726_v19  ;;  %v6827_v58 = vand.u32 2147483647, %v6730_v6  ;;  %2025 = vpow2.f32 %v524_v50  ;;  %v6837_v55 = vld [vmem:[#allocation61_spill] sm:$0xff] }
  0xbf   :  { %v3413_v14 = vsub.f32 0.0, %v6825_v61  ;;  %v530_v5 = vmul.f32 1.442695, %v3287_v9  ;;  %v6828_v2 = vand.u32 2147483647, %v6733_v31  ;;  %v6831_v9 = vld [vmem:[#allocation58_spill] sm:$0xff]  ;;  %2027 = vpow2.f32 %v526_v59 }
  0xc0   :  { %v3419_v13 = vsub.f32 0.0, %v6826_v34  ;;  %v3423_v7 = vsub.f32 0.0, %v6827_v58  ;;  %v6829_v53 = vand.u32 2147483647, %v6736_v37  ;;  %v532_v19 = vmul.f32 1.442695, %v3291_v1 }
  0xc1   :  { %v3430_v3 = vsub.f32 0.0, %v6828_v2  ;;  %v6830_v6 = vand.u32 2147483647, %v6740_v49  ;;  %v6832_v16 = vand.u32 2147483647, %v6831_v9  ;;  %v6833_v37 = vld [vmem:[#allocation59_spill] sm:$0xff]  ;;  %2029 = vpow2.f32 %v528_v39 }
  0xc2   :  { %v3434_v24 = vsub.f32 0.0, %v6829_v53  ;;  %v534_v31 = vmul.f32 1.442695, %v3295_v51  ;;  %v6834_v36 = vand.u32 2147483647, %v6833_v37  ;;  %v6835_v1 = vld [vmem:[#allocation60_spill] sm:$0xff]  ;;  %2031 = vpow2.f32 %v530_v5  ;;  %v3470_v53 = vpop.eup %2013 }
  0xc3   :  { %v3441_v23 = vsub.f32 0.0, %v6830_v6  ;;  %v3445_v63 = vsub.f32 0.0, %v6832_v16  ;;  %v6836_v50 = vand.u32 2147483647, %v6835_v1  ;;  %v536_v49 = vmul.f32 1.442695, %v3299_v45  ;;  %v3481_v1 = vpop.eup %2015 }
  0xc4   :  { %v3452_v11 = vsub.f32 0.0, %v6834_v36  ;;  %v6838_v61 = vand.u32 2147483647, %v6837_v55  ;;  %v6839_v51 = vld [vmem:[#allocation62_spill] sm:$0xff]  ;;  %v538_v2 = vmul.f32 1.442695, %v3303_v10  ;;  %2033 = vpow2.f32 %v532_v19 }
  0xc5   :  { %v3456_v21 = vsub.f32 0.0, %v6836_v50  ;;  %v6840_v34 = vand.u32 2147483647, %v6839_v51  ;;  %v6841_v6 = vld [vmem:[#allocation63_spill] sm:$0xff]  ;;  %v6843_v45 = vld [vmem:[#allocation64_spill] sm:$0xff]  ;;  %6845 = vst [vmem:[#allocation91_spill] sm:$0xff] %v3481_v1  ;;  %2035 = vpow2.f32 %v534_v31 }
  0xc6   :  { %v3463_v59 = vsub.f32 0.0, %v6838_v61  ;;  %v6842_v9 = vand.u32 2147483647, %v6841_v6  ;;  %v6844_v16 = vand.u32 2147483647, %v6843_v45  ;;  %v6846_v50 = vld [vmem:[#allocation65_spill] sm:$0xff]  ;;  %v3492_v6 = vpop.eup %2017  ;;  %2037 = vpow2.f32 %v536_v49 }
  0xc7   :  { %v3467_v58 = vsub.f32 0.0, %v6840_v34  ;;  %v540_v36 = vmul.f32 1.442695, %v3307_v28  ;;  %v6847_v55 = vand.u32 2147483647, %v6846_v50  ;;  %v6848_v10 = vld [vmem:[#allocation66_spill] sm:$0xff]  ;;  %2039 = vpow2.f32 %v538_v2 }
  0xc8   :  { %v3474_v39 = vsub.f32 0.0, %v6842_v9  ;;  %v3478_v37 = vsub.f32 0.0, %v6844_v16  ;;  %v6849_v61 = vand.u32 2147483647, %v6848_v10  ;;  %v542_v34 = vmul.f32 1.442695, %v3311_v29 }
  0xc9   :  { %v3485_v5 = vsub.f32 0.0, %v6847_v55  ;;  %v6850_v9 = vld [vmem:[#allocation67_spill] sm:$0xff]  ;;  %v6852_v28 = vld [vmem:[#allocation68_spill] sm:$0xff]  ;;  %v544_v50 = vmul.f32 1.442695, %v3315_v41  ;;  %v3503_v55 = vpop.eup %2019  ;;  %2041 = vpow2.f32 %v540_v36 }
  0xca   :  { %v3489_v51 = vsub.f32 0.0, %v6849_v61  ;;  %v6851_v45 = vand.u32 2147483647, %v6850_v9  ;;  %v6853_v16 = vand.u32 2147483647, %v6852_v28  ;;  %v3508_v10 = vpop.eup %2021  ;;  %2043 = vpow2.f32 %v542_v34 }
  0xcb   :  { %v546_v31 = vmul.f32 1.442695, %v3319_v32  ;;  %v548_v29 = vmul.f32 1.442695, %v3323_v20  ;;  %v550_v61 = vmul.f32 1.442695, %v3327_v60  ;;  %v3513_v28 = vpop.eup %2023  ;;  %2045 = vpow2.f32 %v544_v50 }
  0xcc   :  { %v3496_v19 = vsub.f32 0.0, %v6851_v45  ;;  %v3500_v1 = vsub.f32 0.0, %v6853_v16  ;;  %v552_v45 = vmul.f32 1.442695, %v3331_v33  ;;  %v554_v16 = vmul.f32 1.442695, %v3335_v26  ;;  %v3518_v2 = vpop.eup %2025 }
  0xcd   :  { %v556_v49 = vmul.f32 1.442695, %v3339_v42  ;;  %v558_v41 = vmul.f32 1.442695, %v3343_v22  ;;  %v560_v32 = vmul.f32 1.442695, %v3347_v57  ;;  %v3523_v36 = vpop.eup %2027  ;;  %2047 = vpow2.f32 %v546_v31 }
  0xce   :  { %v562_v20 = vmul.f32 1.442695, %v3351_v47  ;;  %v564_v60 = vmul.f32 1.442695, %v3355_v25  ;;  %v566_v33 = vmul.f32 1.442695, %v3359_v8  ;;  %v3530_v47 = vpop.eup %2029  ;;  %2049 = vpow2.f32 %v548_v29 }
  0xcf   :  { %v568_v26 = vmul.f32 1.442695, %v3363_v62  ;;  %v570_v42 = vmul.f32 1.442695, %v3367_v38  ;;  %v572_v22 = vmul.f32 1.442695, %v3371_v4  ;;  %v3541_v62 = vpop.eup %2031  ;;  %2051 = vpow2.f32 %v550_v61 }
  0xd0   :  { %v3528_v57 = vmul.f32 1.442695, %v3375_v17  ;;  %v3533_v34 = vmul.f32 1.442695, %v3379_v52  ;;  %v3536_v25 = vmul.f32 1.442695, %v3383_v43  ;;  %v3552_v52 = vpop.eup %2033  ;;  %2053 = vpow2.f32 %v552_v45 }
  0xd1   :  { %v3539_v8 = vmul.f32 1.442695, %v3389_v44  ;;  %v3544_v38 = vmul.f32 1.442695, %v3393_v30  ;;  %v3547_v4 = vmul.f32 1.442695, %v3399_v15  ;;  %v3563_v30 = vpop.eup %2035  ;;  %2055 = vpow2.f32 %v554_v16 }
  0xd2   :  { %v3550_v17 = vmul.f32 1.442695, %v3403_v18  ;;  %v3555_v43 = vmul.f32 1.442695, %v3409_v0  ;;  %v3558_v44 = vmul.f32 1.442695, %v3413_v14  ;;  %v3574_v0 = vpop.eup %2037  ;;  %2057 = vpow2.f32 %v556_v49 }
  0xd3   :  { %v3561_v50 = vmul.f32 1.442695, %v3419_v13  ;;  %v3566_v15 = vmul.f32 1.442695, %v3423_v7  ;;  %v3569_v18 = vmul.f32 1.442695, %v3430_v3  ;;  %v3585_v7 = vpop.eup %2039  ;;  %2059 = vpow2.f32 %v558_v41 }
  0xd4   :  { %v3572_v31 = vmul.f32 1.442695, %v3434_v24  ;;  %v3577_v14 = vmul.f32 1.442695, %v3441_v23  ;;  %v3580_v13 = vmul.f32 1.442695, %v3445_v63  ;;  %v3594_v45 = vpop.eup %2041  ;;  %2061 = vpow2.f32 %v560_v32 }
  0xd5   :  { %v3583_v29 = vmul.f32 1.442695, %v3452_v11  ;;  %v3588_v3 = vmul.f32 1.442695, %v3456_v21  ;;  %v3591_v24 = vmul.f32 1.442695, %v3463_v59  ;;  %v3601_v16 = vpop.eup %2043  ;;  %2063 = vpow2.f32 %v562_v20 }
  0xd6   :  { %v627_v61 = vmul.f32 -0.5, %v3385_v48  ;;  %v3597_v23 = vmul.f32 1.442695, %v3467_v58  ;;  %v636_v63 = vmul.f32 -0.5, %v3395_v27  ;;  %v645_v11 = vmul.f32 -0.5, %v3405_v46  ;;  %6854 = vst [vmem:[#allocation54_spill] sm:$0xff] %v3601_v16  ;;  %v3612_v41 = vpop.eup %2045 }
  0xd7   :  { %v3604_v21 = vmul.f32 1.442695, %v3474_v39  ;;  %v3607_v59 = vmul.f32 1.442695, %v3478_v37  ;;  %v3610_v49 = vmul.f32 1.442695, %v3485_v5  ;;  %2065 = vpow2.f32 %v564_v60  ;;  %v3623_v39 = vpop.eup %2047 }
  0xd8   :  { %6855 = vst [vmem:[#allocation55_spill] sm:$0xff] %v3612_v41  ;;  %v3615_v58 = vmul.f32 1.442695, %v3489_v51  ;;  %v3618_v32 = vmul.f32 1.442695, %v3496_v19  ;;  %6856 = vst [vmem:[#allocation56_spill] sm:$0xff] %v3623_v39  ;;  %2067 = vpow2.f32 %v566_v33  ;;  %v3629_v41 = vpop.eup %2049 }
  0xd9   :  { %v3621_v20 = vmul.f32 1.442695, %v3500_v1  ;;  %v3626_v37 = vadd.f32 1.0, %v3385_v48  ;;  %v628_v5 = vadd.f32 1.0, %v627_v61  ;;  %v654_v9 = vmul.f32 -0.5, %v3415_v54  ;;  %6857 = vst [vmem:[#allocation93_spill] sm:$0xff] %v3629_v41  ;;  %v3632_v16 = vpop.eup %2051 }
  0xda   :  { %2069 = vpow2.f32 %v568_v26  ;;  %v637_v60 = vadd.f32 1.0, %v636_v63  ;;  %v646_v19 = vadd.f32 1.0, %v645_v11  ;;  %v3635_v1 = vadd.f32 1.0, %v3395_v27  ;;  %v3639_v61 = vpop.eup %2053 }
  0xdb   :  { %2071 = vpow2.f32 %v570_v42  ;;  %v663_v39 = vmul.f32 -0.5, %v3426_v56  ;;  %6858 = vst [vmem:[#allocation57_spill] sm:$0xff] %v3639_v61  ;;  %v3642_v41 = vadd.f32 1.0, %v3405_v46  ;;  %v672_v63 = vmul.f32 -0.5, %v3437_v12  ;;  %v3646_v11 = vpop.eup %2055 }
  0xdc   :  { %2073 = vpow2.f32 %v572_v22  ;;  %6859 = vst [vmem:[#allocation95_spill] sm:$0xff] %v3646_v11  ;;  %v3650_v42 = vmul.f32 %v3385_v48, %v628_v5  ;;  %v3653_v33 = vadd.f32 1.0, %v3415_v54  ;;  %v655_v51 = vadd.f32 1.0, %v654_v9  ;;  %v3655_v61 = vpop.eup %2057  ;;  %v6871_v5 = vld [vmem:[#allocation91_spill] sm:$0xff] }
  0xdd   :  { %2075 = vpow2.f32 %v3528_v57  ;;  %6861 = vst [vmem:[#allocation14_spill] sm:$0xff] %v3655_v61  ;;  %v3659_v22 = vmul.f32 %v3395_v27, %v637_v60  ;;  %v3662_v26 = vmul.f32 %v3405_v46, %v646_v19  ;;  %v681_v11 = vmul.f32 -0.5, %v3448_v40  ;;  %v3665_v57 = vpop.eup %2059 }
  0xde   :  { %6860 = vst [vmem:[#allocation96_spill] sm:$0xff] %v3650_v42  ;;  %2077 = vpow2.f32 %v3533_v34  ;;  %6864 = vst [vmem:[#allocation16_spill] sm:$0xff] %v3665_v57  ;;  %v3670_v9 = vadd.f32 1.0, %v3426_v56  ;;  %v664_v61 = vadd.f32 1.0, %v663_v39  ;;  %v3672_v42 = vpop.eup %2061  ;;  %v673_v34 = vadd.f32 1.0, %v672_v63 }
  0xdf   :  { %6862 = vst [vmem:[#allocation98_spill] sm:$0xff] %v3659_v22  ;;  %6863 = vst [vmem:[#allocation15_spill] sm:$0xff] %v3662_v26  ;;  %2079 = vpow2.f32 %v3536_v25  ;;  %v690_v60 = vmul.f32 -0.5, %v3459_v35  ;;  %v699_v19 = vmul.f32 -0.5, %v3470_v53  ;;  %v3677_v26 = vpop.eup %2063  ;;  %v3681_v25 = vmul.f32 %v3415_v54, %v655_v51 }
  0xe0   :  { %6865 = vst [vmem:[#allocation17_spill] sm:$0xff] %v3672_v42  ;;  %2081 = vpow2.f32 %v3539_v8  ;;  %6866 = vst [vmem:[#allocation18_spill] sm:$0xff] %v3677_v26  ;;  %v3685_v39 = vadd.f32 1.0, %v3437_v12  ;;  %v3692_v63 = vadd.f32 1.0, %v3448_v40  ;;  %v682_v26 = vadd.f32 1.0, %v681_v11 }
  0xe1   :  { %2083 = vpow2.f32 %v3544_v38  ;;  %6867 = vst [vmem:[#allocation19_spill] sm:$0xff] %v3681_v25  ;;  %v3687_v42 = vpop.eup %2065  ;;  %v3698_v38 = vmul.f32 %v3426_v56, %v664_v61  ;;  %v708_v25 = vmul.f32 -0.5, %v6871_v5  ;;  %v691_v8 = vadd.f32 1.0, %v690_v60 }
  0xe2   :  { %6868 = vst [vmem:[#allocation22_spill] sm:$0xff] %v3687_v42  ;;  %2085 = vpow2.f32 %v3547_v4  ;;  %v3694_v57 = vpop.eup %2067  ;;  %v3706_v4 = vmul.f32 %v3437_v12, %v673_v34  ;;  %v700_v11 = vadd.f32 1.0, %v699_v19  ;;  %v717_v51 = vmul.f32 -0.5, %v3492_v6 }
  0xe3   :  { %6869 = vst [vmem:[#allocation25_spill] sm:$0xff] %v3694_v57  ;;  %2087 = vpow2.f32 %v3550_v17  ;;  %6870 = vst [vmem:[#allocation27_spill] sm:$0xff] %v3698_v38  ;;  %v3712_v17 = vadd.f32 1.0, %v3459_v35  ;;  %v3723_v34 = vadd.f32 1.0, %v3470_v53  ;;  %v726_v60 = vmul.f32 -0.5, %v3503_v55 }
  0xe4   :  { %v3702_v42 = vpop.eup %2069  ;;  %2089 = vpow2.f32 %v3555_v43  ;;  %6873 = vst [vmem:[#allocation32_spill] sm:$0xff] %v3706_v4  ;;  %v3720_v43 = vmul.f32 %v3448_v40, %v682_v26  ;;  %v3731_v61 = vadd.f32 1.0, %v6871_v5  ;;  %v3740_v26 = vmul.f32 %v3470_v53, %v700_v11 }
  0xe5   :  { %6872 = vst [vmem:[#allocation30_spill] sm:$0xff] %v3702_v42  ;;  %v3708_v22 = vpop.eup %2071  ;;  %2091 = vpow2.f32 %v3558_v44  ;;  %v718_v19 = vadd.f32 1.0, %v717_v51  ;;  %v753_v11 = vmul.f32 -0.5, %v3518_v2  ;;  %v3763_v51 = vadd.f32 1.0, %v3503_v55 }
  0xe6   :  { %6874 = vst [vmem:[#allocation38_spill] sm:$0xff] %v3708_v22  ;;  %v3716_v57 = vpop.eup %2073  ;;  %2093 = vpow2.f32 %v3561_v50  ;;  %6876 = vst [vmem:[#allocation59_spill] sm:$0xff] %v3720_v43  ;;  %v3737_v50 = vmul.f32 %v3459_v35, %v691_v8  ;;  %v744_v8 = vmul.f32 -0.5, %v3513_v28 }
  0xe7   :  { %6875 = vst [vmem:[#allocation58_spill] sm:$0xff] %v3716_v57  ;;  %v3726_v44 = vpop.eup %2075  ;;  %2095 = vpow2.f32 %v3566_v15  ;;  %v709_v57 = vadd.f32 1.0, %v708_v25  ;;  %6880 = vst [vmem:[#allocation63_spill] sm:$0xff] %v3740_v26  ;;  %v3748_v25 = vadd.f32 1.0, %v3492_v6  ;;  %v762_v15 = vmul.f32 -0.5, %v3523_v36 }
  0xe8   :  { %6877 = vst [vmem:[#allocation60_spill] sm:$0xff] %v3726_v44  ;;  %v3733_v22 = vpop.eup %2077  ;;  %2097 = vpow2.f32 %v3569_v18  ;;  %6879 = vst [vmem:[#allocation62_spill] sm:$0xff] %v3737_v50  ;;  %v735_v44 = vmul.f32 -0.5, %v3508_v10  ;;  %v727_v18 = vadd.f32 1.0, %v726_v60  ;;  %v3770_v60 = vadd.f32 1.0, %v3508_v10 }
  0xe9   :  { %6878 = vst [vmem:[#allocation61_spill] sm:$0xff] %v3733_v22  ;;  %v3743_v42 = vpop.eup %2079  ;;  %2099 = vpow2.f32 %v3572_v31  ;;  %v3759_v31 = vmul.f32 %v6871_v5, %v709_v57  ;;  %v771_v57 = vmul.f32 -0.5, %v3530_v47 }
  0xea   :  { %6881 = vst [vmem:[#allocation64_spill] sm:$0xff] %v3743_v42  ;;  %v3750_v22 = vpop.eup %2081  ;;  %2101 = vpow2.f32 %v3577_v14  ;;  %v745_v14 = vadd.f32 1.0, %v744_v8  ;;  %v780_v8 = vmul.f32 -0.5, %v3541_v62 }
  0xeb   :  { %6882 = vst [vmem:[#allocation65_spill] sm:$0xff] %v3750_v22  ;;  %v3755_v26 = vpop.eup %2083  ;;  %2103 = vpow2.f32 %v3580_v13  ;;  %6884 = vst [vmem:[#allocation110_spill] sm:$0xff] %v3759_v31  ;;  %v3776_v13 = vmul.f32 %v3492_v6, %v718_v19  ;;  %v3809_v19 = vadd.f32 1.0, %v3523_v36 }
  0xec   :  { %6883 = vst [vmem:[#allocation91_spill] sm:$0xff] %v3755_v26  ;;  %v3765_v22 = vpop.eup %2085  ;;  %2105 = vpow2.f32 %v3583_v29  ;;  %v736_v26 = vadd.f32 1.0, %v735_v44  ;;  %v3784_v29 = vmul.f32 %v3503_v55, %v727_v18  ;;  %v754_v44 = vadd.f32 1.0, %v753_v11 }
  0xed   :  { %6885 = vst [vmem:[#allocation111_spill] sm:$0xff] %v3765_v22  ;;  %v3772_v42 = vpop.eup %2087  ;;  %2107 = vpow2.f32 %v3588_v3  ;;  %6887 = vst [vmem:[#allocation113_spill] sm:$0xff] %v3776_v13  ;;  %v3790_v3 = vadd.f32 1.0, %v3513_v28  ;;  %v3801_v18 = vadd.f32 1.0, %v3518_v2  ;;  %v772_v11 = vadd.f32 1.0, %v771_v57 }
  0xee   :  { %6886 = vst [vmem:[#allocation112_spill] sm:$0xff] %v3772_v42  ;;  %v3780_v22 = vpop.eup %2089  ;;  %2109 = vpow2.f32 %v3591_v24  ;;  %6889 = vst [vmem:[#allocation115_spill] sm:$0xff] %v3784_v29  ;;  %v3798_v24 = vmul.f32 %v3508_v10, %v736_v26  ;;  %v3818_v26 = vmul.f32 %v3518_v2, %v754_v44  ;;  %v807_v44 = vmul.f32 -0.5, %v3574_v0 }
  0xef   :  { %6888 = vst [vmem:[#allocation114_spill] sm:$0xff] %v3780_v22  ;;  %v3786_v31 = vpop.eup %2091  ;;  %2111 = vpow2.f32 %v3597_v23  ;;  %v3841_v57 = vadd.f32 1.0, %v3541_v62 }
  0xf0   :  { %6890 = vst [vmem:[#allocation116_spill] sm:$0xff] %v3786_v31  ;;  %v3794_v42 = vpop.eup %2093  ;;  %2113 = vpow2.f32 %v3604_v21  ;;  %6892 = vst [vmem:[#allocation118_spill] sm:$0xff] %v3798_v24  ;;  %v3815_v21 = vmul.f32 %v3513_v28, %v745_v14  ;;  %v798_v14 = vmul.f32 -0.5, %v3563_v30 }
  0xf1   :  { %6891 = vst [vmem:[#allocation117_spill] sm:$0xff] %v3794_v42  ;;  %v3804_v23 = vpop.eup %2095  ;;  %2115 = vpow2.f32 %v3607_v59  ;;  %v763_v42 = vadd.f32 1.0, %v762_v15  ;;  %6896 = vst [vmem:[#allocation122_spill] sm:$0xff] %v3818_v26  ;;  %v3826_v15 = vadd.f32 1.0, %v3530_v47  ;;  %v816_v59 = vmul.f32 -0.5, %v3585_v7 }
  0xf2   :  { %6893 = vst [vmem:[#allocation119_spill] sm:$0xff] %v3804_v23  ;;  %v3811_v31 = vpop.eup %2097  ;;  %2117 = vpow2.f32 %v3610_v49  ;;  %6895 = vst [vmem:[#allocation121_spill] sm:$0xff] %v3815_v21  ;;  %v789_v23 = vmul.f32 -0.5, %v3552_v52  ;;  %v781_v49 = vadd.f32 1.0, %v780_v8  ;;  %v3848_v8 = vadd.f32 1.0, %v3552_v52 }
  0xf3   :  { %6894 = vst [vmem:[#allocation120_spill] sm:$0xff] %v3811_v31  ;;  %v3821_v22 = vpop.eup %2099  ;;  %2119 = vpow2.f32 %v3615_v58  ;;  %v3837_v58 = vmul.f32 %v3523_v36, %v763_v42  ;;  %v825_v42 = vmul.f32 -0.5, %v3594_v45 }
  0xf4   :  { %6897 = vst [vmem:[#allocation123_spill] sm:$0xff] %v3821_v22  ;;  %v3828_v31 = vpop.eup %2101  ;;  %2121 = vpow2.f32 %v3618_v32  ;;  %v799_v32 = vadd.f32 1.0, %v798_v14  ;;  %v6909_v14 = vld [vmem:[#allocation54_spill] sm:$0xff] }
  0xf5   :  { %6898 = vst [vmem:[#allocation124_spill] sm:$0xff] %v3828_v31  ;;  %v3833_v26 = vpop.eup %2103  ;;  %2123 = vpow2.f32 %v3621_v20  ;;  %6900 = vst [vmem:[#allocation126_spill] sm:$0xff] %v3837_v58  ;;  %v3854_v20 = vmul.f32 %v3530_v47, %v772_v11  ;;  %v826_v11 = vadd.f32 1.0, %v825_v42 }
  0xf6   :  { %6899 = vst [vmem:[#allocation125_spill] sm:$0xff] %v3833_v26  ;;  %v3843_v31 = vpop.eup %2105  ;;  %2125 = vlog2.f32 %v3626_v37  ;;  %v790_v26 = vadd.f32 1.0, %v789_v23  ;;  %v3862_v37 = vmul.f32 %v3541_v62, %v781_v49  ;;  %v808_v23 = vadd.f32 1.0, %v807_v44 }
  0xf7   :  { %6901 = vst [vmem:[#allocation127_spill] sm:$0xff] %v3843_v31  ;;  %v3850_v22 = vpop.eup %2107  ;;  %2127 = vlog2.f32 %v3635_v1  ;;  %6903 = vst [vmem:[#allocation129_spill] sm:$0xff] %v3854_v20  ;;  %v3868_v1 = vadd.f32 1.0, %v3563_v30  ;;  %v3879_v49 = vadd.f32 1.0, %v3574_v0  ;;  %v834_v44 = vmul.f32 -0.5, %v6909_v14 }
  0xf8   :  { %6902 = vst [vmem:[#allocation128_spill] sm:$0xff] %v3850_v22  ;;  %v3858_v31 = vpop.eup %2109  ;;  %2129 = vlog2.f32 %v3642_v41  ;;  %6905 = vst [vmem:[#allocation131_spill] sm:$0xff] %v3862_v37  ;;  %v3876_v41 = vmul.f32 %v3552_v52, %v790_v26  ;;  %v3896_v26 = vmul.f32 %v3574_v0, %v808_v23  ;;  %v3914_v23 = vadd.f32 1.0, %v3594_v45 }
  0xf9   :  { %6904 = vst [vmem:[#allocation130_spill] sm:$0xff] %v3858_v31  ;;  %v3864_v58 = vpop.eup %2111  ;;  %2131 = vlog2.f32 %v3653_v33 }
  0xfa   :  { %6906 = vst [vmem:[#allocation132_spill] sm:$0xff] %v3864_v58  ;;  %v3872_v22 = vpop.eup %2113  ;;  %2133 = vlog2.f32 %v3670_v9  ;;  %6908 = vst [vmem:[#allocation134_spill] sm:$0xff] %v3876_v41  ;;  %v3887_v58 = vadd.f32 1.0, %v3585_v7  ;;  %v3893_v9 = vmul.f32 %v3563_v30, %v799_v32  ;;  %v6914_v41 = vld [vmem:[#allocation55_spill] sm:$0xff]  ;;  %v6919_v32 = vmov 0 }
  0xfb   :  { %6907 = vst [vmem:[#allocation133_spill] sm:$0xff] %v3872_v22  ;;  %v3882_v33 = vpop.eup %2115  ;;  %2135 = vlog2.f32 %v3685_v39  ;;  %v817_v22 = vadd.f32 1.0, %v816_v59  ;;  %6913 = vst [vmem:[#allocation137_spill] sm:$0xff] %v3896_v26  ;;  %v6916_v59 = vld [vmem:[#allocation56_spill] sm:$0xff] }
  0xfc   :  { %6910 = vst [vmem:[#allocation54_spill] sm:$0xff] %v3882_v33  ;;  %v3889_v31 = vpop.eup %2117  ;;  %2137 = vlog2.f32 %v3692_v63  ;;  %6912 = vst [vmem:[#allocation136_spill] sm:$0xff] %v3893_v9  ;;  %v843_v33 = vmul.f32 -0.5, %v6914_v41  ;;  %v852_v20 = vmul.f32 -0.5, %v6916_v59  ;;  %v6918_v63 = vand.u32 2147483647, %v3385_v48 }
  0xfd   :  { %6911 = vst [vmem:[#allocation135_spill] sm:$0xff] %v3889_v31  ;;  %v3899_v37 = vpop.eup %2119  ;;  %2139 = vlog2.f32 %v3712_v17  ;;  %v6922_v17 = vld [vmem:[#allocation93_spill] sm:$0xff]  ;;  %v3921_v42 = vmul.f32 %v3585_v7, %v817_v22  ;;  %v6926_v9 = vmov 0 }
  0xfe   :  { %6915 = vst [vmem:[#allocation55_spill] sm:$0xff] %v3899_v37  ;;  %v3904_v31 = vpop.eup %2121  ;;  %vm3908_vm0 = vcmp.lt.f32.partialorder %v6918_v63, 0.0004427343  ;;  %2141 = vlog2.f32 %v3723_v34  ;;  %v835_v37 = vadd.f32 1.0, %v834_v44  ;;  %v861_v26 = vmul.f32 -0.5, %v6922_v17 }
  0xff   :  { %6917 = vst [vmem:[#allocation138_spill] sm:$0xff] %v3904_v31  ;;  %v6920_v32 = vsel %vm3908_vm0, 4294967295, %v6919_v32  ;;  %v3917_v39 = vpop.eup %2123  ;;  %2143 = vlog2.f32 %v3731_v61  ;;  %6924 = vst [vmem:[#allocation140_spill] sm:$0xff] %v3921_v42  ;;  %v3925_v63 = vadd.f32 1.0, %v6909_v14  ;;  %v6925_v34 = vand.u32 2147483647, %v3395_v27 }
 0x100   :  { %6921 = vst [vmem:[#allocation139_spill] sm:$0xff] %v6920_v32  ;;  %6923 = vst [vmem:[#allocation93_spill] sm:$0xff] %v3917_v39  ;;  %v2126_v31 = vpop.eup %2125  ;;  %v6929_v44 = vand.u32 2147483647, %v3405_v46  ;;  %v6930_v39 = vmov 0  ;;  %2145 = vlog2.f32 %v3748_v25  ;;  %v3942_v61 = vadd.f32 1.0, %v6914_v41 }
 0x101   :  { %vm3929_vm1 = vcmp.lt.f32.partialorder %v6925_v34, 0.0004427343  ;;  %v844_v48 = vadd.f32 1.0, %v843_v33  ;;  %v2128_v42 = vpop.eup %2127  ;;  %v6933_v27 = vand.u32 2147483647, %v3415_v54  ;;  %v6934_v34 = vmov 0 }
 0x102   :  { %v6927_v9 = vsel %vm3929_vm1, 4294967295, %v6926_v9  ;;  %vm3935_vm2 = vcmp.lt.f32.partialorder %v6929_v44, 0.0004427343  ;;  %v6937_v46 = vand.u32 2147483647, %v3426_v56  ;;  %v6938_v44 = vmov 0  ;;  %v2130_v21 = vpop.eup %2129 }
 0x103   :  { %6928 = vst [vmem:[#allocation141_spill] sm:$0xff] %v6927_v9  ;;  %v6931_v39 = vsel %vm3935_vm2, 4294967295, %v6930_v39  ;;  %vm3946_vm3 = vcmp.lt.f32.partialorder %v6933_v27, 0.0004427343  ;;  %2147 = vlog2.f32 %v3763_v51  ;;  %v3958_v25 = vmul.f32 %v3594_v45, %v826_v11  ;;  %v2132_v11 = vpop.eup %2131  ;;  %v4789_v9 = vld [vmem:[#allocation7 + $0x170] sm:$0xff] }
 0x104   :  { %6932 = vst [vmem:[#allocation142_spill] sm:$0xff] %v6931_v39  ;;  %v6935_v34 = vsel %vm3946_vm3, 4294967295, %v6934_v34  ;;  %vm3952_vm4 = vcmp.lt.f32.partialorder %v6937_v46, 0.0004427343  ;;  %v853_v22 = vadd.f32 1.0, %v852_v20  ;;  %v6943_v27 = vmov 0 }
 0x105   :  { %6936 = vst [vmem:[#allocation143_spill] sm:$0xff] %v6935_v34  ;;  %v6939_v44 = vsel %vm3952_vm4, 4294967295, %v6938_v44  ;;  %6941 = vst [vmem:[#allocation145_spill] sm:$0xff] %v3958_v25  ;;  %v6942_v54 = vand.u32 2147483647, %v3437_v12  ;;  %2149 = vlog2.f32 %v3770_v60  ;;  %v3969_v56 = vmul.f32 %v6909_v14, %v835_v37  ;;  %v4777_v34 = vld [vmem:[#allocation7 + $0x158] sm:$0xff] }
 0x106   :  { %6940 = vst [vmem:[#allocation144_spill] sm:$0xff] %v6939_v44  ;;  %v862_v46 = vadd.f32 1.0, %v861_v26  ;;  %v870_v51 = vmul.f32 -0.5, %v3632_v16  ;;  %v6947_v25 = vand.u32 2147483647, %v3448_v40  ;;  %v6948_v20 = vmov 0  ;;  %v2134_v26 = vpop.eup %2133 }
 0x107   :  { %vm3963_vm5 = vcmp.lt.f32.partialorder %v6942_v54, 0.0004427343  ;;  %6946 = vst [vmem:[#allocation147_spill] sm:$0xff] %v3969_v56  ;;  %2151 = vlog2.f32 %v3790_v3  ;;  %v3980_v12 = vadd.f32 1.0, %v6916_v59  ;;  %v3984_v37 = vadd.f32 1.0, %v6922_v17  ;;  %v2136_v60 = vpop.eup %2135  ;;  %v4773_v44 = vld [vmem:[#allocation7 + $0x150] sm:$0xff] }
 0x108   :  { %v6944_v27 = vsel %vm3963_vm5, 4294967295, %v6943_v27  ;;  %vm3974_vm6 = vcmp.lt.f32.partialorder %v6947_v25, 0.0004427343  ;;  %v6951_v54 = vand.u32 2147483647, %v3459_v35  ;;  %v6952_v33 = vmov 0  ;;  %v2138_v29 = vpop.eup %2137 }
 0x109   :  { %6945 = vst [vmem:[#allocation146_spill] sm:$0xff] %v6944_v27  ;;  %v6949_v20 = vsel %vm3974_vm6, 4294967295, %v6948_v20  ;;  %2153 = vlog2.f32 %v3801_v18  ;;  %v3994_v40 = vmul.f32 %v6914_v41, %v844_v48  ;;  %v6956_v25 = vld [vmem:[#allocation57_spill] sm:$0xff]  ;;  %v3998_v24 = vmul.f32 0.6931472, %v2126_v31  ;;  %v4769_v27 = vld [vmem:[#allocation7 + $0x148] sm:$0xff] }
 0x10a   :  { %6950 = vst [vmem:[#allocation148_spill] sm:$0xff] %v6949_v20  ;;  %vm3988_vm7 = vcmp.lt.f32.partialorder %v6951_v54, 0.0004427343  ;;  %v879_v56 = vmul.f32 -0.5, %v6956_v25  ;;  %2155 = vlog2.f32 %v3809_v19  ;;  %v4002_v35 = vmul.f32 %v6916_v59, %v853_v22  ;;  %v2140_v22 = vpop.eup %2139  ;;  %v4765_v20 = vld [vmem:[#allocation7 + $0x140] sm:$0xff]  ;;  %7237 = vst [vmem:[#allocation262_spill] sm:$0xff] %v4789_v9 }
 0x10b   :  { %v6953_v33 = vsel %vm3988_vm7, 4294967295, %v6952_v33  ;;  %6955 = vst [vmem:[#allocation150_spill] sm:$0xff] %v3994_v40  ;;  %6957 = vst [vmem:[#allocation57_spill] sm:$0xff] %v3998_v24  ;;  %v4005_v54 = vadd.f32 1.0, %v3632_v16  ;;  %v6959_v18 = vand.u32 2147483647, %v3470_v53  ;;  %2157 = vlog2.f32 %v3826_v15 }
 0x10c   :  { %6954 = vst [vmem:[#allocation149_spill] sm:$0xff] %v6953_v33  ;;  %6958 = vst [vmem:[#allocation151_spill] sm:$0xff] %v4002_v35  ;;  %v6960_v48 = vmov 0  ;;  %v4015_v31 = vmul.f32 %v6922_v17, %v862_v46  ;;  %v871_v3 = vadd.f32 1.0, %v870_v51  ;;  %v4018_v35 = vmul.f32 0.6931472, %v2128_v42  ;;  %v2142_v46 = vpop.eup %2141 }
 0x10d   :  { %vm4009_vm8 = vcmp.lt.f32.partialorder %v6959_v18, 0.0004427343  ;;  %v4020_v40 = vmul.f32 0.6931472, %v2130_v21  ;;  %v6966_v59 = vand.u32 2147483647, %v6871_v5  ;;  %2159 = vlog2.f32 %v3841_v57 }
 0x10e   :  { %v6961_v48 = vsel %vm4009_vm8, 4294967295, %v6960_v48  ;;  %6963 = vst [vmem:[#allocation153_spill] sm:$0xff] %v4015_v31  ;;  %6964 = vst [vmem:[#allocation154_spill] sm:$0xff] %v4018_v35  ;;  %v6967_v53 = vmov 0  ;;  %v4030_v15 = vadd.f32 1.0, %v6956_v25  ;;  %v6973_v21 = vmov 0 }
 0x10f   :  { %6962 = vst [vmem:[#allocation152_spill] sm:$0xff] %v6961_v48  ;;  %6965 = vst [vmem:[#allocation155_spill] sm:$0xff] %v4020_v40  ;;  %vm4024_vm9 = vcmp.lt.f32.partialorder %v6966_v59, 0.0004427343  ;;  %v4032_v51 = vmul.f32 0.6931472, %v2132_v11  ;;  %2161 = vlog2.f32 %v3848_v8  ;;  %v2144_v59 = vpop.eup %2143 }
 0x110   :  { %v6968_v53 = vsel %vm4024_vm9, 4294967295, %v6967_v53  ;;  %v4034_v18 = vmul.f32 0.6931472, %v2134_v26  ;;  %v6972_v42 = vand.u32 2147483647, %v3492_v6  ;;  %v880_v5 = vadd.f32 1.0, %v879_v56  ;;  %v2146_v8 = vpop.eup %2145 }
 0x111   :  { %6969 = vst [vmem:[#allocation156_spill] sm:$0xff] %v6968_v53  ;;  %6970 = vst [vmem:[#allocation157_spill] sm:$0xff] %v4032_v51  ;;  %v4047_v31 = vmul.f32 0.6931472, %v2136_v60  ;;  %v6978_v11 = vand.u32 2147483647, %v3503_v55  ;;  %2163 = vlog2.f32 %v3868_v1  ;;  %v4067_v55 = vmul.f32 %v3632_v16, %v871_v3  ;;  %v2148_v19 = vpop.eup %2147 }
 0x112   :  { %6971 = vst [vmem:[#allocation158_spill] sm:$0xff] %v4034_v18  ;;  %vm4038_vm10 = vcmp.lt.f32.partialorder %v6972_v42, 0.0004427343  ;;  %v6979_v26 = vmov 0  ;;  %v4057_v56 = vmul.f32 0.6931472, %v2138_v29  ;;  %2165 = vlog2.f32 %v3879_v49  ;;  %v2150_v24 = vpop.eup %2149 }
 0x113   :  { %v6974_v21 = vsel %vm4038_vm10, 4294967295, %v6973_v21  ;;  %6977 = vst [vmem:[#allocation160_spill] sm:$0xff] %v4047_v31  ;;  %vm4051_vm11 = vcmp.lt.f32.partialorder %v6978_v11, 0.0004427343  ;;  %v6983_v42 = vand.u32 2147483647, %v3508_v10  ;;  %2167 = vlog2.f32 %v3887_v58  ;;  %v2152_v51 = vpop.eup %2151 }
 0x114   :  { %6975 = vst [vmem:[#allocation159_spill] sm:$0xff] %v6974_v21  ;;  %v6980_v26 = vsel %vm4051_vm11, 4294967295, %v6979_v26  ;;  %6982 = vst [vmem:[#allocation162_spill] sm:$0xff] %v4057_v56  ;;  %v6984_v32 = vmov 0  ;;  %v6988_v60 = vld [vmem:[#allocation95_spill] sm:$0xff]  ;;  %v6993_v3 = vmov 0  ;;  %2169 = vlog2.f32 %v3914_v23 }
 0x115   :  { %6981 = vst [vmem:[#allocation161_spill] sm:$0xff] %v6980_v26  ;;  %vm4061_vm12 = vcmp.lt.f32.partialorder %v6983_v42, 0.0004427343  ;;  %6987 = vst [vmem:[#allocation164_spill] sm:$0xff] %v4067_v55  ;;  %v888_v11 = vmul.f32 -0.5, %v6988_v60  ;;  %v7002_v58 = vmov 0  ;;  %v4109_v29 = vmul.f32 %v6956_v25, %v880_v5 }
 0x116   :  { %v6985_v32 = vsel %vm4061_vm12, 4294967295, %v6984_v32  ;;  %v4078_v42 = vmul.f32 0.6931472, %v2140_v22  ;;  %v6992_v49 = vand.u32 2147483647, %v3513_v28  ;;  %v6998_v28 = vmov 0 }
 0x117   :  { %6986 = vst [vmem:[#allocation163_spill] sm:$0xff] %v6985_v32  ;;  %v6997_v10 = vand.u32 2147483647, %v3518_v2  ;;  %7005 = vst [vmem:[#allocation168_spill] sm:$0xff] %v4109_v29  ;;  %2171 = vlog2.f32 %v3925_v63  ;;  %v4123_v5 = vmul.f32 0.6931472, %v2144_v59 }
 0x118   :  { %6991 = vst [vmem:[#allocation95_spill] sm:$0xff] %v4078_v42  ;;  %vm4082_vm13 = vcmp.lt.f32.partialorder %v6992_v49, 0.0004427343  ;;  %v7001_v49 = vand.u32 2147483647, %v3523_v36  ;;  %v885_v36 = vadd.f32 1.0, %v6988_v60  ;;  %2173 = vlog2.f32 %v3942_v61 }
 0x119   :  { %v6994_v3 = vsel %vm4082_vm13, 4294967295, %v6993_v3  ;;  %vm4097_vm14 = vcmp.lt.f32.partialorder %v6997_v10, 0.0004427343  ;;  %v4115_v10 = vmul.f32 0.6931472, %v2142_v46  ;;  %7007 = vst [vmem:[#allocation170_spill] sm:$0xff] %v4123_v5  ;;  %2175 = vlog2.f32 %v3980_v12 }
 0x11a   :  { %6995 = vst [vmem:[#allocation165_spill] sm:$0xff] %v6994_v3  ;;  %v6999_v28 = vsel %vm4097_vm14, 4294967295, %v6998_v28  ;;  %vm4103_vm15 = vcmp.lt.f32.partialorder %v7001_v49, 0.0004427343  ;;  %v2154_v49 = vpop.eup %2153  ;;  %v7008_v22 = vand.u32 2147483647, %v3530_v47  ;;  %2177 = vlog2.f32 %v3984_v37 }
 0x11b   :  { %7000 = vst [vmem:[#allocation166_spill] sm:$0xff] %v6999_v28  ;;  %v7003_v58 = vsel %vm4103_vm15, 4294967295, %v7002_v58  ;;  %7006 = vst [vmem:[#allocation169_spill] sm:$0xff] %v4115_v10  ;;  %v7009_v18 = vmov 0  ;;  %v7012_v46 = vand.u32 2147483647, %v3541_v62  ;;  %v2156_v31 = vpop.eup %2155  ;;  %2179 = vlog2.f32 %v4005_v54 }
 0x11c   :  { %7004 = vst [vmem:[#allocation167_spill] sm:$0xff] %v7003_v58  ;;  %vm4127_vm4 = vcmp.lt.f32.partialorder %v7008_v22, 0.0004427343  ;;  %v7013_v63 = vmov 0  ;;  %v889_v2 = vadd.f32 1.0, %v888_v11  ;;  %v7018_v23 = vmov 0  ;;  %v2158_v61 = vpop.eup %2157 }
 0x11d   :  { %v7010_v18 = vsel %vm4127_vm4, 4294967295, %v7009_v18  ;;  %vm4133_vm5 = vcmp.lt.f32.partialorder %v7012_v46, 0.0004427343  ;;  %v4142_v47 = vmul.f32 0.6931472, %v2146_v8  ;;  %v7023_v33 = vmov 0 }
 0x11e   :  { %7011 = vst [vmem:[#allocation171_spill] sm:$0xff] %v7010_v18  ;;  %v7014_v63 = vsel %vm4133_vm5, 4294967295, %v7013_v63  ;;  %v7017_v22 = vand.u32 2147483647, %v3552_v52  ;;  %v4152_v11 = vmul.f32 0.6931472, %v2148_v19  ;;  %v2160_v19 = vpop.eup %2159  ;;  %2181 = vlog2.f32 %v4030_v15 }
 0x11f   :  { %7015 = vst [vmem:[#allocation172_spill] sm:$0xff] %v7014_v63  ;;  %7016 = vst [vmem:[#allocation173_spill] sm:$0xff] %v4142_v47  ;;  %v7022_v46 = vand.u32 2147483647, %v3563_v30  ;;  %v7026_v8 = vand.u32 2147483647, %v3574_v0  ;;  %v2162_v50 = vpop.eup %2161  ;;  %v4197_v54 = vmul.f32 %v6988_v60, %v889_v2  ;;  %2183 = vlog2.f32 %v885_v36 }
 0x120   :  { %vm4146_vm6 = vcmp.lt.f32.partialorder %v7017_v22, 0.0004427343  ;;  %7021 = vst [vmem:[#allocation175_spill] sm:$0xff] %v4152_v11  ;;  %v7027_v52 = vmov 0  ;;  %v7030_v12 = vld [vmem:[#allocation14_spill] sm:$0xff]  ;;  %v7037_v37 = vld [vmem:[#allocation16_spill] sm:$0xff] }
 0x121   :  { %v7019_v23 = vsel %vm4146_vm6, 4294967295, %v7018_v23  ;;  %vm4156_vm3 = vcmp.lt.f32.partialorder %v7022_v46, 0.0004427343  ;;  %vm4162_vm7 = vcmp.lt.f32.partialorder %v7026_v8, 0.0004427343  ;;  %v894_v22 = vadd.f32 1.0, %v7030_v12 }
 0x122   :  { %7020 = vst [vmem:[#allocation174_spill] sm:$0xff] %v7019_v23  ;;  %v7024_v33 = vsel %vm4156_vm3, 4294967295, %v7023_v33  ;;  %v7028_v52 = vsel %vm4162_vm7, 4294967295, %v7027_v52  ;;  %v897_v59 = vmul.f32 -0.5, %v7030_v12  ;;  %v4173_v46 = vmul.f32 0.6931472, %v2150_v24 }
 0x123   :  { %7025 = vst [vmem:[#allocation176_spill] sm:$0xff] %v7024_v33  ;;  %7029 = vst [vmem:[#allocation177_spill] sm:$0xff] %v7028_v52  ;;  %v7033_v0 = vand.u32 2147483647, %v3585_v7  ;;  %v7034_v8 = vmov 0  ;;  %v903_v42 = vadd.f32 1.0, %v7037_v37  ;;  %2185 = vlog2.f32 %v894_v22 }
 0x124   :  { %7032 = vst [vmem:[#allocation14_spill] sm:$0xff] %v4173_v46  ;;  %v4187_v48 = vmul.f32 0.6931472, %v2152_v51  ;;  %v7040_v24 = vand.u32 2147483647, %v3594_v45  ;;  %v7041_v7 = vmov 0 }
 0x125   :  { %vm4177_vm2 = vcmp.lt.f32.partialorder %v7033_v0, 0.0004427343  ;;  %7044 = vst [vmem:[#allocation180_spill] sm:$0xff] %v4197_v54  ;;  %v2164_v0 = vpop.eup %2163  ;;  %v4203_v43 = vmul.f32 0.6931472, %v2154_v49  ;;  %v7053_v49 = vmov 0  ;;  %2187 = vlog2.f32 %v903_v42 }
 0x126   :  { %v7035_v8 = vsel %vm4177_vm2, 4294967295, %v7034_v8  ;;  %7039 = vst [vmem:[#allocation16_spill] sm:$0xff] %v4187_v48  ;;  %vm4191_vm8 = vcmp.lt.f32.partialorder %v7040_v24, 0.0004427343  ;;  %v4205_v51 = vmul.f32 0.6931472, %v2156_v31  ;;  %v2166_v15 = vpop.eup %2165 }
 0x127   :  { %7036 = vst [vmem:[#allocation178_spill] sm:$0xff] %v7035_v8  ;;  %v7042_v7 = vsel %vm4191_vm8, 4294967295, %v7041_v7  ;;  %7045 = vst [vmem:[#allocation181_spill] sm:$0xff] %v4203_v43  ;;  %v7047_v45 = vand.u32 2147483647, %v6909_v14  ;;  %v7048_v24 = vmov 0 }
 0x128   :  { %7043 = vst [vmem:[#allocation179_spill] sm:$0xff] %v7042_v7  ;;  %7046 = vst [vmem:[#allocation182_spill] sm:$0xff] %v4205_v51  ;;  %v7052_v21 = vand.u32 2147483647, %v6914_v41  ;;  %v898_v31 = vadd.f32 1.0, %v897_v59  ;;  %v906_v14 = vmul.f32 -0.5, %v7037_v37 }
 0x129   :  { %vm4209_vm9 = vcmp.lt.f32.partialorder %v7047_v45, 0.0004427343  ;;  %v2168_v45 = vpop.eup %2167  ;;  %v4228_v47 = vmul.f32 0.6931472, %v2158_v61  ;;  %v4230_v26 = vmul.f32 0.6931472, %v2160_v19 }
 0x12a   :  { %v7049_v24 = vsel %vm4209_vm9, 4294967295, %v7048_v24  ;;  %vm4219_vm10 = vcmp.lt.f32.partialorder %v7052_v21, 0.0004427343  ;;  %v2170_v41 = vpop.eup %2169  ;;  %v4236_v59 = vmul.f32 0.6931472, %v2162_v50  ;;  %v7061_v5 = vld [vmem:[#allocation56_spill] sm:$0xff] }
 0x12b   :  { %7050 = vst [vmem:[#allocation183_spill] sm:$0xff] %v7049_v24  ;;  %v7054_v49 = vsel %vm4219_vm10, 4294967295, %v7053_v49  ;;  %7057 = vst [vmem:[#allocation185_spill] sm:$0xff] %v4228_v47  ;;  %v7062_v11 = vand.u32 2147483647, %v7061_v5  ;;  %v7063_v2 = vmov 0  ;;  %v2172_v46 = vpop.eup %2171 }
 0x12c   :  { %7055 = vst [vmem:[#allocation184_spill] sm:$0xff] %v7054_v49  ;;  %7058 = vst [vmem:[#allocation186_spill] sm:$0xff] %v4230_v26  ;;  %v900_v61 = vand.u32 2147483647, %v7030_v12  ;;  %v7066_v36 = vld [vmem:[#allocation17_spill] sm:$0xff]  ;;  %v7072_v21 = vmov 0  ;;  %v2174_v3 = vpop.eup %2173  ;;  %v4724_v49 = vstv %s4592_s2 }
 0x12d   :  { %7060 = vst [vmem:[#allocation187_spill] sm:$0xff] %v4236_v59  ;;  %vm4240_vm11 = vcmp.lt.f32.partialorder %v7062_v11, 0.0004427343  ;;  %v912_v19 = vadd.f32 1.0, %v7066_v36  ;;  %v4254_v5 = vmul.f32 0.6931472, %v2164_v0  ;;  %v4273_v0 = vmul.f32 %v7030_v12, %v898_v31 }
 0x12e   :  { %v7064_v2 = vsel %vm4240_vm11, 4294967295, %v7063_v2  ;;  %v4256_v11 = vmul.f32 0.6931472, %v2166_v15  ;;  %v7071_v48 = vand.u32 2147483647, %v6922_v17  ;;  %v7077_v43 = vmov 0  ;;  %v2176_v17 = vpop.eup %2175 }
 0x12f   :  { %7065 = vst [vmem:[#allocation56_spill] sm:$0xff] %v7064_v2  ;;  %7069 = vst [vmem:[#allocation17_spill] sm:$0xff] %v4254_v5  ;;  %v4264_v32 = vmul.f32 0.6931472, %v2168_v45  ;;  %v7076_v30 = vand.u32 2147483647, %v3632_v16  ;;  %2189 = vlog2.f32 %v912_v19  ;;  %v1561_v4 = vmul.f32 %v4765_v20, %v4724_v49 }
 0x130   :  { %7070 = vst [vmem:[#allocation188_spill] sm:$0xff] %v4256_v11  ;;  %vm4260_vm13 = vcmp.lt.f32.partialorder %v7071_v48, 0.0004427343  ;;  %7080 = vst [vmem:[#allocation192_spill] sm:$0xff] %v4273_v0  ;;  %v907_v15 = vadd.f32 1.0, %v906_v14  ;;  %v7085_v12 = vmov 0  ;;  %v2178_v14 = vpop.eup %2177  ;;  %v1562_v38 = vmul.f32 %v4769_v27, %v4724_v49 }
 0x131   :  { %v7073_v21 = vsel %vm4260_vm13, 4294967295, %v7072_v21  ;;  %7075 = vst [vmem:[#allocation190_spill] sm:$0xff] %v4264_v32  ;;  %vm4268_vm14 = vcmp.lt.f32.partialorder %v7076_v30, 0.0004427343  ;;  %v909_v50 = vand.u32 2147483647, %v7037_v37  ;;  %v2180_v26 = vpop.eup %2179  ;;  %v1563_v57 = vmul.f32 %v4773_v44, %v4724_v49 }
 0x132   :  { %7074 = vst [vmem:[#allocation189_spill] sm:$0xff] %v7073_v21  ;;  %v7078_v43 = vsel %vm4268_vm14, 4294967295, %v7077_v43  ;;  %v4284_v30 = vmul.f32 0.6931472, %v2170_v41  ;;  %v7084_v22 = vand.u32 2147483647, %v6956_v25  ;;  %v4326_v63 = vmul.f32 %v7037_v37, %v907_v15 }
 0x133   :  { %7079 = vst [vmem:[#allocation191_spill] sm:$0xff] %v7078_v43  ;;  %v915_v31 = vmul.f32 -0.5, %v7066_v36  ;;  %v4297_v47 = vmul.f32 0.6931472, %v2172_v46  ;;  %v7090_v16 = vand.u32 2147483647, %v6988_v60  ;;  %v1564_v40 = vmul.f32 %v4777_v34, %v4724_v49 }
 0x134   :  { %7083 = vst [vmem:[#allocation193_spill] sm:$0xff] %v4284_v30  ;;  %vm4288_vm15 = vcmp.lt.f32.partialorder %v7084_v22, 0.0004427343  ;;  %v7091_v41 = vmov 0  ;;  %v7094_v25 = vld [vmem:[#allocation18_spill] sm:$0xff]  ;;  %v7098_v60 = vmov 0 }
 0x135   :  { %v7086_v12 = vsel %vm4288_vm15, 4294967295, %v7085_v12  ;;  %7089 = vst [vmem:[#allocation195_spill] sm:$0xff] %v4297_v47  ;;  %vm4301_vm5 = vcmp.lt.f32.partialorder %v7090_v16, 0.0004427343  ;;  %v921_v22 = vadd.f32 1.0, %v7094_v25  ;;  %v924_v19 = vmul.f32 -0.5, %v7094_v25  ;;  %v2182_v16 = vpop.eup %2181 }
 0x136   :  { %7087 = vst [vmem:[#allocation194_spill] sm:$0xff] %v7086_v12  ;;  %v7092_v41 = vsel %vm4301_vm5, 4294967295, %v7091_v41  ;;  %v4314_v51 = vmul.f32 0.6931472, %v2174_v3  ;;  %vm4316_vm6 = vcmp.lt.f32.partialorder %v900_v61, 0.0004427343  ;;  %v2184_v46 = vpop.eup %2183 }
 0x137   :  { %7093 = vst [vmem:[#allocation196_spill] sm:$0xff] %v7092_v41  ;;  %v7099_v60 = vsel %vm4316_vm6, 4294967295, %v7098_v60  ;;  %7102 = vst [vmem:[#allocation198_spill] sm:$0xff] %v4326_v63  ;;  %vm4328_vm3 = vcmp.lt.f32.partialorder %v909_v50, 0.0004427343  ;;  %v7103_v52 = vmov 0  ;;  %v2186_v32 = vpop.eup %2185  ;;  %2191 = vlog2.f32 %v921_v22 }
 0x138   :  { %7097 = vst [vmem:[#allocation18_spill] sm:$0xff] %v4314_v51  ;;  %7100 = vst [vmem:[#allocation197_spill] sm:$0xff] %v7099_v60  ;;  %v7104_v52 = vsel %vm4328_vm3, 4294967295, %v7103_v52  ;;  %v7106_v3 = vld [vmem:[#allocation22_spill] sm:$0xff]  ;;  %v4337_v5 = vmul.f32 0.6931472, %v2176_v17  ;;  %v2188_v58 = vpop.eup %2187 }
 0x139   :  { %7105 = vst [vmem:[#allocation199_spill] sm:$0xff] %v7104_v52  ;;  %v930_v61 = vadd.f32 1.0, %v7106_v3  ;;  %v916_v45 = vadd.f32 1.0, %v915_v31  ;;  %v918_v33 = vand.u32 2147483647, %v7066_v36  ;;  %v7111_v59 = vld [vmem:[#allocation25_spill] sm:$0xff] }
 0x13a   :  { %7108 = vst [vmem:[#allocation22_spill] sm:$0xff] %v4337_v5  ;;  %v4344_v15 = vmul.f32 0.6931472, %v2178_v14  ;;  %v939_v8 = vadd.f32 1.0, %v7111_v59  ;;  %v4351_v31 = vmul.f32 0.6931472, %v2180_v26  ;;  %v2190_v5 = vpop.eup %2189 }
 0x13b   :  { %v925_v23 = vadd.f32 1.0, %v924_v19  ;;  %v933_v30 = vmul.f32 -0.5, %v7106_v3  ;;  %v4354_v11 = vmul.f32 0.6931472, %v2182_v16  ;;  %v927_v50 = vand.u32 2147483647, %v7094_v25 }
 0x13c   :  { %7110 = vst [vmem:[#allocation200_spill] sm:$0xff] %v4344_v15  ;;  %7113 = vst [vmem:[#allocation25_spill] sm:$0xff] %v4351_v31  ;;  %2193 = vlog2.f32 %v930_v61  ;;  %v7115_v14 = vld [vmem:[#allocation30_spill] sm:$0xff]  ;;  %v4362_v24 = vmul.f32 0.6931472, %v2184_v46  ;;  %v4365_v26 = vmul.f32 %v7066_v36, %v916_v45  ;;  %v7119_v19 = vmov 0 }
 0x13d   :  { %7114 = vst [vmem:[#allocation201_spill] sm:$0xff] %v4354_v11  ;;  %v948_v22 = vadd.f32 1.0, %v7115_v14  ;;  %vm4367_vm10 = vcmp.lt.f32.partialorder %v918_v33, 0.0004427343  ;;  %v4375_v17 = vmul.f32 0.6931472, %v2186_v32  ;;  %2195 = vlog2.f32 %v939_v8 }
 0x13e   :  { %7117 = vst [vmem:[#allocation30_spill] sm:$0xff] %v4362_v24  ;;  %7118 = vst [vmem:[#allocation202_spill] sm:$0xff] %v4365_v26  ;;  %v7120_v19 = vsel %vm4367_vm10, 4294967295, %v7119_v19  ;;  %v4377_v51 = vmul.f32 0.6931472, %v2188_v58  ;;  %v4384_v33 = vmul.f32 %v7094_v25, %v925_v23  ;;  %v934_v45 = vadd.f32 1.0, %v933_v30 }
 0x13f   :  { %7121 = vst [vmem:[#allocation203_spill] sm:$0xff] %v7120_v19  ;;  %7123 = vst [vmem:[#allocation204_spill] sm:$0xff] %v4375_v17  ;;  %v7126_v46 = vld [vmem:[#allocation38_spill] sm:$0xff]  ;;  %vm4391_vm13 = vcmp.lt.f32.partialorder %v927_v50, 0.0004427343  ;;  %v7127_v58 = vmov 0  ;;  %2197 = vlog2.f32 %v948_v22 }
 0x140   :  { %7124 = vst [vmem:[#allocation205_spill] sm:$0xff] %v4377_v51  ;;  %7125 = vst [vmem:[#allocation206_spill] sm:$0xff] %v4384_v33  ;;  %v957_v37 = vadd.f32 1.0, %v7126_v46  ;;  %v7128_v58 = vsel %vm4391_vm13, 4294967295, %v7127_v58  ;;  %v7130_v8 = vld [vmem:[#allocation58_spill] sm:$0xff]  ;;  %v942_v25 = vmul.f32 -0.5, %v7111_v59  ;;  %v4416_v54 = vmul.f32 %v7106_v3, %v934_v45 }
 0x141   :  { %7129 = vst [vmem:[#allocation38_spill] sm:$0xff] %v7128_v58  ;;  %v966_v61 = vadd.f32 1.0, %v7130_v8  ;;  %v936_v30 = vand.u32 2147483647, %v7106_v3  ;;  %v7131_v36 = vld [vmem:[#allocation60_spill] sm:$0xff]  ;;  %v7132_v41 = vld [vmem:[#allocation61_spill] sm:$0xff]  ;;  %v2192_v29 = vpop.eup %2191 }
 0x142   :  { %v975_v31 = vadd.f32 1.0, %v7131_v36  ;;  %v945_v32 = vand.u32 2147483647, %v7111_v59  ;;  %v984_v23 = vadd.f32 1.0, %v7132_v41  ;;  %v4413_v24 = vmul.f32 0.6931472, %v2190_v5 }
 0x143   :  { %7134 = vst [vmem:[#allocation60_spill] sm:$0xff] %v4416_v54  ;;  %v951_v11 = vmul.f32 -0.5, %v7115_v14  ;;  %2199 = vlog2.f32 %v957_v37  ;;  %v954_v50 = vand.u32 2147483647, %v7115_v14  ;;  %v960_v17 = vmul.f32 -0.5, %v7126_v46  ;;  %v7141_v52 = vld [vmem:[#allocation64_spill] sm:$0xff] }
 0x144   :  { %7133 = vst [vmem:[#allocation58_spill] sm:$0xff] %v4413_v24  ;;  %2201 = vlog2.f32 %v966_v61  ;;  %v969_v22 = vmul.f32 -0.5, %v7130_v8  ;;  %vm4422_vm3 = vcmp.lt.f32.partialorder %v936_v30, 0.0004427343  ;;  %v7135_v51 = vmov 0  ;;  %v7158_v26 = vld [vmem:[#allocation65_spill] sm:$0xff] }
 0x145   :  { %v7136_v51 = vsel %vm4422_vm3, 4294967295, %v7135_v51  ;;  %v943_v5 = vadd.f32 1.0, %v942_v25  ;;  %v963_v63 = vand.u32 2147483647, %v7126_v46  ;;  %2203 = vlog2.f32 %v975_v31  ;;  %v2282_v16 = vld [vmem:[#allocation4 + $0x1f0] sm:$0xff]  ;;  %7231 = vst [vmem:[#allocation257_spill] sm:$0xff] %v4724_v49 }
 0x146   :  { %7137 = vst [vmem:[#allocation61_spill] sm:$0xff] %v7136_v51  ;;  %v2194_v3 = vpop.eup %2193  ;;  %vm4427_vm6 = vcmp.lt.f32.partialorder %v945_v32, 0.0004427343  ;;  %v7138_v45 = vmov 0  ;;  %v978_v37 = vmul.f32 -0.5, %v7131_v36  ;;  %2205 = vlog2.f32 %v984_v23  ;;  %v4736_v48 = vld [vmem:[#allocation7 + $0x110] sm:$0xff] }
 0x147   :  { %v7139_v45 = vsel %vm4427_vm6, 4294967295, %v7138_v45  ;;  %v993_v61 = vadd.f32 1.0, %v7141_v52  ;;  %v4437_v0 = vmul.f32 0.6931472, %v2192_v29  ;;  %v952_v25 = vadd.f32 1.0, %v951_v11  ;;  %v2196_v60 = vpop.eup %2195  ;;  %v4745_v18 = vld [vmem:[#allocation7 + $0x118] sm:$0xff] }
 0x148   :  { %7140 = vst [vmem:[#allocation207_spill] sm:$0xff] %v7139_v45  ;;  %v987_v31 = vmul.f32 -0.5, %v7132_v41  ;;  %vm4440_vm5 = vcmp.lt.f32.partialorder %v954_v50, 0.0004427343  ;;  %v7143_v32 = vmov 0  ;;  %v961_v12 = vadd.f32 1.0, %v960_v17 }
 0x149   :  { %7142 = vst [vmem:[#allocation208_spill] sm:$0xff] %v4437_v0  ;;  %v7144_v32 = vsel %vm4440_vm5, 4294967295, %v7143_v32  ;;  %v970_v55 = vadd.f32 1.0, %v969_v22  ;;  %v972_v23 = vand.u32 2147483647, %v7130_v8  ;;  %v4448_v15 = vmul.f32 %v7111_v59, %v943_v5  ;;  %v2198_v30 = vpop.eup %2197  ;;  %v7168_v22 = vld [vmem:[#allocation111_spill] sm:$0xff] }
 0x14a   :  { %7145 = vst [vmem:[#allocation209_spill] sm:$0xff] %v7144_v32  ;;  %v4445_v43 = vmul.f32 0.6931472, %v2194_v3  ;;  %vm4450_vm10 = vcmp.lt.f32.partialorder %v963_v63, 0.0004427343  ;;  %v7148_v29 = vmov 0  ;;  %2207 = vlog2.f32 %v993_v61 }
 0x14b   :  { %7147 = vst [vmem:[#allocation211_spill] sm:$0xff] %v4448_v15  ;;  %v7149_v29 = vsel %vm4450_vm10, 4294967295, %v7148_v29  ;;  %v981_v11 = vand.u32 2147483647, %v7131_v36  ;;  %v979_v50 = vadd.f32 1.0, %v978_v37  ;;  %v996_v17 = vmul.f32 -0.5, %v7141_v52 }
 0x14c   :  { %7146 = vst [vmem:[#allocation210_spill] sm:$0xff] %v4445_v43  ;;  %7150 = vst [vmem:[#allocation212_spill] sm:$0xff] %v7149_v29  ;;  %v990_v24 = vand.u32 2147483647, %v7132_v41  ;;  %v4461_v59 = vmul.f32 0.6931472, %v2196_v60  ;;  %v4464_v63 = vmul.f32 %v7115_v14, %v952_v25  ;;  %v4467_v3 = vmul.f32 %v7126_v46, %v961_v12 }
 0x14d   :  { %v988_v5 = vadd.f32 1.0, %v987_v31  ;;  %v4470_v37 = vmul.f32 %v7130_v8, %v970_v55  ;;  %vm4472_vm15 = vcmp.lt.f32.partialorder %v972_v23, 0.0004427343  ;;  %v7155_v61 = vmov 0  ;;  %v2200_v58 = vpop.eup %2199  ;;  %v7163_v55 = vld [vmem:[#allocation91_spill] sm:$0xff]  ;;  %v7174_v15 = vld [vmem:[#allocation112_spill] sm:$0xff] }
 0x14e   :  { %7151 = vst [vmem:[#allocation213_spill] sm:$0xff] %v4461_v59  ;;  %7152 = vst [vmem:[#allocation214_spill] sm:$0xff] %v4464_v63  ;;  %v7156_v61 = vsel %vm4472_vm15, 4294967295, %v7155_v61  ;;  %v1005_v19 = vmul.f32 -0.5, %v7158_v26  ;;  %v4481_v14 = vmul.f32 0.6931472, %v2198_v30  ;;  %v2202_v8 = vpop.eup %2201  ;;  %v4489_v25 = vmul.f32 %v7131_v36, %v979_v50 }
 0x14f   :  { %7153 = vst [vmem:[#allocation215_spill] sm:$0xff] %v4467_v3  ;;  %7154 = vst [vmem:[#allocation216_spill] sm:$0xff] %v4470_v37  ;;  %vm4483_vm13 = vcmp.lt.f32.partialorder %v981_v11, 0.0004427343  ;;  %v7160_v12 = vmov 0  ;;  %v1014_v46 = vmul.f32 -0.5, %v7163_v55  ;;  %v2204_v60 = vpop.eup %2203  ;;  %v4501_v11 = vmul.f32 %v7132_v41, %v988_v5 }
 0x150   :  { %7157 = vst [vmem:[#allocation217_spill] sm:$0xff] %v7156_v61  ;;  %7159 = vst [vmem:[#allocation218_spill] sm:$0xff] %v4481_v14  ;;  %v7161_v12 = vsel %vm4483_vm13, 4294967295, %v7160_v12  ;;  %vm4491_vm14 = vcmp.lt.f32.partialorder %v990_v24, 0.0004427343  ;;  %v7165_v31 = vmov 0  ;;  %v2206_v24 = vpop.eup %2205 }
 0x151   :  { %7162 = vst [vmem:[#allocation219_spill] sm:$0xff] %v7161_v12  ;;  %7164 = vst [vmem:[#allocation220_spill] sm:$0xff] %v4489_v25  ;;  %v7166_v31 = vsel %vm4491_vm14, 4294967295, %v7165_v31  ;;  %v997_v23 = vadd.f32 1.0, %v996_v17  ;;  %v1023_v51 = vmul.f32 -0.5, %v7168_v22  ;;  %v1002_v36 = vadd.f32 1.0, %v7158_v26 }
 0x152   :  { %7167 = vst [vmem:[#allocation221_spill] sm:$0xff] %v7166_v31  ;;  %7169 = vst [vmem:[#allocation222_spill] sm:$0xff] %v4501_v11  ;;  %v4505_v50 = vmul.f32 0.6931472, %v2200_v58  ;;  %v1006_v54 = vadd.f32 1.0, %v1005_v19  ;;  %v1011_v0 = vadd.f32 1.0, %v7163_v55 }
 0x153   :  { %v4513_v59 = vmul.f32 0.6931472, %v2202_v8  ;;  %v1015_v41 = vadd.f32 1.0, %v1014_v46  ;;  %v1020_v5 = vadd.f32 1.0, %v7168_v22  ;;  %v4516_v43 = vmul.f32 0.6931472, %v2204_v60 }
 0x154   :  { %7170 = vst [vmem:[#allocation223_spill] sm:$0xff] %v4505_v50  ;;  %v4519_v58 = vmul.f32 %v7141_v52, %v997_v23  ;;  %v1024_v19 = vadd.f32 1.0, %v1023_v51  ;;  %v1029_v17 = vadd.f32 1.0, %v7174_v15  ;;  %v4522_v45 = vmul.f32 0.6931472, %v2206_v24  ;;  %v7176_v32 = vld [vmem:[#allocation114_spill] sm:$0xff]  ;;  %v2208_v8 = vpop.eup %2207 }
 0x155   :  { %7171 = vst [vmem:[#allocation224_spill] sm:$0xff] %v4513_v59  ;;  %7172 = vst [vmem:[#allocation225_spill] sm:$0xff] %v4516_v43  ;;  %2209 = vlog2.f32 %v1002_v36  ;;  %v1032_v33 = vmul.f32 -0.5, %v7174_v15  ;;  %v1038_v30 = vadd.f32 1.0, %v7176_v32  ;;  %v4531_v46 = vmul.f32 %v7158_v26, %v1006_v54  ;;  %v4568_v60 = vld [vmem:[#allocation4 + $0x110] sm:$0xff]  ;;  %v4583_v54 = vld [vmem:[#allocation4 + $0x138] sm:$0xff] }
 0x156   :  { %7173 = vst [vmem:[#allocation226_spill] sm:$0xff] %v4519_v58  ;;  %7175 = vst [vmem:[#allocation227_spill] sm:$0xff] %v4522_v45  ;;  %2211 = vlog2.f32 %v1011_v0  ;;  %v4539_v36 = vmul.f32 %v7163_v55, %v1015_v41  ;;  %v4547_v0 = vmul.f32 %v7168_v22, %v1024_v19  ;;  %v4554_v23 = vmul.f32 0.6931472, %v2208_v8  ;;  %v7183_v19 = vld [vmem:[#allocation116_spill] sm:$0xff]  ;;  %v4580_v41 = vld [vmem:[#allocation4 + $0x130] sm:$0xff] }
 0x157   :  { %7177 = vst [vmem:[#allocation228_spill] sm:$0xff] %v4531_v46  ;;  %2213 = vlog2.f32 %v1020_v5  ;;  %v4556_v5 = vadd.f32 1.0, %v1032_v33  ;;  %v4559_v24 = vmul.f32 -0.5, %v7176_v32  ;;  %v4563_v51 = vadd.f32 1.0, %v7183_v19  ;;  %v4571_v8 = vld [vmem:[#allocation4 + $0x118] sm:$0xff]  ;;  %v4574_v33 = vld [vmem:[#allocation4 + $0x120] sm:$0xff] }
 0x158   :  { %7178 = vst [vmem:[#allocation229_spill] sm:$0xff] %v4539_v36  ;;  %7179 = vst [vmem:[#allocation230_spill] sm:$0xff] %v4547_v0  ;;  %2215 = vlog2.f32 %v1029_v17  ;;  %v4565_v17 = vld [vmem:[#allocation4 + $0x108] sm:$0xff]  ;;  %v2260_v45 = vld [vmem:[#allocation4 + $0x140] sm:$0xff]  ;;  %v6440_v21 = vmov 0.0   ;;  %vm7190_vm3 = vcmp.le.f32.partialorder %v4568_v60, 0.0  ;;  %v1567_v15 = vmul.f32 %v4789_v9, %v4724_v49 }
 0x159   :  { %7180 = vst [vmem:[#allocation231_spill] sm:$0xff] %v4554_v23  ;;  %7181 = vst [vmem:[#allocation232_spill] sm:$0xff] %v4556_v5  ;;  %2217 = vlog2.f32 %v1038_v30  ;;  %v4577_v30 = vld [vmem:[#allocation4 + $0x128] sm:$0xff]  ;;  %vm1304_vm6 = vcmp.le.f32.partialorder %v2260_v45, 0.0  ;;  %v2262_v31 = vld [vmem:[#allocation4 + $0x150] sm:$0xff]  ;;  %vm7189_vm14 = vcmp.le.f32.partialorder %v4565_v17, 0.0 }
 0x15a   :  { %7182 = vst [vmem:[#allocation233_spill] sm:$0xff] %v4559_v24  ;;  %7184 = vst [vmem:[#allocation234_spill] sm:$0xff] %v4563_v51  ;;  %v2261_v11 = vld [vmem:[#allocation4 + $0x148] sm:$0xff]  ;;  %v2263_v43 = vld [vmem:[#allocation4 + $0x158] sm:$0xff]  ;;  %v4606_v47 = vsel %vm7190_vm3, 1.0, %v6440_v21  ;;  %vm7192_vm11 = vcmp.le.f32.partialorder %v4571_v8, 0.0 }
 0x15b   :  { %v2264_v25 = vld [vmem:[#allocation4 + $0x160] sm:$0xff]  ;;  %v2265_v12 = vld [vmem:[#allocation4 + $0x168] sm:$0xff]  ;;  %v2266_v59 = vld [vmem:[#allocation4 + $0x170] sm:$0xff]  ;;  %vm7193_vm8 = vcmp.le.f32.partialorder %v4574_v33, 0.0  ;;  %vm7195_vm3 = vcmp.le.f32.partialorder %v4580_v41, 0.0  ;;  %vm7196_vm13 = vcmp.le.f32.partialorder %v4583_v54, 0.0 }
 0x15c   :  { %vm1309_vm5 = vcmp.le.f32.partialorder %v2265_v12, 0.0  ;;  %v2267_v37 = vld [vmem:[#allocation4 + $0x178] sm:$0xff]  ;;  %v2268_v61 = vld [vmem:[#allocation4 + $0x180] sm:$0xff]  ;;  %v2269_v50 = vld [vmem:[#allocation4 + $0x188] sm:$0xff]  ;;  %v4618_v7 = vsel %vm7193_vm8, 1.0, %v6440_v21  ;;  %v4628_v60 = vsel %vm7195_vm3, 1.0, %v6440_v21 }
 0x15d   :  { %v2270_v29 = vld [vmem:[#allocation4 + $0x190] sm:$0xff]  ;;  %v2271_v14 = vld [vmem:[#allocation4 + $0x198] sm:$0xff]  ;;  %v2272_v63 = vld [vmem:[#allocation4 + $0x1a0] sm:$0xff]  ;;  %v4633_v8 = vsel %vm7196_vm13, 1.0, %v6440_v21  ;;  %v4637_v33 = vsel %vm1304_vm6, 1.0, %v6440_v21  ;;  %vm7197_vm8 = vcmp.le.f32.partialorder %v2261_v11, 0.0 }
 0x15e   :  { %vm1314_vm15 = vcmp.le.f32.partialorder %v2270_v29, 0.0  ;;  %v2273_v0 = vld [vmem:[#allocation4 + $0x1a8] sm:$0xff]  ;;  %v2274_v32 = vld [vmem:[#allocation4 + $0x1b0] sm:$0xff]  ;;  %v2275_v46 = vld [vmem:[#allocation4 + $0x1b8] sm:$0xff]  ;;  %vm7200_vm3 = vcmp.le.f32.partialorder %v2264_v25, 0.0  ;;  %v4657_v45 = vsel %vm1309_vm5, 1.0, %v6440_v21 }
 0x15f   :  { %v4586_v3 = vpop.eup %2209  ;;  %vm1318_vm9 = vcmp.le.f32.partialorder %v2274_v32, 0.0  ;;  %v2276_v51 = vld [vmem:[#allocation4 + $0x1c0] sm:$0xff]  ;;  %v2277_v24 = vld [vmem:[#allocation4 + $0x1c8] sm:$0xff]  ;;  %v2279_v19 = vld [vmem:[#allocation4 + $0x1d8] sm:$0xff]  ;;  %v4653_v54 = vsel %vm7200_vm3, 1.0, %v6440_v21  ;;  %7201 = vst [vmem:[#allocation240_spill] sm:$0xff] %v4657_v45 }
 0x160   :  { %7185 = vst [vmem:[#allocation235_spill] sm:$0xff] %v4586_v3  ;;  %v4588_v36 = vpop.eup %2211  ;;  %v2278_v3 = vld [vmem:[#allocation4 + $0x1d0] sm:$0xff]  ;;  %vm1323_vm10 = vcmp.le.f32.partialorder %v2279_v19, 0.0  ;;  %v2280_v55 = vld [vmem:[#allocation4 + $0x1e0] sm:$0xff]  ;;  %vm7202_vm6 = vcmp.le.f32.partialorder %v2266_v59, 0.0  ;;  %vm7204_vm13 = vcmp.le.f32.partialorder %v2267_v37, 0.0 }
 0x161   :  { %7186 = vst [vmem:[#allocation236_spill] sm:$0xff] %v4588_v36  ;;  %v4590_v22 = vpop.eup %2213  ;;  %v2281_v36 = vld [vmem:[#allocation4 + $0x1e8] sm:$0xff]  ;;  %v4661_v11 = vsel %vm7202_vm6, 1.0, %v6440_v21  ;;  %v4677_v12 = vsel %vm1314_vm15, 1.0, %v6440_v21  ;;  %vm7211_vm5 = vcmp.le.f32.partialorder %v2271_v14, 0.0  ;;  %vm7215_vm3 = vcmp.le.f32.partialorder %v2273_v0, 0.0 }
 0x162   :  { %7187 = vst [vmem:[#allocation237_spill] sm:$0xff] %v4590_v22  ;;  %v4594_v26 = vpop.eup %2215  ;;  %v4601_v22 = vsel %vm7189_vm14, 1.0, %v6440_v21  ;;  %vm7194_vm14 = vcmp.le.f32.partialorder %v4577_v30, 0.0  ;;  %7203 = vst [vmem:[#allocation241_spill] sm:$0xff] %v4661_v11  ;;  %v4681_v59 = vsel %vm7211_vm5, 1.0, %v6440_v21  ;;  %vm7218_vm15 = vcmp.le.f32.partialorder %v2275_v46, 0.0 }
 0x163   :  { %7188 = vst [vmem:[#allocation238_spill] sm:$0xff] %v4594_v26  ;;  %v4608_v2 = vpop.eup %2217  ;;  %v4613_v26 = vsel %vm7192_vm11, 1.0, %v6440_v21  ;;  %v4623_v17 = vsel %vm7194_vm14, 1.0, %v6440_v21  ;;  %vm7198_vm11 = vcmp.le.f32.partialorder %v2262_v31, 0.0  ;;  %vm7199_vm14 = vcmp.le.f32.partialorder %v2263_v43, 0.0  ;;  %7210 = vst [vmem:[#allocation245_spill] sm:$0xff] %v4677_v12 }
 0x164   :  { %7191 = vst [vmem:[#allocation239_spill] sm:$0xff] %v4608_v2  ;;  %v4641_v2 = vsel %vm7197_vm8, 1.0, %v6440_v21  ;;  %v4645_v30 = vsel %vm7198_vm11, 1.0, %v6440_v21  ;;  %v4649_v41 = vsel %vm7199_vm14, 1.0, %v6440_v21  ;;  %v4665_v31 = vsel %vm7204_vm13, 1.0, %v6440_v21  ;;  %7212 = vst [vmem:[#allocation246_spill] sm:$0xff] %v4681_v59 }
 0x165   :  { %7205 = vst [vmem:[#allocation242_spill] sm:$0xff] %v4665_v31  ;;  %vm7206_vm8 = vcmp.le.f32.partialorder %v2268_v61, 0.0  ;;  %vm7208_vm11 = vcmp.le.f32.partialorder %v2269_v50, 0.0  ;;  %vm7213_vm14 = vcmp.le.f32.partialorder %v2272_v63, 0.0  ;;  %v4689_v61 = vsel %vm7215_vm3, 1.0, %v6440_v21  ;;  %v4753_v28 = vld [vmem:[#allocation7 + $0x128] sm:$0xff] }
 0x166   :  { %v4669_v43 = vsel %vm7206_vm8, 1.0, %v6440_v21  ;;  %v4673_v25 = vsel %vm7208_vm11, 1.0, %v6440_v21  ;;  %v4685_v37 = vsel %vm7213_vm14, 1.0, %v6440_v21  ;;  %7216 = vst [vmem:[#allocation248_spill] sm:$0xff] %v4689_v61  ;;  %v4693_v50 = vsel %vm1318_vm9, 1.0, %v6440_v21  ;;  %v4757_v56 = vld [vmem:[#allocation7 + $0x130] sm:$0xff] }
 0x167   :  { %7207 = vst [vmem:[#allocation243_spill] sm:$0xff] %v4669_v43  ;;  %7209 = vst [vmem:[#allocation244_spill] sm:$0xff] %v4673_v25  ;;  %v4697_v29 = vsel %vm7218_vm15, 1.0, %v6440_v21  ;;  %vm7220_vm6 = vcmp.le.f32.partialorder %v2276_v51, 0.0  ;;  %vm7222_vm13 = vcmp.le.f32.partialorder %v2277_v24, 0.0  ;;  %vm7224_vm8 = vcmp.le.f32.partialorder %v2278_v3, 0.0 }
 0x168   :  { %7214 = vst [vmem:[#allocation247_spill] sm:$0xff] %v4685_v37  ;;  %7217 = vst [vmem:[#allocation249_spill] sm:$0xff] %v4693_v50  ;;  %v4701_v14 = vsel %vm7220_vm6, 1.0, %v6440_v21  ;;  %v4705_v63 = vsel %vm7222_vm13, 1.0, %v6440_v21  ;;  %v4709_v0 = vsel %vm7224_vm8, 1.0, %v6440_v21  ;;  %v4713_v32 = vsel %vm1323_vm10, 1.0, %v6440_v21 }
 0x169   :  { %7219 = vst [vmem:[#allocation250_spill] sm:$0xff] %v4697_v29  ;;  %7221 = vst [vmem:[#allocation251_spill] sm:$0xff] %v4701_v14  ;;  %vm7227_vm9 = vcmp.le.f32.partialorder %v2280_v55, 0.0  ;;  %vm7229_vm11 = vcmp.le.f32.partialorder %v2281_v36, 0.0  ;;  %vm7232_vm5 = vcmp.le.f32.partialorder %v2282_v16, 0.0  ;;  %v4730_v3 = vld [vmem:[#allocation7 + $0x108] sm:$0xff]  ;;  %v4740_v55 = vmul.f32 %v4736_v48, %v4724_v49 }
 0x16a   :  { %7223 = vst [vmem:[#allocation252_spill] sm:$0xff] %v4705_v63  ;;  %7225 = vst [vmem:[#allocation253_spill] sm:$0xff] %v4709_v0  ;;  %v4717_v46 = vsel %vm7227_vm9, 1.0, %v6440_v21  ;;  %v4721_v51 = vsel %vm7229_vm11, 1.0, %v6440_v21  ;;  %v4728_v24 = vsel %vm7232_vm5, 1.0, %v6440_v21  ;;  %v4734_v19 = vmul.f32 %v4730_v3, %v4724_v49  ;;  %v4749_v21 = vld [vmem:[#allocation7 + $0x120] sm:$0xff] }
 0x16b   :  { %7226 = vst [vmem:[#allocation254_spill] sm:$0xff] %v4713_v32  ;;  %7228 = vst [vmem:[#allocation255_spill] sm:$0xff] %v4717_v46  ;;  %v4743_v36 = vstv %s4596_s19  ;;  %v1556_v16 = vmul.f32 %v4745_v18, %v4724_v49  ;;  %v1557_v42 = vmul.f32 %v4749_v21, %v4724_v49  ;;  %v1558_v13 = vmul.f32 %v4753_v28, %v4724_v49  ;;  %v4761_v10 = vld [vmem:[#allocation7 + $0x138] sm:$0xff]  ;;  %v4781_v6 = vld [vmem:[#allocation7 + $0x160] sm:$0xff] }
 0x16c   :  { %7230 = vst [vmem:[#allocation256_spill] sm:$0xff] %v4721_v51  ;;  %7233 = vst [vmem:[#allocation258_spill] sm:$0xff] %v4728_v24  ;;  %v1559_v53 = vmul.f32 %v4757_v56, %v4724_v49  ;;  %v1560_v62 = vmul.f32 %v4761_v10, %v4724_v49  ;;  %v1565_v39 = vmul.f32 %v4781_v6, %v4724_v49  ;;  %v4785_v35 = vld [vmem:[#allocation7 + $0x168] sm:$0xff]  ;;  %v4793_v5 = vld [vmem:[#allocation7 + $0x178] sm:$0xff] }
 0x16d   :  { %7234 = vst [vmem:[#allocation259_spill] sm:$0xff] %v4743_v36  ;;  %7235 = vst [vmem:[#allocation260_spill] sm:$0xff] %v4781_v6  ;;  %v1566_v1 = vmul.f32 %v4785_v35, %v4724_v49  ;;  %v1568_v58 = vmul.f32 %v4793_v5, %v4724_v49  ;;  %v4797_v23 = vld [vmem:[#allocation7 + $0x180] sm:$0xff]  ;;  %v4801_v51 = vld [vmem:[#allocation7 + $0x188] sm:$0xff]  ;;  %v4873_v45 = vadd.f32 %v4743_v36, %v1557_v42 }
 0x16e   :  { %7236 = vst [vmem:[#allocation261_spill] sm:$0xff] %v4785_v35  ;;  %7238 = vst [vmem:[#allocation263_spill] sm:$0xff] %v4793_v5  ;;  %v1569_v24 = vmul.f32 %v4797_v23, %v4724_v49  ;;  %v1570_v46 = vmul.f32 %v4801_v51, %v4724_v49  ;;  %v4805_v32 = vld [vmem:[#allocation7 + $0x190] sm:$0xff]  ;;  %v2301_v63 = vld [vmem:[#allocation4 + $0x1f8] sm:$0xff]  ;;  %v4863_v35 = vadd.f32 %v4743_v36, %v4734_v19 }
 0x16f   :  { %7239 = vst [vmem:[#allocation264_spill] sm:$0xff] %v4797_v23  ;;  %7240 = vst [vmem:[#allocation265_spill] sm:$0xff] %v4801_v51  ;;  %v1571_v0 = vmul.f32 %v4805_v32, %v4724_v49  ;;  %vm1327_vm10 = vcmp.le.f32.partialorder %v2301_v63, 0.0  ;;  %v4809_v14 = vld [vmem:[#allocation7 + $0x198] sm:$0xff]  ;;  %v4813_v50 = vld [vmem:[#allocation7 + $0x1a0] sm:$0xff]  ;;  %v4879_v6 = vadd.f32 %v4743_v36, %v1559_v53  ;;  %v4885_v19 = vadd.f32 %v4743_v36, %v1561_v4 }
 0x170   :  { %7241 = vst [vmem:[#allocation266_spill] sm:$0xff] %v4805_v32  ;;  %7242 = vst [vmem:[#allocation267_spill] sm:$0xff] %v4809_v14  ;;  %v1572_v29 = vmul.f32 %v4809_v14, %v4724_v49  ;;  %v1573_v61 = vmul.f32 %v4813_v50, %v4724_v49  ;;  %v4817_v37 = vld [vmem:[#allocation7 + $0x1a8] sm:$0xff]  ;;  %v4821_v59 = vld [vmem:[#allocation7 + $0x1b0] sm:$0xff]  ;;  %v4894_v42 = vadd.f32 %v4743_v36, %v1564_v40 }
 0x171   :  { %7243 = vst [vmem:[#allocation268_spill] sm:$0xff] %v4813_v50  ;;  %7244 = vst [vmem:[#allocation269_spill] sm:$0xff] %v4817_v37  ;;  %v1574_v52 = vmul.f32 %v4817_v37, %v4724_v49  ;;  %v1575_v32 = vmul.f32 %v4821_v59, %v4724_v49  ;;  %v4825_v12 = vld [vmem:[#allocation7 + $0x1b8] sm:$0xff]  ;;  %v4829_v51 = vld [vmem:[#allocation7 + $0x1c0] sm:$0xff]  ;;  %v4900_v53 = vadd.f32 %v4743_v36, %v1566_v1 }
 0x172   :  { %7245 = vst [vmem:[#allocation270_spill] sm:$0xff] %v4821_v59  ;;  %7246 = vst [vmem:[#allocation271_spill] sm:$0xff] %v4825_v12  ;;  %v1576_v14 = vmul.f32 %v4825_v12, %v4724_v49  ;;  %v1577_v50 = vmul.f32 %v4829_v51, %v4724_v49  ;;  %v4833_v25 = vld [vmem:[#allocation7 + $0x1c8] sm:$0xff]  ;;  %v4837_v23 = vld [vmem:[#allocation7 + $0x1d0] sm:$0xff]  ;;  %v4906_v4 = vadd.f32 %v4743_v36, %v1568_v58 }
 0x173   :  { %7247 = vst [vmem:[#allocation272_spill] sm:$0xff] %v4829_v51  ;;  %7248 = vst [vmem:[#allocation273_spill] sm:$0xff] %v4833_v25  ;;  %v1578_v37 = vmul.f32 %v4833_v25, %v4724_v49  ;;  %v1579_v59 = vmul.f32 %v4837_v23, %v4724_v49  ;;  %v4841_v43 = vld [vmem:[#allocation7 + $0x1d8] sm:$0xff]  ;;  %v4845_v5 = vld [vmem:[#allocation7 + $0x1e0] sm:$0xff]  ;;  %v4915_v40 = vadd.f32 %v4743_v36, %v1571_v0 }
 0x174   :  { %7249 = vst [vmem:[#allocation274_spill] sm:$0xff] %v4837_v23  ;;  %7250 = vst [vmem:[#allocation275_spill] sm:$0xff] %v4841_v43  ;;  %v1580_v12 = vmul.f32 %v4841_v43, %v4724_v49  ;;  %v1581_v51 = vmul.f32 %v4845_v5, %v4724_v49  ;;  %v4849_v31 = vld [vmem:[#allocation7 + $0x1e8] sm:$0xff]  ;;  %v4853_v9 = vld [vmem:[#allocation7 + $0x1f0] sm:$0xff]  ;;  %v4921_v1 = vadd.f32 %v4743_v36, %v1573_v61 }
 0x175   :  { %7251 = vst [vmem:[#allocation276_spill] sm:$0xff] %v4845_v5  ;;  %7252 = vst [vmem:[#allocation277_spill] sm:$0xff] %v4849_v31  ;;  %v1582_v25 = vmul.f32 %v4849_v31, %v4724_v49  ;;  %v1583_v23 = vmul.f32 %v4853_v9, %v4724_v49  ;;  %v4857_v11 = vld [vmem:[#allocation7 + $0x1f8] sm:$0xff]  ;;  %v4867_v5 = vadd.f32 %v4743_v36, %v4740_v55 }
 0x176   :  { %7253 = vst [vmem:[#allocation278_spill] sm:$0xff] %v4853_v9  ;;  %v1584_v43 = vmul.f32 %v4857_v11, %v4724_v49  ;;  %v4870_v31 = vadd.f32 %v4743_v36, %v1556_v16  ;;  %v4876_v9 = vadd.f32 %v4743_v36, %v1558_v13  ;;  %v4882_v49 = vadd.f32 %v4743_v36, %v1560_v62 }
 0x177   :  { %v4888_v55 = vadd.f32 %v4743_v36, %v1562_v38  ;;  %v4891_v16 = vadd.f32 %v4743_v36, %v1563_v57  ;;  %v4897_v13 = vadd.f32 %v4743_v36, %v1565_v39  ;;  %v4903_v62 = vadd.f32 %v4743_v36, %v1567_v15  ;;  %7256 = vst [vmem:[#allocation281_spill] sm:$0xff] %v4915_v40  ;;  %v7309_v40 = vld [vmem:[#allocation256_spill] sm:$0xff] }
 0x178   :  { %v4909_v38 = vadd.f32 %v4743_v36, %v1569_v24  ;;  %v4912_v57 = vadd.f32 %v4743_v36, %v1570_v46  ;;  %v4918_v39 = vadd.f32 %v4743_v36, %v1572_v29  ;;  %7258 = vst [vmem:[#allocation283_spill] sm:$0xff] %v4921_v1  ;;  %v4924_v15 = vadd.f32 %v4743_v36, %v1574_v52  ;;  %v7305_v1 = vld [vmem:[#allocation254_spill] sm:$0xff] }
 0x179   :  { %v4927_v58 = vadd.f32 %v4743_v36, %v1575_v32  ;;  %v4930_v24 = vadd.f32 %v4743_v36, %v1576_v14  ;;  %v4933_v46 = vadd.f32 %v4743_v36, %v1577_v50  ;;  %v4936_v0 = vadd.f32 %v4743_v36, %v1578_v37 }
 0x17a   :  { %7254 = vst [vmem:[#allocation279_spill] sm:$0xff] %v4909_v38  ;;  %7255 = vst [vmem:[#allocation280_spill] sm:$0xff] %v4912_v57  ;;  %v4939_v29 = vadd.f32 %v4743_v36, %v1579_v59  ;;  %v4942_v61 = vadd.f32 %v4743_v36, %v1580_v12  ;;  %v4947_v52 = vadd.f32 %v4743_v36, %v1581_v51  ;;  %v7270_v32 = vmov 0.0   ;;  %v7311_v57 = vld [vmem:[#allocation258_spill] sm:$0xff] }
 0x17b   :  { %7257 = vst [vmem:[#allocation282_spill] sm:$0xff] %v4918_v39  ;;  %7259 = vst [vmem:[#allocation284_spill] sm:$0xff] %v4924_v15  ;;  %v4950_v14 = vadd.f32 %v4743_v36, %v1582_v25  ;;  %v4953_v50 = vadd.f32 %v4743_v36, %v1583_v23  ;;  %v4956_v37 = vadd.f32 %v4743_v36, %v1584_v43  ;;  %v1989_v59 = vsel %vm1327_vm10, 1.0, %v7270_v32  ;;  %v7280_v36 = vld [vmem:[#allocation244_spill] sm:$0xff]  ;;  %v7307_v39 = vld [vmem:[#allocation255_spill] sm:$0xff] }
 0x17c   :  { %7260 = vst [vmem:[#allocation285_spill] sm:$0xff] %v4927_v58  ;;  %7261 = vst [vmem:[#allocation286_spill] sm:$0xff] %v4930_v24  ;;  %v1489_v12 = vmul.f32 %v4730_v3, %v4601_v22  ;;  %v1491_v51 = vmul.f32 %v4745_v18, %v4613_v26  ;;  %v1492_v25 = vmul.f32 %v4749_v21, %v4618_v7  ;;  %v7278_v3 = vld [vmem:[#allocation243_spill] sm:$0xff]  ;;  %v7303_v24 = vld [vmem:[#allocation253_spill] sm:$0xff]  ;;  %v5027_v38 = vstv %s4944_s20 }
 0x17d   :  { %7262 = vst [vmem:[#allocation287_spill] sm:$0xff] %v4933_v46  ;;  %7263 = vst [vmem:[#allocation288_spill] sm:$0xff] %v4936_v0  ;;  %v1493_v23 = vmul.f32 %v4753_v28, %v4623_v17  ;;  %v1494_v43 = vmul.f32 %v4757_v56, %v4628_v60  ;;  %v1495_v63 = vmul.f32 %v4761_v10, %v4633_v8  ;;  %v7271_v28 = vld [vmem:[#allocation260_spill] sm:$0xff]  ;;  %v7273_v56 = vld [vmem:[#allocation261_spill] sm:$0xff] }
 0x17e   :  { %7264 = vst [vmem:[#allocation289_spill] sm:$0xff] %v4939_v29  ;;  %7265 = vst [vmem:[#allocation290_spill] sm:$0xff] %v4942_v61  ;;  %v1490_v61 = vmul.f32 %v4736_v48, %v4606_v47  ;;  %v1496_v22 = vmul.f32 %v4765_v20, %v4637_v33  ;;  %v1497_v47 = vmul.f32 %v4769_v27, %v4641_v2  ;;  %v7272_v48 = vld [vmem:[#allocation240_spill] sm:$0xff]  ;;  %v7274_v17 = vld [vmem:[#allocation241_spill] sm:$0xff] }
 0x17f   :  { %7266 = vst [vmem:[#allocation291_spill] sm:$0xff] %v4947_v52  ;;  %7267 = vst [vmem:[#allocation292_spill] sm:$0xff] %v4950_v14  ;;  %v1498_v18 = vmul.f32 %v4773_v44, %v4645_v30  ;;  %v1499_v7 = vmul.f32 %v4777_v34, %v4649_v41  ;;  %v1500_v21 = vmul.f32 %v7271_v28, %v4653_v54  ;;  %v7275_v10 = vld [vmem:[#allocation262_spill] sm:$0xff]  ;;  %v7277_v20 = vld [vmem:[#allocation263_spill] sm:$0xff] }
 0x180   :  { %7268 = vst [vmem:[#allocation293_spill] sm:$0xff] %v4953_v50  ;;  %7269 = vst [vmem:[#allocation294_spill] sm:$0xff] %v4956_v37  ;;  %v1501_v26 = vmul.f32 %v7273_v56, %v7272_v48  ;;  %v1502_v60 = vmul.f32 %v7275_v10, %v7274_v17  ;;  %v7276_v8 = vld [vmem:[#allocation242_spill] sm:$0xff]  ;;  %v7279_v27 = vld [vmem:[#allocation264_spill] sm:$0xff]  ;;  %v7288_v17 = vmov 0 }
 0x181   :  { %v1503_v33 = vmul.f32 %v7277_v20, %v7276_v8  ;;  %v1504_v2 = vmul.f32 %v7279_v27, %v7278_v3  ;;  %v7281_v44 = vld [vmem:[#allocation265_spill] sm:$0xff]  ;;  %v7283_v41 = vld [vmem:[#allocation266_spill] sm:$0xff]  ;;  %v7285_v28 = vld [vmem:[#allocation267_spill] sm:$0xff]  ;;  %7313 = vst [vmem:[#allocation240_spill] sm:$0xff] %v5027_v38 }
 0x182   :  { %v1505_v30 = vmul.f32 %v7281_v44, %v7280_v36  ;;  %v7282_v34 = vld [vmem:[#allocation245_spill] sm:$0xff]  ;;  %v7284_v54 = vld [vmem:[#allocation246_spill] sm:$0xff]  ;;  %v7286_v48 = vld [vmem:[#allocation64_spill] sm:$0xff] }
 0x183   :  { %v1506_v37 = vmul.f32 %v7283_v41, %v7282_v34  ;;  %v1507_v50 = vmul.f32 %v7285_v28, %v7284_v54  ;;  %v7287_v56 = vand.u32 2147483647, %v7286_v48  ;;  %v7291_v10 = vld [vmem:[#allocation247_spill] sm:$0xff]  ;;  %v7292_v8 = vld [vmem:[#allocation268_spill] sm:$0xff]  ;;  %v7294_v27 = vld [vmem:[#allocation269_spill] sm:$0xff] }
 0x184   :  { %v1508_v20 = vmul.f32 %v7292_v8, %v7291_v10  ;;  %v7293_v3 = vld [vmem:[#allocation248_spill] sm:$0xff]  ;;  %v7295_v52 = vld [vmem:[#allocation249_spill] sm:$0xff]  ;;  %v7296_v36 = vld [vmem:[#allocation270_spill] sm:$0xff] }
 0x185   :  { %vm5000_vm14 = vcmp.lt.f32.partialorder %v7287_v56, 0.0004427343  ;;  %v1509_v14 = vmul.f32 %v7294_v27, %v7293_v3  ;;  %v1510_v44 = vmul.f32 %v7296_v36, %v7295_v52  ;;  %v7297_v29 = vld [vmem:[#allocation250_spill] sm:$0xff]  ;;  %v7298_v34 = vld [vmem:[#allocation271_spill] sm:$0xff]  ;;  %v7300_v54 = vld [vmem:[#allocation272_spill] sm:$0xff] }
 0x186   :  { %v7289_v17 = vsel %vm5000_vm14, 4294967295, %v7288_v17  ;;  %v1511_v41 = vmul.f32 %v7298_v34, %v7297_v29  ;;  %v7299_v0 = vld [vmem:[#allocation251_spill] sm:$0xff]  ;;  %v7301_v48 = vld [vmem:[#allocation252_spill] sm:$0xff]  ;;  %v7302_v56 = vld [vmem:[#allocation273_spill] sm:$0xff] }
 0x187   :  { %7290 = vst [vmem:[#allocation260_spill] sm:$0xff] %v7289_v17  ;;  %v1512_v28 = vmul.f32 %v7300_v54, %v7299_v0  ;;  %v1513_v46 = vmul.f32 %v7302_v56, %v7301_v48  ;;  %v7304_v58 = vld [vmem:[#allocation274_spill] sm:$0xff]  ;;  %v7306_v10 = vld [vmem:[#allocation275_spill] sm:$0xff]  ;;  %v7308_v3 = vld [vmem:[#allocation276_spill] sm:$0xff]  ;;  %v1519_v0 = vmul.f32 %v4857_v11, %v1989_v59  ;;  %v5031_v54 = vmul.f32 %v5027_v38, %v1489_v12 }
 0x188   :  { %v1514_v15 = vmul.f32 %v7304_v58, %v7303_v24  ;;  %v1515_v8 = vmul.f32 %v7306_v10, %v7305_v1  ;;  %v1516_v27 = vmul.f32 %v7308_v3, %v7307_v39  ;;  %v7310_v52 = vld [vmem:[#allocation277_spill] sm:$0xff]  ;;  %v7312_v29 = vld [vmem:[#allocation278_spill] sm:$0xff]  ;;  %v5034_v58 = vmul.f32 %v5027_v38, %v1490_v61  ;;  %v7318_v48 = vld [vmem:[#allocation112_spill] sm:$0xff] }
 0x189   :  { %v1517_v36 = vmul.f32 %v7310_v52, %v7309_v40  ;;  %v1518_v34 = vmul.f32 %v7312_v29, %v7311_v57  ;;  %v5037_v1 = vmul.f32 %v5027_v38, %v1491_v51  ;;  %v5040_v39 = vmul.f32 %v5027_v38, %v1492_v25  ;;  %v7320_v10 = vld [vmem:[#allocation69_spill] sm:$0xff]  ;;  %v7322_v3 = vld [vmem:[#allocation96_spill] sm:$0xff]  ;;  %v7326_v29 = vld [vmem:[#allocation70_spill] sm:$0xff] }
 0x18a   :  { %v5043_v40 = vmul.f32 %v5027_v38, %v1493_v23  ;;  %v5046_v57 = vmul.f32 %v5027_v38, %v1494_v43  ;;  %v5049_v11 = vmul.f32 %v5027_v38, %v1495_v63  ;;  %v5052_v24 = vmul.f32 %v5027_v38, %v1496_v22 }
 0x18b   :  { %v5055_v61 = vmul.f32 %v5027_v38, %v1497_v47  ;;  %v5058_v59 = vmul.f32 %v5027_v38, %v1498_v18  ;;  %v5061_v12 = vmul.f32 %v5027_v38, %v1499_v7  ;;  %v5064_v51 = vmul.f32 %v5027_v38, %v1500_v21 }
 0x18c   :  { %v5067_v25 = vmul.f32 %v5027_v38, %v1501_v26  ;;  %v5070_v23 = vmul.f32 %v5027_v38, %v1502_v60  ;;  %v5073_v43 = vmul.f32 %v5027_v38, %v1503_v33  ;;  %v5076_v63 = vmul.f32 %v5027_v38, %v1504_v2 }
 0x18d   :  { %v5079_v22 = vmul.f32 %v5027_v38, %v1505_v30  ;;  %v5082_v47 = vmul.f32 %v5027_v38, %v1506_v37  ;;  %v5085_v18 = vmul.f32 %v5027_v38, %v1507_v50  ;;  %v5088_v7 = vmul.f32 %v5027_v38, %v1508_v20 }
 0x18e   :  { %v5091_v21 = vmul.f32 %v5027_v38, %v1509_v14  ;;  %v5094_v26 = vmul.f32 %v5027_v38, %v1510_v44  ;;  %v5097_v60 = vmul.f32 %v5027_v38, %v1511_v41  ;;  %v5100_v33 = vmul.f32 %v5027_v38, %v1512_v28  ;;  %v7317_v28 = vld [vmem:[#allocation232_spill] sm:$0xff]  ;;  %v7336_v41 = vld [vmem:[#allocation155_spill] sm:$0xff] }
 0x18f   :  { %v5103_v37 = vmul.f32 %v5027_v38, %v1513_v46  ;;  %v5106_v50 = vmul.f32 %v5027_v38, %v1514_v15  ;;  %v5109_v2 = vmul.f32 %v5027_v38, %v1515_v8  ;;  %v5112_v14 = vmul.f32 %v5027_v38, %v1516_v27  ;;  %v7323_v27 = vld [vmem:[#allocation57_spill] sm:$0xff]  ;;  %v7332_v15 = vld [vmem:[#allocation71_spill] sm:$0xff]  ;;  %v7333_v46 = vld [vmem:[#allocation142_spill] sm:$0xff] }
 0x190   :  { %v5115_v30 = vmul.f32 %v5027_v38, %v1517_v36  ;;  %v5118_v20 = vmul.f32 %v5027_v38, %v1518_v34  ;;  %v5121_v44 = vmul.f32 %v5027_v38, %v1519_v0  ;;  %v5129_v56 = vmul.f32 %v7318_v48, %v7317_v28  ;;  %v7328_v0 = vld [vmem:[#allocation98_spill] sm:$0xff]  ;;  %v7335_v28 = vld [vmem:[#allocation15_spill] sm:$0xff]  ;;  %v7339_v48 = vld [vmem:[#allocation72_spill] sm:$0xff] }
 0x191   :  { %v7324_v52 = vsel %vm3908_vm0, %v7322_v3, %v7323_v27  ;;  %v7329_v38 = vld [vmem:[#allocation154_spill] sm:$0xff]  ;;  %vm7334_vm3 = vnez %v7333_v46  ;;  %v7340_v3 = vld [vmem:[#allocation143_spill] sm:$0xff]  ;;  %v7343_v27 = vld [vmem:[#allocation157_spill] sm:$0xff] }
 0x192   :  { %7314 = vst [vmem:[#allocation261_spill] sm:$0xff] %v5121_v44  ;;  %7319 = vst [vmem:[#allocation241_spill] sm:$0xff] %v5129_v56  ;;  %v5137_v36 = vadd.f32 %v7324_v52, %v7320_v10  ;;  %v7330_v44 = vsel %vm3929_vm1, %v7328_v0, %v7329_v38  ;;  %v7337_v56 = vsel %vm7334_vm3, %v7335_v28, %v7336_v41  ;;  %vm7341_vm0 = vnez %v7340_v3  ;;  %v7342_v10 = vld [vmem:[#allocation19_spill] sm:$0xff]  ;;  %v7347_v38 = vld [vmem:[#allocation144_spill] sm:$0xff] }
 0x193   :  { %v5145_v17 = vadd.f32 %v7330_v44, %v7326_v29  ;;  %v5153_v8 = vadd.f32 %v7337_v56, %v7332_v15  ;;  %v7344_v52 = vsel %vm7341_vm0, %v7342_v10, %v7343_v27  ;;  %vm7348_vm1 = vnez %v7347_v38  ;;  %v7349_v44 = vld [vmem:[#allocation27_spill] sm:$0xff]  ;;  %v7350_v29 = vld [vmem:[#allocation158_spill] sm:$0xff]  ;;  %v7356_v15 = vld [vmem:[#allocation32_spill] sm:$0xff] }
 0x194   :  { %7325 = vst [vmem:[#allocation262_spill] sm:$0xff] %v5137_v36  ;;  %v5161_v34 = vadd.f32 %v7344_v52, %v7339_v48  ;;  %v7346_v36 = vld [vmem:[#allocation73_spill] sm:$0xff]  ;;  %v7351_v0 = vsel %vm7348_vm1, %v7349_v44, %v7350_v29  ;;  %v7354_v41 = vld [vmem:[#allocation146_spill] sm:$0xff]  ;;  %v7357_v56 = vld [vmem:[#allocation160_spill] sm:$0xff] }
 0x195   :  { %7331 = vst [vmem:[#allocation242_spill] sm:$0xff] %v5145_v17  ;;  %7338 = vst [vmem:[#allocation263_spill] sm:$0xff] %v5153_v8  ;;  %v5169_v46 = vadd.f32 %v7351_v0, %v7346_v36  ;;  %v7353_v17 = vld [vmem:[#allocation74_spill] sm:$0xff]  ;;  %vm7355_vm15 = vnez %v7354_v41  ;;  %v7360_v8 = vld [vmem:[#allocation75_spill] sm:$0xff] }
 0x196   :  { %7345 = vst [vmem:[#allocation243_spill] sm:$0xff] %v5161_v34  ;;  %v7358_v28 = vsel %vm7355_vm15, %v7356_v15, %v7357_v56  ;;  %v7361_v10 = vld [vmem:[#allocation148_spill] sm:$0xff]  ;;  %v7363_v48 = vld [vmem:[#allocation59_spill] sm:$0xff]  ;;  %v7364_v27 = vld [vmem:[#allocation162_spill] sm:$0xff] }
 0x197   :  { %7352 = vst [vmem:[#allocation264_spill] sm:$0xff] %v5169_v46  ;;  %v5177_v3 = vadd.f32 %v7358_v28, %v7353_v17  ;;  %vm7362_vm6 = vnez %v7361_v10  ;;  %v7367_v34 = vld [vmem:[#allocation76_spill] sm:$0xff]  ;;  %v7368_v44 = vld [vmem:[#allocation149_spill] sm:$0xff]  ;;  %v7370_v36 = vld [vmem:[#allocation62_spill] sm:$0xff] }
 0x198   :  { %v7365_v52 = vsel %vm7362_vm6, %v7363_v48, %v7364_v27  ;;  %vm7369_vm13 = vnez %v7368_v44  ;;  %v7371_v29 = vld [vmem:[#allocation95_spill] sm:$0xff]  ;;  %v7374_v46 = vld [vmem:[#allocation78_spill] sm:$0xff]  ;;  %v7375_v15 = vld [vmem:[#allocation152_spill] sm:$0xff] }
 0x199   :  { %7359 = vst [vmem:[#allocation244_spill] sm:$0xff] %v5177_v3  ;;  %v5185_v38 = vadd.f32 %v7365_v52, %v7360_v8  ;;  %v7372_v0 = vsel %vm7369_vm13, %v7370_v36, %v7371_v29  ;;  %vm7376_vm8 = vnez %v7375_v15  ;;  %v7377_v17 = vld [vmem:[#allocation63_spill] sm:$0xff]  ;;  %v7378_v56 = vld [vmem:[#allocation169_spill] sm:$0xff]  ;;  %v7381_v3 = vld [vmem:[#allocation80_spill] sm:$0xff] }
 0x19a   :  { %v5193_v41 = vadd.f32 %v7372_v0, %v7367_v34  ;;  %v7379_v28 = vsel %vm7376_vm8, %v7377_v17, %v7378_v56  ;;  %v7382_v48 = vld [vmem:[#allocation156_spill] sm:$0xff]  ;;  %v7384_v8 = vld [vmem:[#allocation110_spill] sm:$0xff]  ;;  %v7389_v36 = vld [vmem:[#allocation159_spill] sm:$0xff] }
 0x19b   :  { %7366 = vst [vmem:[#allocation265_spill] sm:$0xff] %v5185_v38  ;;  %v5201_v10 = vadd.f32 %v7379_v28, %v7374_v46  ;;  %vm7383_vm9 = vnez %v7382_v48  ;;  %v7385_v27 = vld [vmem:[#allocation170_spill] sm:$0xff]  ;;  %vm7390_vm11 = vnez %v7389_v36  ;;  %v7391_v34 = vld [vmem:[#allocation113_spill] sm:$0xff]  ;;  %v7398_v46 = vld [vmem:[#allocation115_spill] sm:$0xff] }
 0x19c   :  { %7373 = vst [vmem:[#allocation245_spill] sm:$0xff] %v5193_v41  ;;  %v7386_v52 = vsel %vm7383_vm9, %v7384_v8, %v7385_v27  ;;  %v7388_v38 = vld [vmem:[#allocation82_spill] sm:$0xff]  ;;  %v7392_v29 = vld [vmem:[#allocation173_spill] sm:$0xff]  ;;  %v7395_v41 = vld [vmem:[#allocation84_spill] sm:$0xff] }
 0x19d   :  { %7380 = vst [vmem:[#allocation266_spill] sm:$0xff] %v5201_v10  ;;  %v5209_v44 = vadd.f32 %v7386_v52, %v7381_v3  ;;  %v7393_v0 = vsel %vm7390_vm11, %v7391_v34, %v7392_v29  ;;  %v7396_v17 = vld [vmem:[#allocation161_spill] sm:$0xff]  ;;  %v7399_v56 = vld [vmem:[#allocation175_spill] sm:$0xff]  ;;  %v7402_v10 = vld [vmem:[#allocation86_spill] sm:$0xff] }
 0x19e   :  { %v5217_v15 = vadd.f32 %v7393_v0, %v7388_v38  ;;  %vm7397_vm5 = vnez %v7396_v17  ;;  %v7404_v3 = vld [vmem:[#allocation118_spill] sm:$0xff]  ;;  %v7409_v34 = vld [vmem:[#allocation165_spill] sm:$0xff]  ;;  %v7412_v29 = vld [vmem:[#allocation16_spill] sm:$0xff] }
 0x19f   :  { %7387 = vst [vmem:[#allocation246_spill] sm:$0xff] %v5209_v44  ;;  %v7400_v28 = vsel %vm7397_vm5, %v7398_v46, %v7399_v56  ;;  %v7405_v27 = vld [vmem:[#allocation14_spill] sm:$0xff]  ;;  %v7408_v44 = vld [vmem:[#allocation89_spill] sm:$0xff]  ;;  %vm7410_vm10 = vnez %v7409_v34 }
 0x1a0   :  { %7394 = vst [vmem:[#allocation267_spill] sm:$0xff] %v5217_v15  ;;  %v5225_v48 = vadd.f32 %v7400_v28, %v7395_v41  ;;  %v7406_v52 = vsel %vm4061_vm12, %v7404_v3, %v7405_v27  ;;  %v7411_v38 = vld [vmem:[#allocation121_spill] sm:$0xff]  ;;  %v7415_v15 = vld [vmem:[#allocation92_spill] sm:$0xff]  ;;  %v7416_v46 = vld [vmem:[#allocation166_spill] sm:$0xff] }
 0x1a1   :  { %v5233_v36 = vadd.f32 %v7406_v52, %v7402_v10  ;;  %v7413_v0 = vsel %vm7410_vm10, %v7411_v38, %v7412_v29  ;;  %vm7417_vm3 = vnez %v7416_v46  ;;  %v7418_v41 = vld [vmem:[#allocation122_spill] sm:$0xff]  ;;  %v7419_v56 = vld [vmem:[#allocation181_spill] sm:$0xff]  ;;  %v2317_v3 = vld [vmem:[#allocation4 + $0x10] sm:$0xff] }
 0x1a2   :  { %7401 = vst [vmem:[#allocation64_spill] sm:$0xff] %v5225_v48  ;;  %v5241_v17 = vadd.f32 %v7413_v0, %v7408_v44  ;;  %v7420_v28 = vsel %vm7417_vm3, %v7418_v41, %v7419_v56  ;;  %v2315_v48 = vld [vmem:[#allocation4] sm:$0xff]  ;;  %v2316_v10 = vld [vmem:[#allocation4 + $0x8] sm:$0xff]  ;;  %vm1266_vm1 = vcmp.le.f32.partialorder %v2317_v3, 0.0  ;;  %v7423_v52 = vld [vmem:[#allocation167_spill] sm:$0xff] }
 0x1a3   :  { %7407 = vst [vmem:[#allocation247_spill] sm:$0xff] %v5233_v36  ;;  %v5249_v8 = vadd.f32 %v7420_v28, %v7415_v15  ;;  %vm1264_vm12 = vcmp.le.f32.partialorder %v2315_v48, 0.0  ;;  %vm1265_vm0 = vcmp.le.f32.partialorder %v2316_v10, 0.0  ;;  %v7422_v27 = vld [vmem:[#allocation94_spill] sm:$0xff]  ;;  %vm7424_vm15 = vnez %v7423_v52  ;;  %v7429_v0 = vld [vmem:[#allocation28_spill] sm:$0xff]  ;;  %v7431_v41 = vld [vmem:[#allocation129_spill] sm:$0xff] }
 0x1a4   :  { %7414 = vst [vmem:[#allocation268_spill] sm:$0xff] %v5241_v17  ;;  %v7425_v34 = vld [vmem:[#allocation126_spill] sm:$0xff]  ;;  %v7432_v15 = vld [vmem:[#allocation185_spill] sm:$0xff]  ;;  %v7436_v10 = vld [vmem:[#allocation172_spill] sm:$0xff] }
 0x1a5   :  { %7421 = vst [vmem:[#allocation248_spill] sm:$0xff] %v5249_v8  ;;  %v7426_v44 = vld [vmem:[#allocation182_spill] sm:$0xff]  ;;  %v7433_v56 = vsel %vm4127_vm4, %v7431_v41, %v7432_v15  ;;  %v7435_v48 = vld [vmem:[#allocation97_spill] sm:$0xff]  ;;  %vm7437_vm6 = vnez %v7436_v10  ;;  %v7438_v3 = vld [vmem:[#allocation131_spill] sm:$0xff] }
 0x1a6   :  { %v7427_v38 = vsel %vm7424_vm15, %v7425_v34, %v7426_v44  ;;  %v5265_v28 = vadd.f32 %v7433_v56, %v7429_v0  ;;  %v7439_v8 = vld [vmem:[#allocation186_spill] sm:$0xff]  ;;  %v2318_v36 = vld [vmem:[#allocation4 + $0x18] sm:$0xff]  ;;  %v7449_v0 = vld [vmem:[#allocation29_spill] sm:$0xff] }
 0x1a7   :  { %v5257_v29 = vadd.f32 %v7427_v38, %v7422_v27  ;;  %v7440_v17 = vsel %vm7437_vm6, %v7438_v3, %v7439_v8  ;;  %vm1267_vm13 = vcmp.le.f32.partialorder %v2318_v36, 0.0  ;;  %v7442_v27 = vld [vmem:[#allocation100_spill] sm:$0xff]  ;;  %v7443_v34 = vld [vmem:[#allocation174_spill] sm:$0xff]  ;;  %v7446_v38 = vld [vmem:[#allocation187_spill] sm:$0xff] }
 0x1a8   :  { %7434 = vst [vmem:[#allocation249_spill] sm:$0xff] %v5265_v28  ;;  %v5273_v52 = vadd.f32 %v7440_v17, %v7435_v48  ;;  %vm7444_vm8 = vnez %v7443_v34  ;;  %v7445_v44 = vld [vmem:[#allocation134_spill] sm:$0xff]  ;;  %v7450_v41 = vld [vmem:[#allocation176_spill] sm:$0xff]  ;;  %v7453_v56 = vld [vmem:[#allocation17_spill] sm:$0xff] }
 0x1a9   :  { %7428 = vst [vmem:[#allocation269_spill] sm:$0xff] %v5257_v29  ;;  %v7447_v46 = vsel %vm7444_vm8, %v7445_v44, %v7446_v38  ;;  %vm7451_vm4 = vnez %v7450_v41  ;;  %v7452_v15 = vld [vmem:[#allocation136_spill] sm:$0xff]  ;;  %v7455_v17 = vld [vmem:[#allocation103_spill] sm:$0xff]  ;;  %v7457_v36 = vld [vmem:[#allocation137_spill] sm:$0xff] }
 0x1aa   :  { %7441 = vst [vmem:[#allocation270_spill] sm:$0xff] %v5273_v52  ;;  %v5281_v29 = vadd.f32 %v7447_v46, %v7442_v27  ;;  %v7454_v10 = vsel %vm7451_vm4, %v7452_v15, %v7453_v56  ;;  %v7458_v48 = vld [vmem:[#allocation188_spill] sm:$0xff]  ;;  %v7463_v38 = vld [vmem:[#allocation190_spill] sm:$0xff]  ;;  %v7466_v15 = vld [vmem:[#allocation179_spill] sm:$0xff] }
 0x1ab   :  { %v5289_v28 = vadd.f32 %v7454_v10, %v7449_v0  ;;  %v7459_v3 = vsel %vm4162_vm7, %v7457_v36, %v7458_v48  ;;  %v7460_v52 = vld [vmem:[#allocation104_spill] sm:$0xff]  ;;  %vm7467_vm9 = vnez %v7466_v15  ;;  %v7468_v0 = vld [vmem:[#allocation145_spill] sm:$0xff]  ;;  %v1926_v36 = vsel %vm1264_vm12, 1.0, %v7270_v32  ;;  %v2320_v44 = vld [vmem:[#allocation4 + $0x28] sm:$0xff] }
 0x1ac   :  { %7448 = vst [vmem:[#allocation250_spill] sm:$0xff] %v5281_v29  ;;  %v5297_v34 = vadd.f32 %v7459_v3, %v7455_v17  ;;  %v7462_v27 = vld [vmem:[#allocation140_spill] sm:$0xff]  ;;  %v7465_v29 = vld [vmem:[#allocation31_spill] sm:$0xff]  ;;  %v7469_v56 = vld [vmem:[#allocation193_spill] sm:$0xff]  ;;  %v1927_v17 = vsel %vm1265_vm0, 1.0, %v7270_v32  ;;  %v1928_v48 = vsel %vm1266_vm1, 1.0, %v7270_v32  ;;  %v5337_v15 = vadd.f32 %v5043_v40, %v4876_v9 }
 0x1ad   :  { %v7464_v46 = vsel %vm4177_vm2, %v7462_v27, %v7463_v38  ;;  %v7470_v10 = vsel %vm7467_vm9, %v7468_v0, %v7469_v56  ;;  %v2319_v3 = vld [vmem:[#allocation4 + $0x20] sm:$0xff]  ;;  %vm1269_vm2 = vcmp.le.f32.partialorder %v2320_v44, 0.0  ;;  %v5321_v27 = vadd.f32 %v5031_v54, %v4863_v35  ;;  %v7473_v54 = vld [vmem:[#allocation279_spill] sm:$0xff]  ;;  %v7503_v0 = vld [vmem:[#allocation294_spill] sm:$0xff] }
 0x1ae   :  { %v5305_v41 = vadd.f32 %v7464_v46, %v7460_v52  ;;  %v5313_v8 = vadd.f32 %v7470_v10, %v7465_v29  ;;  %vm1268_vm7 = vcmp.le.f32.partialorder %v2319_v3, 0.0  ;;  %v1929_v52 = vsel %vm1267_vm13, 1.0, %v7270_v32  ;;  %v7481_v40 = vld [vmem:[#allocation283_spill] sm:$0xff]  ;;  %v7504_v56 = vld [vmem:[#allocation261_spill] sm:$0xff] }
 0x1af   :  { %v5325_v29 = vadd.f32 %v5034_v58, %v4867_v5  ;;  %v5329_v38 = vadd.f32 %v5037_v1, %v4870_v31  ;;  %v5333_v46 = vadd.f32 %v5040_v39, %v4873_v45  ;;  %v5341_v35 = vadd.f32 %v5046_v57, %v4879_v6  ;;  %v7475_v58 = vld [vmem:[#allocation280_spill] sm:$0xff]  ;;  %v7477_v1 = vld [vmem:[#allocation281_spill] sm:$0xff]  ;;  %v7479_v39 = vld [vmem:[#allocation282_spill] sm:$0xff] }
 0x1b0   :  { %v5345_v5 = vadd.f32 %v5049_v11, %v4882_v49  ;;  %v5349_v31 = vadd.f32 %v5052_v24, %v4885_v19  ;;  %v5353_v45 = vadd.f32 %v5055_v61, %v4888_v55  ;;  %v5357_v9 = vadd.f32 %v5058_v59, %v4891_v16  ;;  %v7483_v57 = vld [vmem:[#allocation284_spill] sm:$0xff]  ;;  %v7485_v24 = vld [vmem:[#allocation285_spill] sm:$0xff]  ;;  %v7487_v59 = vld [vmem:[#allocation286_spill] sm:$0xff] }
 0x1b1   :  { %v5361_v6 = vadd.f32 %v5061_v12, %v4894_v42  ;;  %v5365_v49 = vadd.f32 %v5064_v51, %v4897_v13  ;;  %v5369_v19 = vadd.f32 %v5067_v25, %v4900_v53  ;;  %v5373_v55 = vadd.f32 %v5070_v23, %v4903_v62  ;;  %v7489_v51 = vld [vmem:[#allocation287_spill] sm:$0xff]  ;;  %v7491_v23 = vld [vmem:[#allocation288_spill] sm:$0xff]  ;;  %v2321_v10 = vld [vmem:[#allocation7] sm:$0xff] }
 0x1b2   :  { %v5377_v16 = vadd.f32 %v5073_v43, %v4906_v4  ;;  %v5381_v42 = vadd.f32 %v5076_v63, %v7473_v54  ;;  %v5385_v13 = vadd.f32 %v5079_v22, %v7475_v58  ;;  %v5389_v53 = vadd.f32 %v5082_v47, %v7477_v1  ;;  %v7493_v63 = vld [vmem:[#allocation289_spill] sm:$0xff]  ;;  %v7495_v47 = vld [vmem:[#allocation290_spill] sm:$0xff]  ;;  %v2329_v3 = vld [vmem:[#allocation4 + $0x50] sm:$0xff] }
 0x1b3   :  { %7471 = vst [vmem:[#allocation271_spill] sm:$0xff] %v5373_v55  ;;  %v5393_v62 = vadd.f32 %v5085_v18, %v7479_v39  ;;  %v5397_v4 = vadd.f32 %v5088_v7, %v7481_v40  ;;  %v5401_v11 = vadd.f32 %v5091_v21, %v7483_v57  ;;  %v5405_v61 = vadd.f32 %v5094_v26, %v7485_v24  ;;  %v7497_v7 = vld [vmem:[#allocation291_spill] sm:$0xff]  ;;  %v7499_v26 = vld [vmem:[#allocation292_spill] sm:$0xff]  ;;  %v7506_v1 = vld [vmem:[#allocation257_spill] sm:$0xff] }
 0x1b4   :  { %7472 = vst [vmem:[#allocation251_spill] sm:$0xff] %v5377_v16  ;;  %7474 = vst [vmem:[#allocation272_spill] sm:$0xff] %v5381_v42  ;;  %v5409_v12 = vadd.f32 %v5097_v60, %v7487_v59  ;;  %v5413_v25 = vadd.f32 %v5100_v33, %v7489_v51  ;;  %v5417_v43 = vadd.f32 %v5103_v37, %v7491_v23  ;;  %v7501_v33 = vld [vmem:[#allocation293_spill] sm:$0xff]  ;;  %v7508_v57 = vld [vmem:[#allocation183_spill] sm:$0xff]  ;;  %vm1274_vm6 = vcmp.le.f32.partialorder %v2329_v3, 0.0 }
 0x1b5   :  { %7476 = vst [vmem:[#allocation252_spill] sm:$0xff] %v5385_v13  ;;  %7478 = vst [vmem:[#allocation273_spill] sm:$0xff] %v5389_v53  ;;  %v5421_v22 = vadd.f32 %v5106_v50, %v7493_v63  ;;  %v5425_v18 = vadd.f32 %v5109_v2, %v7495_v47  ;;  %v5429_v21 = vadd.f32 %v5112_v14, %v7497_v7  ;;  %v2322_v2 = vld [vmem:[#allocation7 + $0x8] sm:$0xff]  ;;  %v7507_v40 = vld [vmem:[#allocation105_spill] sm:$0xff]  ;;  %vm7509_vm11 = vnez %v7508_v57 }
 0x1b6   :  { %7480 = vst [vmem:[#allocation253_spill] sm:$0xff] %v5393_v62  ;;  %7482 = vst [vmem:[#allocation274_spill] sm:$0xff] %v5397_v4  ;;  %v5433_v60 = vadd.f32 %v5115_v30, %v7499_v26  ;;  %v5437_v37 = vadd.f32 %v5118_v20, %v7501_v33  ;;  %v5441_v50 = vadd.f32 %v7504_v56, %v7503_v0  ;;  %v7510_v30 = vld [vmem:[#allocation147_spill] sm:$0xff]  ;;  %v7513_v51 = vld [vmem:[#allocation106_spill] sm:$0xff] }
 0x1b7   :  { %7484 = vst [vmem:[#allocation254_spill] sm:$0xff] %v5401_v11  ;;  %7486 = vst [vmem:[#allocation275_spill] sm:$0xff] %v5405_v61  ;;  %v1456_v54 = vmul.f32 %v2321_v10, %v1926_v36  ;;  %v1457_v58 = vmul.f32 %v2322_v2, %v1927_v17  ;;  %v1521_v39 = vmul.f32 %v2321_v10, %v7506_v1  ;;  %v7511_v24 = vld [vmem:[#allocation195_spill] sm:$0xff]  ;;  %v7514_v23 = vld [vmem:[#allocation184_spill] sm:$0xff] }
 0x1b8   :  { %7488 = vst [vmem:[#allocation255_spill] sm:$0xff] %v5409_v12  ;;  %7490 = vst [vmem:[#allocation276_spill] sm:$0xff] %v5413_v25  ;;  %v1522_v14 = vmul.f32 %v2322_v2, %v7506_v1  ;;  %v7512_v59 = vsel %vm7509_vm11, %v7510_v30, %v7511_v24  ;;  %vm7515_vm5 = vnez %v7514_v23  ;;  %v7516_v63 = vld [vmem:[#allocation150_spill] sm:$0xff]  ;;  %v7519_v17 = vld [vmem:[#allocation33_spill] sm:$0xff] }
 0x1b9   :  { %7492 = vst [vmem:[#allocation256_spill] sm:$0xff] %v5417_v43  ;;  %7494 = vst [vmem:[#allocation277_spill] sm:$0xff] %v5421_v22  ;;  %v5451_v20 = vadd.f32 %v7512_v59, %v7507_v40  ;;  %v7517_v47 = vld [vmem:[#allocation18_spill] sm:$0xff]  ;;  %v7520_v26 = vld [vmem:[#allocation56_spill] sm:$0xff] }
 0x1ba   :  { %7496 = vst [vmem:[#allocation258_spill] sm:$0xff] %v5425_v18  ;;  %7498 = vst [vmem:[#allocation278_spill] sm:$0xff] %v5429_v21  ;;  %v7518_v36 = vsel %vm7515_vm5, %v7516_v63, %v7517_v47  ;;  %vm7521_vm10 = vnez %v7520_v26  ;;  %v7522_v33 = vld [vmem:[#allocation151_spill] sm:$0xff]  ;;  %v7523_v0 = vld [vmem:[#allocation22_spill] sm:$0xff]  ;;  %v1931_v26 = vsel %vm1269_vm2, 1.0, %v7270_v32 }
 0x1bb   :  { %7500 = vst [vmem:[#allocation232_spill] sm:$0xff] %v5433_v60  ;;  %7502 = vst [vmem:[#allocation69_spill] sm:$0xff] %v5437_v37  ;;  %v5459_v7 = vadd.f32 %v7518_v36, %v7513_v51  ;;  %v7524_v56 = vsel %vm7521_vm10, %v7522_v33, %v7523_v0  ;;  %v7525_v2 = vld [vmem:[#allocation107_spill] sm:$0xff]  ;;  %v7526_v57 = vld [vmem:[#allocation189_spill] sm:$0xff] }
 0x1bc   :  { %7505 = vst [vmem:[#allocation139_spill] sm:$0xff] %v5441_v50  ;;  %v5467_v10 = vadd.f32 %v7524_v56, %v7519_v17  ;;  %vm7527_vm3 = vnez %v7526_v57  ;;  %v7528_v40 = vld [vmem:[#allocation153_spill] sm:$0xff]  ;;  %v7529_v30 = vld [vmem:[#allocation200_spill] sm:$0xff]  ;;  %v2323_v23 = vld [vmem:[#allocation4 + $0x30] sm:$0xff]  ;;  %v1930_v17 = vsel %vm1268_vm7, 1.0, %v7270_v32 }
 0x1bd   :  { %v7530_v24 = vsel %vm7527_vm3, %v7528_v40, %v7529_v30  ;;  %vm1270_vm12 = vcmp.le.f32.partialorder %v2323_v23, 0.0  ;;  %v2324_v51 = vld [vmem:[#allocation4 + $0x38] sm:$0xff]  ;;  %v2325_v63 = vld [vmem:[#allocation7 + $0x10] sm:$0xff]  ;;  %v2327_v50 = vld [vmem:[#allocation4 + $0x40] sm:$0xff] }
 0x1be   :  { %v5475_v59 = vadd.f32 %v7530_v24, %v7525_v2  ;;  %vm1271_vm0 = vcmp.le.f32.partialorder %v2324_v51, 0.0  ;;  %v1458_v47 = vmul.f32 %v2325_v63, %v1928_v48  ;;  %v1523_v36 = vmul.f32 %v2325_v63, %v7506_v1  ;;  %v2326_v33 = vld [vmem:[#allocation7 + $0x18] sm:$0xff]  ;;  %v7531_v2 = vld [vmem:[#allocation259_spill] sm:$0xff]  ;;  %v2328_v63 = vld [vmem:[#allocation4 + $0x48] sm:$0xff] }
 0x1bf   :  { %v1459_v0 = vmul.f32 %v2326_v33, %v1929_v52  ;;  %v1524_v56 = vmul.f32 %v2326_v33, %v7506_v1  ;;  %v1586_v57 = vadd.f32 %v7531_v2, %v1521_v39  ;;  %v1587_v40 = vadd.f32 %v7531_v2, %v1522_v14  ;;  %v7532_v30 = vld [vmem:[#allocation240_spill] sm:$0xff]  ;;  %v2330_v52 = vld [vmem:[#allocation7 + $0x20] sm:$0xff]  ;;  %v2332_v60 = vld [vmem:[#allocation7 + $0x28] sm:$0xff] }
 0x1c0   :  { %v1651_v24 = vmul.f32 %v7532_v30, %v1456_v54  ;;  %v1652_v48 = vmul.f32 %v7532_v30, %v1457_v58  ;;  %vm1272_vm1 = vcmp.le.f32.partialorder %v2327_v50, 0.0  ;;  %vm1273_vm15 = vcmp.le.f32.partialorder %v2328_v63, 0.0  ;;  %v2331_v54 = vld [vmem:[#allocation4 + $0x58] sm:$0xff]  ;;  %v2335_v25 = vld [vmem:[#allocation7 + $0x30] sm:$0xff]  ;;  %v7533_v11 = vld [vmem:[#allocation262_spill] sm:$0xff] }
 0x1c1   :  { %v1932_v44 = vsel %vm1270_vm12, 1.0, %v7270_v32  ;;  %v1460_v37 = vmul.f32 %v2330_v52, %v1930_v17  ;;  %v1525_v33 = vmul.f32 %v2330_v52, %v7506_v1  ;;  %v1588_v39 = vadd.f32 %v7531_v2, %v1523_v36  ;;  %v2333_v52 = vld [vmem:[#allocation4 + $0x60] sm:$0xff]  ;;  %v2334_v36 = vld [vmem:[#allocation4 + $0x68] sm:$0xff]  ;;  %v2336_v12 = vld [vmem:[#allocation4 + $0x70] sm:$0xff] }
 0x1c2   :  { %v1653_v14 = vmul.f32 %v7532_v30, %v1458_v47  ;;  %vm1275_vm13 = vcmp.le.f32.partialorder %v2331_v54, 0.0  ;;  %v1933_v58 = vsel %vm1271_vm0, 1.0, %v7270_v32  ;;  %v1461_v21 = vmul.f32 %v2332_v60, %v1931_v26  ;;  %v2339_v63 = vld [vmem:[#allocation7 + $0x40] sm:$0xff]  ;;  %v7537_v42 = vld [vmem:[#allocation264_spill] sm:$0xff]  ;;  %v7688_v55 = vld [vmem:[#allocation231_spill] sm:$0xff] }
 0x1c3   :  { %v1526_v18 = vmul.f32 %v2332_v60, %v7506_v1  ;;  %v1589_v23 = vadd.f32 %v7531_v2, %v1524_v56  ;;  %v1654_v22 = vmul.f32 %v7532_v30, %v1459_v0  ;;  %v1715_v17 = vadd.f32 %v1651_v24, %v1586_v57  ;;  %v7690_v16 = vld [vmem:[#allocation128_spill] sm:$0xff] }
 0x1c4   :  { %v1716_v43 = vadd.f32 %v1652_v48, %v1587_v40  ;;  %vm1276_vm8 = vcmp.le.f32.partialorder %v2333_v52, 0.0  ;;  %vm1277_vm4 = vcmp.le.f32.partialorder %v2334_v36, 0.0  ;;  %v1934_v47 = vsel %vm1272_vm1, 1.0, %v7270_v32  ;;  %v2337_v40 = vld [vmem:[#allocation7 + $0x38] sm:$0xff] }
 0x1c5   :  { %v1462_v51 = vmul.f32 %v2335_v25, %v1932_v44  ;;  %vm1278_vm9 = vcmp.le.f32.partialorder %v2336_v12, 0.0  ;;  %v1527_v26 = vmul.f32 %v2335_v25, %v7506_v1  ;;  %v1590_v60 = vadd.f32 %v7531_v2, %v1525_v33  ;;  %v7534_v25 = vld [vmem:[#allocation242_spill] sm:$0xff]  ;;  %v2338_v33 = vld [vmem:[#allocation4 + $0x78] sm:$0xff] }
 0x1c6   :  { %v1655_v56 = vmul.f32 %v7532_v30, %v1460_v37  ;;  %v1717_v0 = vadd.f32 %v1653_v14, %v1588_v39  ;;  %v1935_v57 = vsel %vm1273_vm15, 1.0, %v7270_v32  ;;  %v1463_v24 = vmul.f32 %v2337_v40, %v1933_v58  ;;  %v2340_v58 = vld [vmem:[#allocation4 + $0x80] sm:$0xff] }
 0x1c7   :  { %v1528_v48 = vmul.f32 %v2337_v40, %v7506_v1  ;;  %v1591_v50 = vadd.f32 %v7531_v2, %v1526_v18  ;;  %v1656_v44 = vmul.f32 %v7532_v30, %v1461_v21  ;;  %v1718_v61 = vadd.f32 %v1654_v22, %v1589_v23  ;;  %v7535_v23 = vld [vmem:[#allocation263_spill] sm:$0xff] }
 0x1c8   :  { %v1779_v4 = vmul.f32 %v1715_v17, %v7533_v11  ;;  %v1780_v62 = vmul.f32 %v1716_v43, %v7534_v25  ;;  %vm1279_vm7 = vcmp.le.f32.partialorder %v2338_v33, 0.0  ;;  %v1936_v37 = vsel %vm1274_vm6, 1.0, %v7270_v32  ;;  %v2341_v17 = vld [vmem:[#allocation7 + $0x48] sm:$0xff] }
 0x1c9   :  { %v1464_v39 = vmul.f32 %v2339_v63, %v1934_v47  ;;  %v1529_v14 = vmul.f32 %v2339_v63, %v7506_v1  ;;  %vm1280_vm2 = vcmp.le.f32.partialorder %v2340_v58, 0.0  ;;  %v1592_v18 = vadd.f32 %v7531_v2, %v1527_v26  ;;  %v2342_v25 = vld [vmem:[#allocation4 + $0x88] sm:$0xff]  ;;  %v7536_v26 = vld [vmem:[#allocation243_spill] sm:$0xff] }
 0x1ca   :  { %v1657_v21 = vmul.f32 %v7532_v30, %v1462_v51  ;;  %v1719_v22 = vadd.f32 %v1655_v56, %v1590_v60  ;;  %v1781_v11 = vmul.f32 %v1717_v0, %v7535_v23  ;;  %v1937_v43 = vsel %vm1275_vm13, 1.0, %v7270_v32  ;;  %v2343_v56 = vld [vmem:[#allocation7 + $0x50] sm:$0xff] }
 0x1cb   :  { %v1465_v40 = vmul.f32 %v2341_v17, %v1935_v57  ;;  %v1530_v3 = vmul.f32 %v2341_v17, %v7506_v1  ;;  %v1593_v47 = vadd.f32 %v7531_v2, %v1528_v48  ;;  %vm1281_vm11 = vcmp.le.f32.partialorder %v2342_v25, 0.0  ;;  %v2344_v23 = vld [vmem:[#allocation4 + $0x90] sm:$0xff] }
 0x1cc   :  { %v1658_v63 = vmul.f32 %v7532_v30, %v1463_v24  ;;  %v1720_v53 = vadd.f32 %v1656_v44, %v1591_v50  ;;  %v1782_v13 = vmul.f32 %v1718_v61, %v7536_v26  ;;  %v1843_v51 = vadd.f32 %v1780_v62, %v1779_v4  ;;  %v2345_v4 = vld [vmem:[#allocation7 + $0x58] sm:$0xff] }
 0x1cd   :  { %v1938_v60 = vsel %vm1276_vm8, 1.0, %v7270_v32  ;;  %v1466_v54 = vmul.f32 %v2343_v56, %v1936_v37  ;;  %v1531_v0 = vmul.f32 %v2343_v56, %v7506_v1  ;;  %v1594_v57 = vadd.f32 %v7531_v2, %v1529_v14  ;;  %v2346_v37 = vld [vmem:[#allocation4 + $0x98] sm:$0xff] }
 0x1ce   :  { %vm1282_vm5 = vcmp.le.f32.partialorder %v2344_v23, 0.0  ;;  %v1659_v48 = vmul.f32 %v7532_v30, %v1464_v39  ;;  %v1721_v17 = vadd.f32 %v1657_v21, %v1592_v18  ;;  %v1783_v24 = vmul.f32 %v1719_v22, %v7537_v42  ;;  %v7538_v56 = vld [vmem:[#allocation244_spill] sm:$0xff]  ;;  %v2347_v21 = vld [vmem:[#allocation7 + $0x60] sm:$0xff] }
 0x1cf   :  { %v1844_v50 = vadd.f32 %v1843_v51, %v1781_v11  ;;  %v1939_v62 = vsel %vm1277_vm4, 1.0, %v7270_v32  ;;  %v1467_v61 = vmul.f32 %v2345_v4, %v1937_v43  ;;  %v1532_v52 = vmul.f32 %v2345_v4, %v7506_v1  ;;  %v2348_v43 = vld [vmem:[#allocation4 + $0xa0] sm:$0xff] }
 0x1d0   :  { %v1595_v44 = vadd.f32 %v7531_v2, %v1530_v3  ;;  %vm1283_vm10 = vcmp.le.f32.partialorder %v2346_v37, 0.0  ;;  %v1660_v14 = vmul.f32 %v7532_v30, %v1465_v40  ;;  %v1722_v26 = vadd.f32 %v1658_v63, %v1593_v47  ;;  %v7539_v4 = vld [vmem:[#allocation265_spill] sm:$0xff] }
 0x1d1   :  { %v1784_v39 = vmul.f32 %v1720_v53, %v7538_v56  ;;  %v1845_v18 = vadd.f32 %v1844_v50, %v1782_v13  ;;  %v1940_v42 = vsel %vm1278_vm9, 1.0, %v7270_v32  ;;  %v1468_v36 = vmul.f32 %v2347_v21, %v1938_v60  ;;  %v2349_v53 = vld [vmem:[#allocation7 + $0x68] sm:$0xff] }
 0x1d2   :  { %v1533_v22 = vmul.f32 %v2347_v21, %v7506_v1  ;;  %v1596_v11 = vadd.f32 %v7531_v2, %v1531_v0  ;;  %vm1284_vm3 = vcmp.le.f32.partialorder %v2348_v43, 0.0  ;;  %v1661_v3 = vmul.f32 %v7532_v30, %v1466_v54  ;;  %v2350_v50 = vld [vmem:[#allocation4 + $0xa8] sm:$0xff]  ;;  %v7540_v21 = vld [vmem:[#allocation245_spill] sm:$0xff] }
 0x1d3   :  { %v1723_v51 = vadd.f32 %v1659_v48, %v1594_v57  ;;  %v1785_v40 = vmul.f32 %v1721_v17, %v7539_v4  ;;  %v1846_v47 = vadd.f32 %v1845_v18, %v1783_v24  ;;  %v1941_v13 = vsel %vm1279_vm7, 1.0, %v7270_v32  ;;  %v2351_v17 = vld [vmem:[#allocation7 + $0x70] sm:$0xff] }
 0x1d4   :  { %v1469_v12 = vmul.f32 %v2349_v53, %v1939_v62  ;;  %v1534_v63 = vmul.f32 %v2349_v53, %v7506_v1  ;;  %v1597_v60 = vadd.f32 %v7531_v2, %v1532_v52  ;;  %vm1285_vm12 = vcmp.le.f32.partialorder %v2350_v50, 0.0  ;;  %v2352_v18 = vld [vmem:[#allocation4 + $0xb0] sm:$0xff]  ;;  %v7541_v53 = vld [vmem:[#allocation266_spill] sm:$0xff] }
 0x1d5   :  { %v1662_v0 = vmul.f32 %v7532_v30, %v1467_v61  ;;  %v1724_v56 = vadd.f32 %v1660_v14, %v1595_v44  ;;  %v1786_v54 = vmul.f32 %v1722_v26, %v7540_v21  ;;  %v1847_v57 = vadd.f32 %v1846_v47, %v1784_v39  ;;  %v2353_v26 = vld [vmem:[#allocation7 + $0x78] sm:$0xff] }
 0x1d6   :  { %v1942_v48 = vsel %vm1280_vm2, 1.0, %v7270_v32  ;;  %v1470_v33 = vmul.f32 %v2351_v17, %v1940_v42  ;;  %v1535_v24 = vmul.f32 %v2351_v17, %v7506_v1  ;;  %v1598_v62 = vadd.f32 %v7531_v2, %v1533_v22  ;;  %v2354_v47 = vld [vmem:[#allocation4 + $0xb8] sm:$0xff]  ;;  %v7542_v17 = vld [vmem:[#allocation246_spill] sm:$0xff] }
 0x1d7   :  { %vm1286_vm0 = vcmp.le.f32.partialorder %v2352_v18, 0.0  ;;  %v1663_v52 = vmul.f32 %v7532_v30, %v1468_v36  ;;  %v1725_v4 = vadd.f32 %v1661_v3, %v1596_v11  ;;  %v1787_v61 = vmul.f32 %v1723_v51, %v7541_v53  ;;  %v2355_v51 = vld [vmem:[#allocation7 + $0x80] sm:$0xff] }
 0x1d8   :  { %v1848_v44 = vadd.f32 %v1847_v57, %v1785_v40  ;;  %v1943_v14 = vsel %vm1281_vm11, 1.0, %v7270_v32  ;;  %v1471_v58 = vmul.f32 %v2353_v26, %v1941_v13  ;;  %v1536_v39 = vmul.f32 %v2353_v26, %v7506_v1  ;;  %v2356_v57 = vld [vmem:[#allocation4 + $0xc0] sm:$0xff]  ;;  %v7543_v26 = vld [vmem:[#allocation267_spill] sm:$0xff] }
 0x1d9   :  { %v1599_v42 = vadd.f32 %v7531_v2, %v1534_v63  ;;  %vm1287_vm1 = vcmp.le.f32.partialorder %v2354_v47, 0.0  ;;  %v1664_v22 = vmul.f32 %v7532_v30, %v1469_v12  ;;  %v1726_v21 = vadd.f32 %v1662_v0, %v1597_v60 }
 0x1da   :  { %v1788_v36 = vmul.f32 %v1724_v56, %v7542_v17  ;;  %v1849_v11 = vadd.f32 %v1848_v44, %v1786_v54  ;;  %v1944_v3 = vsel %vm1282_vm5, 1.0, %v7270_v32  ;;  %v1472_v25 = vmul.f32 %v2355_v51, %v1942_v48  ;;  %v2357_v56 = vld [vmem:[#allocation7 + $0x88] sm:$0xff] }
 0x1db   :  { %v1537_v40 = vmul.f32 %v2355_v51, %v7506_v1  ;;  %v1600_v13 = vadd.f32 %v7531_v2, %v1535_v24  ;;  %vm1288_vm15 = vcmp.le.f32.partialorder %v2356_v57, 0.0  ;;  %v1665_v63 = vmul.f32 %v7532_v30, %v1470_v33  ;;  %v2358_v44 = vld [vmem:[#allocation4 + $0xc8] sm:$0xff]  ;;  %v7544_v51 = vld [vmem:[#allocation64_spill] sm:$0xff] }
 0x1dc   :  { %v1727_v53 = vadd.f32 %v1663_v52, %v1598_v62  ;;  %v1789_v12 = vmul.f32 %v1725_v4, %v7543_v26  ;;  %v1850_v60 = vadd.f32 %v1849_v11, %v1787_v61  ;;  %v1945_v0 = vsel %vm1283_vm10, 1.0, %v7270_v32  ;;  %v2359_v4 = vld [vmem:[#allocation7 + $0x90] sm:$0xff] }
 0x1dd   :  { %v1473_v23 = vmul.f32 %v2357_v56, %v1943_v14  ;;  %v1538_v54 = vmul.f32 %v2357_v56, %v7506_v1  ;;  %v1601_v48 = vadd.f32 %v7531_v2, %v1536_v39  ;;  %vm1289_vm6 = vcmp.le.f32.partialorder %v2358_v44, 0.0  ;;  %v2360_v11 = vld [vmem:[#allocation4 + $0xd0] sm:$0xff] }
 0x1de   :  { %v1666_v24 = vmul.f32 %v7532_v30, %v1471_v58  ;;  %v1728_v17 = vadd.f32 %v1664_v22, %v1599_v42  ;;  %v1790_v33 = vmul.f32 %v1726_v21, %v7544_v51  ;;  %v1851_v62 = vadd.f32 %v1850_v60, %v1788_v36  ;;  %v7545_v56 = vld [vmem:[#allocation247_spill] sm:$0xff]  ;;  %v2361_v21 = vld [vmem:[#allocation7 + $0x98] sm:$0xff] }
 0x1df   :  { %v1946_v52 = vsel %vm1284_vm3, 1.0, %v7270_v32  ;;  %v1474_v37 = vmul.f32 %v2359_v4, %v1944_v3  ;;  %v1539_v61 = vmul.f32 %v2359_v4, %v7506_v1  ;;  %v1602_v14 = vadd.f32 %v7531_v2, %v1537_v40  ;;  %v2362_v60 = vld [vmem:[#allocation4 + $0xd8] sm:$0xff] }
 0x1e0   :  { %vm1290_vm13 = vcmp.le.f32.partialorder %v2360_v11, 0.0  ;;  %v1667_v39 = vmul.f32 %v7532_v30, %v1472_v25  ;;  %v1729_v26 = vadd.f32 %v1665_v63, %v1600_v13  ;;  %v1791_v58 = vmul.f32 %v1727_v53, %v7545_v56  ;;  %v7546_v4 = vld [vmem:[#allocation268_spill] sm:$0xff]  ;;  %v2363_v53 = vld [vmem:[#allocation7 + $0xa0] sm:$0xff] }
 0x1e1   :  { %v1852_v42 = vadd.f32 %v1851_v62, %v1789_v12  ;;  %v1947_v22 = vsel %vm1285_vm12, 1.0, %v7270_v32  ;;  %v1475_v43 = vmul.f32 %v2361_v21, %v1945_v0  ;;  %v1540_v36 = vmul.f32 %v2361_v21, %v7506_v1  ;;  %v2364_v62 = vld [vmem:[#allocation4 + $0xe0] sm:$0xff]  ;;  %v7547_v21 = vld [vmem:[#allocation248_spill] sm:$0xff] }
 0x1e2   :  { %v1603_v3 = vadd.f32 %v7531_v2, %v1538_v54  ;;  %vm1291_vm8 = vcmp.le.f32.partialorder %v2362_v60, 0.0  ;;  %v1668_v40 = vmul.f32 %v7532_v30, %v1473_v23  ;;  %v1730_v51 = vadd.f32 %v1666_v24, %v1601_v48 }
 0x1e3   :  { %v1792_v25 = vmul.f32 %v1728_v17, %v7546_v4  ;;  %v1853_v13 = vadd.f32 %v1852_v42, %v1790_v33  ;;  %v1948_v63 = vsel %vm1286_vm0, 1.0, %v7270_v32  ;;  %v1476_v50 = vmul.f32 %v2363_v53, %v1946_v52  ;;  %v2365_v17 = vld [vmem:[#allocation7 + $0xa8] sm:$0xff] }
 0x1e4   :  { %v1541_v12 = vmul.f32 %v2363_v53, %v7506_v1  ;;  %v1604_v0 = vadd.f32 %v7531_v2, %v1539_v61  ;;  %vm1292_vm4 = vcmp.le.f32.partialorder %v2364_v62, 0.0  ;;  %v1669_v54 = vmul.f32 %v7532_v30, %v1474_v37  ;;  %v2366_v42 = vld [vmem:[#allocation4 + $0xe8] sm:$0xff]  ;;  %v7548_v53 = vld [vmem:[#allocation269_spill] sm:$0xff] }
 0x1e5   :  { %v1731_v56 = vadd.f32 %v1667_v39, %v1602_v14  ;;  %v1793_v23 = vmul.f32 %v1729_v26, %v7547_v21  ;;  %v1854_v48 = vadd.f32 %v1853_v13, %v1791_v58  ;;  %v1949_v24 = vsel %vm1287_vm1, 1.0, %v7270_v32  ;;  %v2367_v26 = vld [vmem:[#allocation7 + $0xb0] sm:$0xff] }
 0x1e6   :  { %v1477_v18 = vmul.f32 %v2365_v17, %v1947_v22  ;;  %v1542_v33 = vmul.f32 %v2365_v17, %v7506_v1  ;;  %v1605_v52 = vadd.f32 %v7531_v2, %v1540_v36  ;;  %vm1293_vm9 = vcmp.le.f32.partialorder %v2366_v42, 0.0  ;;  %v2368_v13 = vld [vmem:[#allocation4 + $0xf0] sm:$0xff]  ;;  %v7549_v17 = vld [vmem:[#allocation249_spill] sm:$0xff] }
 0x1e7   :  { %v1670_v61 = vmul.f32 %v7532_v30, %v1475_v43  ;;  %v1732_v4 = vadd.f32 %v1668_v40, %v1603_v3  ;;  %v1794_v37 = vmul.f32 %v1730_v51, %v7548_v53  ;;  %v1855_v14 = vadd.f32 %v1854_v48, %v1792_v25  ;;  %v2369_v51 = vld [vmem:[#allocation7 + $0xb8] sm:$0xff] }
 0x1e8   :  { %v1950_v39 = vsel %vm1288_vm15, 1.0, %v7270_v32  ;;  %v1478_v47 = vmul.f32 %v2367_v26, %v1948_v63  ;;  %v1543_v58 = vmul.f32 %v2367_v26, %v7506_v1  ;;  %v1606_v22 = vadd.f32 %v7531_v2, %v1541_v12  ;;  %v2370_v48 = vld [vmem:[#allocation4 + $0xf8] sm:$0xff]  ;;  %v7550_v26 = vld [vmem:[#allocation270_spill] sm:$0xff] }
 0x1e9   :  { %vm1294_vm7 = vcmp.le.f32.partialorder %v2368_v13, 0.0  ;;  %v1671_v36 = vmul.f32 %v7532_v30, %v1476_v50  ;;  %v1733_v21 = vadd.f32 %v1669_v54, %v1604_v0  ;;  %v1795_v43 = vmul.f32 %v1731_v56, %v7549_v17  ;;  %v2371_v56 = vld [vmem:[#allocation7 + $0xc0] sm:$0xff] }
 0x1ea   :  { %v1856_v3 = vadd.f32 %v1855_v14, %v1793_v23  ;;  %v1951_v40 = vsel %vm1289_vm6, 1.0, %v7270_v32  ;;  %v1479_v57 = vmul.f32 %v2369_v51, %v1949_v24  ;;  %v1544_v25 = vmul.f32 %v2369_v51, %v7506_v1  ;;  %v2372_v14 = vld [vmem:[#allocation4 + $0x100] sm:$0xff]  ;;  %v7551_v51 = vld [vmem:[#allocation250_spill] sm:$0xff] }
 0x1eb   :  { %v1607_v63 = vadd.f32 %v7531_v2, %v1542_v33  ;;  %vm1295_vm2 = vcmp.le.f32.partialorder %v2370_v48, 0.0  ;;  %v1672_v12 = vmul.f32 %v7532_v30, %v1477_v18  ;;  %v1734_v53 = vadd.f32 %v1670_v61, %v1605_v52 }
 0x1ec   :  { %v1796_v50 = vmul.f32 %v1732_v4, %v7550_v26  ;;  %v1857_v0 = vadd.f32 %v1856_v3, %v1794_v37  ;;  %v1952_v54 = vsel %vm1290_vm13, 1.0, %v7270_v32  ;;  %v1480_v44 = vmul.f32 %v2371_v56, %v1950_v39  ;;  %v2373_v4 = vld [vmem:[#allocation7 + $0xc8] sm:$0xff] }
 0x1ed   :  { %v1545_v23 = vmul.f32 %v2371_v56, %v7506_v1  ;;  %v1608_v24 = vadd.f32 %v7531_v2, %v1543_v58  ;;  %vm1296_vm11 = vcmp.le.f32.partialorder %v2372_v14, 0.0  ;;  %v1673_v33 = vmul.f32 %v7532_v30, %v1478_v47  ;;  %v7556_v14 = vld [vmem:[#allocation108_spill] sm:$0xff] }
 0x1ee   :  { %v1735_v17 = vadd.f32 %v1671_v36, %v1606_v22  ;;  %v1797_v18 = vmul.f32 %v1733_v21, %v7551_v51  ;;  %v1858_v52 = vadd.f32 %v1857_v0, %v1795_v43  ;;  %v1953_v61 = vsel %vm1291_vm8, 1.0, %v7270_v32  ;;  %v2374_v22 = vld [vmem:[#allocation7 + $0xd0] sm:$0xff] }
 0x1ef   :  { %v1481_v11 = vmul.f32 %v2373_v4, %v1951_v40  ;;  %v1546_v37 = vmul.f32 %v2373_v4, %v7506_v1  ;;  %v1609_v39 = vadd.f32 %v7531_v2, %v1544_v25  ;;  %v1674_v3 = vmul.f32 %v7532_v30, %v1479_v57 }
 0x1f0   :  { %v1736_v58 = vadd.f32 %v1672_v12, %v1607_v63  ;;  %v1798_v26 = vmul.f32 %v1734_v53, %v5289_v28  ;;  %v1859_v56 = vadd.f32 %v1858_v52, %v1796_v50  ;;  %v1954_v47 = vsel %vm1292_vm4, 1.0, %v7270_v32  ;;  %v2375_v28 = vld [vmem:[#allocation7 + $0xd8] sm:$0xff] }
 0x1f1   :  { %v1482_v36 = vmul.f32 %v2374_v22, %v1952_v54  ;;  %v1547_v60 = vmul.f32 %v2374_v22, %v7506_v1  ;;  %v1610_v21 = vadd.f32 %v7531_v2, %v1545_v23  ;;  %v1675_v43 = vmul.f32 %v7532_v30, %v1480_v44  ;;  %v7552_v22 = vld [vmem:[#allocation65_spill] sm:$0xff] }
 0x1f2   :  { %v1737_v40 = vadd.f32 %v1673_v33, %v1608_v24  ;;  %v1799_v25 = vmul.f32 %v1735_v17, %v5297_v34  ;;  %v1860_v0 = vadd.f32 %v1859_v56, %v1797_v18  ;;  %v1955_v57 = vsel %vm1293_vm9, 1.0, %v7270_v32  ;;  %v2376_v34 = vld [vmem:[#allocation7 + $0xe0] sm:$0xff] }
 0x1f3   :  { %v1483_v63 = vmul.f32 %v2375_v28, %v1953_v61  ;;  %v1548_v62 = vmul.f32 %v2375_v28, %v7506_v1  ;;  %v1611_v12 = vadd.f32 %v7531_v2, %v1546_v37  ;;  %v1676_v53 = vmul.f32 %v7532_v30, %v1481_v11 }
 0x1f4   :  { %v1738_v50 = vadd.f32 %v1674_v3, %v1609_v39  ;;  %v1800_v54 = vmul.f32 %v1736_v58, %v5305_v41  ;;  %v1861_v23 = vadd.f32 %v1860_v0, %v1798_v26  ;;  %v1956_v44 = vsel %vm1294_vm7, 1.0, %v7270_v32  ;;  %v2377_v41 = vld [vmem:[#allocation7 + $0xe8] sm:$0xff]  ;;  %v7560_v0 = vld [vmem:[#allocation25_spill] sm:$0xff] }
 0x1f5   :  { %v1484_v24 = vmul.f32 %v2376_v34, %v1954_v47  ;;  %v1549_v42 = vmul.f32 %v2376_v34, %v7506_v1  ;;  %v1612_v33 = vadd.f32 %v7531_v2, %v1547_v60  ;;  %v1677_v17 = vmul.f32 %v7532_v30, %v1482_v36  ;;  %v7563_v34 = vld [vmem:[#allocation194_spill] sm:$0xff]  ;;  %v7695_v60 = vld [vmem:[#allocation45_spill] sm:$0xff] }
 0x1f6   :  { %v1739_v51 = vadd.f32 %v1675_v43, %v1610_v21  ;;  %v1801_v18 = vmul.f32 %v1737_v40, %v5313_v8  ;;  %v1862_v52 = vadd.f32 %v1861_v23, %v1799_v25  ;;  %v1957_v61 = vsel %vm1295_vm2, 1.0, %v7270_v32  ;;  %v2378_v8 = vld [vmem:[#allocation7 + $0xf0] sm:$0xff]  ;;  %v7559_v25 = vld [vmem:[#allocation164_spill] sm:$0xff] }
 0x1f7   :  { %v1485_v4 = vmul.f32 %v2377_v41, %v1955_v57  ;;  %v1550_v13 = vmul.f32 %v2377_v41, %v7506_v1  ;;  %v1613_v11 = vadd.f32 %v7531_v2, %v1548_v62  ;;  %v1678_v37 = vmul.f32 %v7532_v30, %v1483_v63  ;;  %v2379_v63 = vld [vmem:[#allocation7 + $0xf8] sm:$0xff]  ;;  %v7568_v41 = vld [vmem:[#allocation91_spill] sm:$0xff] }
 0x1f8   :  { %v1740_v39 = vadd.f32 %v1676_v53, %v1611_v12  ;;  %v1802_v3 = vmul.f32 %v1738_v50, %v5451_v20  ;;  %v1863_v58 = vadd.f32 %v1862_v52, %v1800_v54  ;;  %v1958_v26 = vsel %vm1296_vm11, 1.0, %v7270_v32  ;;  %v7557_v32 = vld [vmem:[#allocation191_spill] sm:$0xff] }
 0x1f9   :  { %v1486_v56 = vmul.f32 %v2378_v8, %v1956_v44  ;;  %v1551_v48 = vmul.f32 %v2378_v8, %v7506_v1  ;;  %v1614_v47 = vadd.f32 %v7531_v2, %v1549_v42  ;;  %v7553_v36 = vand.u32 2147483647, %v7552_v22  ;;  %v7562_v44 = vld [vmem:[#allocation34_spill] sm:$0xff]  ;;  %v7566_v42 = vld [vmem:[#allocation201_spill] sm:$0xff]  ;;  %v7573_v8 = vld [vmem:[#allocation35_spill] sm:$0xff] }
 0x1fa   :  { %v1679_v21 = vmul.f32 %v7532_v30, %v1484_v24  ;;  %v1741_v43 = vadd.f32 %v1677_v17, %v1612_v33  ;;  %v1803_v20 = vmul.f32 %v1739_v51, %v5459_v7  ;;  %v1864_v40 = vadd.f32 %v1863_v58, %v1801_v18  ;;  %v7565_v24 = vld [vmem:[#allocation168_spill] sm:$0xff]  ;;  %v2380_v51 = vld [vmem:[#allocation7 + $0x100] sm:$0xff]  ;;  %v7577_v22 = vld [vmem:[#allocation30_spill] sm:$0xff] }
 0x1fb   :  { %vm5647_vm5 = vcmp.lt.f32.partialorder %v7553_v36, 0.0004427343  ;;  %vm7558_vm10 = vnez %v7557_v32  ;;  %v1487_v62 = vmul.f32 %v2379_v63, %v1957_v61  ;;  %v1552_v12 = vmul.f32 %v2379_v63, %v7506_v1 }
 0x1fc   :  { %v7561_v57 = vsel %vm7558_vm10, %v7559_v25, %v7560_v0  ;;  %v1615_v53 = vadd.f32 %v7531_v2, %v1550_v13  ;;  %v1680_v50 = vmul.f32 %v7532_v30, %v1485_v4  ;;  %v1742_v54 = vadd.f32 %v1678_v37, %v1613_v11  ;;  %v7700_v4 = vld [vmem:[#allocation46_spill] sm:$0xff] }
 0x1fd   :  { %v1227_v28 = vadd.f32 %v7561_v57, %v7556_v14  ;;  %v1804_v23 = vmul.f32 %v1740_v39, %v5467_v10  ;;  %v1865_v7 = vadd.f32 %v1864_v40, %v1802_v3  ;;  %vm7564_vm3 = vnez %v7563_v34  ;;  %v7572_v3 = vld [vmem:[#allocation116_spill] sm:$0xff]  ;;  %v7584_v57 = vld [vmem:[#allocation117_spill] sm:$0xff] }
 0x1fe   :  { %v7567_v33 = vsel %vm7564_vm3, %v7565_v24, %v7566_v42  ;;  %v1488_v18 = vmul.f32 %v2380_v51, %v1958_v26  ;;  %v1553_v52 = vmul.f32 %v2380_v51, %v7506_v1  ;;  %v1616_v61 = vadd.f32 %v7531_v2, %v1551_v48  ;;  %v7574_v1 = vld [vmem:[#allocation196_spill] sm:$0xff]  ;;  %v7591_v42 = vld [vmem:[#allocation233_spill] sm:$0xff]  ;;  %v7592_v51 = vld [vmem:[#allocation234_spill] sm:$0xff] }
 0x1ff   :  { %v1228_v17 = vadd.f32 %v7567_v33, %v7562_v44  ;;  %v7569_v13 = vand.u32 2147483647, %v7568_v41  ;;  %v1681_v10 = vmul.f32 %v7532_v30, %v1486_v56  ;;  %v1743_v11 = vadd.f32 %v1679_v21, %v1614_v47  ;;  %v7576_v48 = vld [vmem:[#allocation180_spill] sm:$0xff]  ;;  %v7586_v44 = vld [vmem:[#allocation197_spill] sm:$0xff] }
 0x200   :  { %v1805_v37 = vmul.f32 %v1741_v43, %v5475_v59  ;;  %v1866_v39 = vadd.f32 %v1865_v7, %v1803_v20  ;;  %v1050_v58 = vmul.f32 -0.5, %v7572_v3  ;;  %v1053_v26 = vand.u32 2147483647, %v7572_v3  ;;  %v7579_v59 = vld [vmem:[#allocation235_spill] sm:$0xff]  ;;  %v7585_v7 = vld [vmem:[#allocation36_spill] sm:$0xff] }
 0x201   :  { %vm5673_vm12 = vcmp.lt.f32.partialorder %v7569_v13, 0.0004427343  ;;  %vm7575_vm0 = vnez %v7574_v1  ;;  %v1617_v14 = vadd.f32 %v7531_v2, %v1552_v12  ;;  %v1682_v32 = vmul.f32 %v7532_v30, %v1487_v62  ;;  %v7580_v20 = vld [vmem:[#allocation111_spill] sm:$0xff]  ;;  %v7588_v12 = vld [vmem:[#allocation192_spill] sm:$0xff]  ;;  %v7596_v1 = vld [vmem:[#allocation198_spill] sm:$0xff] }
 0x202   :  { %v7578_v36 = vsel %vm7575_vm0, %v7576_v48, %v7577_v22  ;;  %v1744_v56 = vadd.f32 %v1680_v50, %v1615_v53  ;;  %v1806_v47 = vmul.f32 %v1742_v54, %v1227_v28  ;;  %v1867_v21 = vadd.f32 %v1866_v39, %v1804_v23  ;;  %v7589_v34 = vld [vmem:[#allocation204_spill] sm:$0xff]  ;;  %v7593_v39 = vld [vmem:[#allocation77_spill] sm:$0xff] }
 0x203   :  { %v1229_v40 = vadd.f32 %v7578_v36, %v7573_v8  ;;  %v5690_v43 = vmul.f32 0.6931472, %v7579_v59  ;;  %v7581_v25 = vand.u32 2147483647, %v7580_v20  ;;  %v1059_v63 = vmul.f32 -0.5, %v7584_v57  ;;  %v7594_v8 = vld [vmem:[#allocation199_spill] sm:$0xff] }
 0x204   :  { %vm7587_vm15 = vnez %v7586_v44  ;;  %v1618_v28 = vadd.f32 %v7531_v2, %v1553_v52  ;;  %v1683_v50 = vmul.f32 %v7532_v30, %v1488_v18  ;;  %v1745_v54 = vadd.f32 %v1681_v10, %v1616_v61  ;;  %v7597_v48 = vld [vmem:[#allocation205_spill] sm:$0xff]  ;;  %v7600_v61 = vld [vmem:[#allocation236_spill] sm:$0xff] }
 0x205   :  { %vm5694_vm1 = vcmp.lt.f32.partialorder %v7581_v25, 0.0004427343  ;;  %v7590_v62 = vsel %vm7587_vm15, %v7588_v12, %v7589_v34  ;;  %v1807_v23 = vmul.f32 %v1743_v11, %v1228_v17  ;;  %v1868_v24 = vadd.f32 %v1867_v21, %v1805_v37  ;;  %v7599_v17 = vld [vmem:[#allocation228_spill] sm:$0xff]  ;;  %v7601_v37 = vld [vmem:[#allocation119_spill] sm:$0xff]  ;;  %v7612_v34 = vld [vmem:[#allocation114_spill] sm:$0xff] }
 0x206   :  { %v1230_v53 = vadd.f32 %v7590_v62, %v7585_v7  ;;  %v1042_v33 = vadd.f32 1.0, %v7591_v42  ;;  %2219 = vlog2.f32 %v7592_v51  ;;  %v1051_v41 = vadd.f32 1.0, %v1050_v58  ;;  %v7602_v21 = vld [vmem:[#allocation112_spill] sm:$0xff]  ;;  %v7613_v42 = vld [vmem:[#allocation237_spill] sm:$0xff] }
 0x207   :  { %v1056_v13 = vadd.f32 1.0, %v7584_v57  ;;  %vm7595_vm6 = vnez %v7594_v8  ;;  %v1746_v2 = vadd.f32 %v1682_v32, %v1617_v14  ;;  %v1808_v52 = vmul.f32 %v1744_v56, %v1229_v40  ;;  %v7606_v14 = vld [vmem:[#allocation37_spill] sm:$0xff]  ;;  %v7607_v40 = vld [vmem:[#allocation203_spill] sm:$0xff]  ;;  %v7609_v32 = vld [vmem:[#allocation202_spill] sm:$0xff] }
 0x208   :  { %v7598_v22 = vsel %vm7595_vm6, %v7596_v1, %v7597_v48  ;;  %v1869_v30 = vadd.f32 %v1868_v24, %v1806_v47  ;;  %v5721_v10 = vmul.f32 0.6931472, %v7600_v61  ;;  %v1060_v11 = vadd.f32 1.0, %v1059_v63  ;;  %v7610_v56 = vld [vmem:[#allocation58_spill] sm:$0xff]  ;;  %v7623_v48 = vld [vmem:[#allocation229_spill] sm:$0xff]  ;;  %v7624_v61 = vld [vmem:[#allocation120_spill] sm:$0xff] }
 0x209   :  { %v1231_v36 = vadd.f32 %v7598_v22, %v7593_v39  ;;  %v1065_v58 = vadd.f32 1.0, %v7601_v37  ;;  %v7603_v59 = vand.u32 2147483647, %v7602_v21  ;;  %vm7608_vm8 = vnez %v7607_v40  ;;  %v7631_v40 = vld [vmem:[#allocation210_spill] sm:$0xff]  ;;  %v7662_v22 = vld [vmem:[#allocation81_spill] sm:$0xff]  ;;  %v7711_v8 = vld [vmem:[#allocation47_spill] sm:$0xff] }
 0x20a   :  { %v7611_v47 = vsel %vm7608_vm8, %v7609_v32, %v7610_v56  ;;  %v1747_v7 = vadd.f32 %v1683_v50, %v1618_v28  ;;  %v1809_v44 = vmul.f32 %v1745_v54, %v1230_v53  ;;  %v1870_v12 = vadd.f32 %v1869_v30, %v1807_v23  ;;  %v7617_v28 = vld [vmem:[#allocation109_spill] sm:$0xff]  ;;  %v7618_v53 = vld [vmem:[#allocation38_spill] sm:$0xff]  ;;  %v7621_v54 = vld [vmem:[#allocation208_spill] sm:$0xff] }
 0x20b   :  { %vm5726_vm13 = vcmp.lt.f32.partialorder %v7603_v59, 0.0004427343  ;;  %v1232_v25 = vadd.f32 %v7611_v47, %v7606_v14  ;;  %v5737_v63 = vmul.f32 %v7612_v34, %v1042_v33  ;;  %2221 = vlog2.f32 %v1056_v13  ;;  %v7620_v50 = vld [vmem:[#allocation206_spill] sm:$0xff]  ;;  %v7663_v18 = vld [vmem:[#allocation217_spill] sm:$0xff]  ;;  %v7716_v59 = vld [vmem:[#allocation23_spill] sm:$0xff] }
 0x20c   :  { %v1062_v62 = vand.u32 2147483647, %v7584_v57  ;;  %v1068_v24 = vmul.f32 -0.5, %v7601_v37  ;;  %v5742_v51 = vmul.f32 0.6931472, %v7613_v42  ;;  %vm7619_vm9 = vnez %v7618_v53  ;;  %v7634_v42 = vld [vmem:[#allocation230_spill] sm:$0xff] }
 0x20d   :  { %v7614_v39 = vand.u32 2147483647, %v7612_v34  ;;  %v7622_v23 = vsel %vm7619_vm9, %v7620_v50, %v7621_v54  ;;  %v1810_v13 = vmul.f32 %v1746_v2, %v1231_v36  ;;  %v1871_v1 = vadd.f32 %v1870_v12, %v1808_v52  ;;  %v7627_v36 = vld [vmem:[#allocation79_spill] sm:$0xff]  ;;  %v7628_v2 = vld [vmem:[#allocation61_spill] sm:$0xff]  ;;  %v7630_v52 = vld [vmem:[#allocation60_spill] sm:$0xff] }
 0x20e   :  { %v1233_v33 = vadd.f32 %v7622_v23, %v7617_v28  ;;  %v5761_v30 = vmul.f32 %v7572_v3, %v1051_v41  ;;  %2223 = vlog2.f32 %v1065_v58  ;;  %v1074_v21 = vadd.f32 1.0, %v7624_v61  ;;  %v7633_v12 = vld [vmem:[#allocation123_spill] sm:$0xff]  ;;  %v7639_v53 = vld [vmem:[#allocation213_spill] sm:$0xff]  ;;  %v7641_v54 = vld [vmem:[#allocation238_spill] sm:$0xff] }
 0x20f   :  { %vm5746_vm4 = vcmp.lt.f32.partialorder %v7614_v39, 0.0004427343  ;;  %vm5764_vm7 = vcmp.lt.f32.partialorder %v1053_v26, 0.0004427343  ;;  %v5769_v14 = vmul.f32 %v7584_v57, %v1060_v11  ;;  %vm7629_vm2 = vnez %v7628_v2  ;;  %v7635_v11 = vld [vmem:[#allocation39_spill] sm:$0xff]  ;;  %v7655_v57 = vld [vmem:[#allocation212_spill] sm:$0xff] }
 0x210   :  { %v7632_v32 = vsel %vm7629_vm2, %v7630_v52, %v7631_v40  ;;  %v1811_v47 = vmul.f32 %v1747_v7, %v1232_v25  ;;  %v1872_v3 = vadd.f32 %v1871_v1, %v1809_v44  ;;  %v1069_v41 = vadd.f32 1.0, %v1068_v24  ;;  %v7636_v39 = vld [vmem:[#allocation207_spill] sm:$0xff]  ;;  %v2220_v24 = vpop.eup %2219 }
 0x211   :  { %v1234_v56 = vadd.f32 %v7632_v32, %v7627_v36  ;;  %v1071_v58 = vand.u32 2147483647, %v7601_v37  ;;  %v1077_v26 = vmul.f32 -0.5, %v7624_v61  ;;  %v1083_v34 = vadd.f32 1.0, %v7633_v12  ;;  %v7638_v28 = vld [vmem:[#allocation211_spill] sm:$0xff]  ;;  %v7645_v32 = vld [vmem:[#allocation40_spill] sm:$0xff] }
 0x212   :  { %vm7637_vm11 = vnez %v7636_v39  ;;  %v1812_v7 = vmul.f32 %v5321_v27, %v1233_v33  ;;  %v1873_v44 = vadd.f32 %v1872_v3, %v1810_v13  ;;  %v5792_v23 = vmul.f32 0.6931472, %v7641_v54  ;;  %v7642_v1 = vld [vmem:[#allocation239_spill] sm:$0xff]  ;;  %v7648_v27 = vld [vmem:[#allocation214_spill] sm:$0xff] }
 0x213   :  { %v7640_v50 = vsel %vm7637_vm11, %v7638_v28, %v7639_v53  ;;  %v5795_v36 = vmul.f32 0.6931472, %v7642_v1  ;;  %2225 = vlog2.f32 %v1074_v21  ;;  %v1080_v2 = vand.u32 2147483647, %v7624_v61  ;;  %v7649_v33 = vld [vmem:[#allocation218_spill] sm:$0xff] }
 0x214   :  { %v1235_v25 = vadd.f32 %v7640_v50, %v7635_v11  ;;  %vm5798_vm10 = vcmp.lt.f32.partialorder %v1062_v62, 0.0004427343  ;;  %v1086_v40 = vmul.f32 -0.5, %v7633_v12  ;;  %v7646_v11 = vld [vmem:[#allocation209_spill] sm:$0xff]  ;;  %v1813_v39 = vmul.f32 %v5325_v29, %v1234_v56  ;;  %v7651_v62 = vld [vmem:[#allocation124_spill] sm:$0xff] }
 0x215   :  { %vm7647_vm3 = vnez %v7646_v11  ;;  %v1874_v28 = vadd.f32 %v1873_v44, %v1811_v47  ;;  %v5811_v21 = vmul.f32 %v7601_v37, %v1069_v41  ;;  %v1078_v53 = vadd.f32 1.0, %v1077_v26  ;;  %v7654_v11 = vld [vmem:[#allocation41_spill] sm:$0xff]  ;;  %v2222_v41 = vpop.eup %2221 }
 0x216   :  { %v7650_v13 = vsel %vm7647_vm3, %v7648_v27, %v7649_v33  ;;  %2227 = vlog2.f32 %v1083_v34  ;;  %v1092_v50 = vadd.f32 1.0, %v7651_v62  ;;  %vm5814_vm0 = vcmp.lt.f32.partialorder %v1071_v58, 0.0004427343  ;;  %v7658_v27 = vld [vmem:[#allocation223_spill] sm:$0xff]  ;;  %v7660_v26 = vld [vmem:[#allocation241_spill] sm:$0xff]  ;;  %v7685_v58 = vld [vmem:[#allocation44_spill] sm:$0xff] }
 0x217   :  { %v1236_v3 = vadd.f32 %v7650_v13, %v7645_v32  ;;  %v1095_v1 = vmul.f32 -0.5, %v7651_v62  ;;  %vm7656_vm15 = vnez %v7655_v57  ;;  %v7657_v32 = vld [vmem:[#allocation215_spill] sm:$0xff]  ;;  %v1814_v37 = vmul.f32 %v5329_v38, %v1235_v25  ;;  %v7661_v33 = vld [vmem:[#allocation125_spill] sm:$0xff] }
 0x218   :  { %v7659_v29 = vsel %vm7656_vm15, %v7657_v32, %v7658_v27  ;;  %v1875_v47 = vadd.f32 %v1874_v28, %v1812_v7  ;;  %v5830_v34 = vmul.f32 0.6931472, %v2220_v24  ;;  %v1089_v44 = vand.u32 2147483647, %v7633_v12  ;;  %v7666_v32 = vld [vmem:[#allocation224_spill] sm:$0xff]  ;;  %v2224_v27 = vpop.eup %2223 }
 0x219   :  { %v1237_v56 = vadd.f32 %v7659_v29, %v7654_v11  ;;  %v1104_v13 = vmul.f32 -0.5, %v7661_v33  ;;  %v1087_v57 = vadd.f32 1.0, %v1086_v40  ;;  %vm7664_vm6 = vnez %v7663_v18  ;;  %v7665_v11 = vld [vmem:[#allocation216_spill] sm:$0xff] }
 0x21a   :  { %v7667_v38 = vsel %vm7664_vm6, %v7665_v11, %v7666_v32  ;;  %v1815_v7 = vmul.f32 %v5333_v46, %v1236_v3  ;;  %v1876_v28 = vadd.f32 %v1875_v47, %v1813_v39  ;;  %v5846_v29 = vmul.f32 %v7624_v61, %v1078_v53  ;;  %v7670_v11 = vld [vmem:[#allocation42_spill] sm:$0xff]  ;;  %v7671_v46 = vld [vmem:[#allocation219_spill] sm:$0xff]  ;;  %v7673_v3 = vld [vmem:[#allocation220_spill] sm:$0xff] }
 0x21b   :  { %v1238_v25 = vadd.f32 %v7667_v38, %v7662_v22  ;;  %2229 = vlog2.f32 %v1092_v50  ;;  %v1101_v40 = vadd.f32 1.0, %v7661_v33  ;;  %vm5849_vm8 = vcmp.lt.f32.partialorder %v1080_v2, 0.0004427343  ;;  %v7674_v39 = vld [vmem:[#allocation225_spill] sm:$0xff] }
 0x21c   :  { %v1096_v22 = vadd.f32 1.0, %v1095_v1  ;;  %vm7672_vm9 = vnez %v7671_v46  ;;  %v1816_v38 = vmul.f32 %v5337_v15, %v1237_v56  ;;  %v1877_v24 = vadd.f32 %v1876_v28, %v1814_v37  ;;  %v7679_v15 = vld [vmem:[#allocation221_spill] sm:$0xff]  ;;  %v7681_v56 = vld [vmem:[#allocation222_spill] sm:$0xff]  ;;  %v7682_v37 = vld [vmem:[#allocation227_spill] sm:$0xff] }
 0x21d   :  { %v7675_v47 = vsel %vm7672_vm9, %v7673_v3, %v7674_v39  ;;  %v5864_v2 = vmul.f32 0.6931472, %v2222_v41  ;;  %v1098_v53 = vand.u32 2147483647, %v7651_v62  ;;  %v1105_v50 = vadd.f32 1.0, %v1104_v13 }
 0x21e   :  { %v1239_v32 = vadd.f32 %v7675_v47, %v7670_v11  ;;  %v5868_v1 = vmul.f32 %v7633_v12, %v1087_v57  ;;  %vm5870_vm2 = vcmp.lt.f32.partialorder %v1089_v44, 0.0004427343  ;;  %v7678_v11 = vld [vmem:[#allocation43_spill] sm:$0xff]  ;;  %vm7680_vm11 = vnez %v7679_v15  ;;  %v2226_v47 = vpop.eup %2225  ;;  %v7687_v15 = vld [vmem:[#allocation226_spill] sm:$0xff] }
 0x21f   :  { %v7683_v28 = vsel %vm7680_vm11, %v7681_v56, %v7682_v37  ;;  %v1817_v41 = vmul.f32 %v5341_v35, %v1238_v25  ;;  %v1878_v39 = vadd.f32 %v1877_v24, %v1815_v7  ;;  %v5881_v61 = vmul.f32 0.6931472, %v2224_v27  ;;  %v7684_v44 = vld [vmem:[#allocation127_spill] sm:$0xff] }
 0x220   :  { %v1240_v3 = vadd.f32 %v7683_v28, %v7678_v11  ;;  %2231 = vlog2.f32 %v1101_v40  ;;  %v1107_v12 = vand.u32 2147483647, %v7661_v33  ;;  %v1113_v13 = vmul.f32 -0.5, %v7684_v44  ;;  %v2228_v7 = vpop.eup %2227  ;;  %v7697_v28 = vld [vmem:[#allocation130_spill] sm:$0xff] }
 0x221   :  { %v1110_v57 = vadd.f32 1.0, %v7684_v44  ;;  %v7689_v56 = vsel %vm5000_vm14, %v7687_v15, %v7688_v55  ;;  %v1818_v35 = vmul.f32 %v5345_v5, %v1239_v32  ;;  %v1879_v25 = vadd.f32 %v1878_v39, %v1816_v38 }
 0x222   :  { %v1241_v11 = vadd.f32 %v7689_v56, %v7685_v58  ;;  %v1064_v27 = vsel %vm5798_vm10, %v5769_v14, %v5864_v2  ;;  %v5898_v24 = vmul.f32 %v7651_v62, %v1096_v22  ;;  %v5901_v40 = vmul.f32 %v7661_v33, %v1105_v50  ;;  %v7691_v58 = vld [vmem:[#allocation83_spill] sm:$0xff]  ;;  %v7703_v56 = vld [vmem:[#allocation20_spill] sm:$0xff] }
 0x223   :  { %v1122_v37 = vmul.f32 -0.5, %v7690_v16  ;;  %v1119_v55 = vadd.f32 1.0, %v7690_v16  ;;  %v7692_v5 = vsel %vm5647_vm5, %v7599_v17, %v5690_v43  ;;  %v1819_v52 = vmul.f32 %v5349_v31, %v1240_v3 }
 0x224   :  { %v1242_v32 = vadd.f32 %v7692_v5, %v7691_v58  ;;  %v1880_v14 = vadd.f32 %v1879_v25, %v1817_v41  ;;  %v1073_v62 = vsel %vm5814_vm0, %v5811_v21, %v5881_v61  ;;  %v5916_v33 = vmul.f32 0.6931472, %v2226_v47  ;;  %v7705_v25 = vld [vmem:[#allocation133_spill] sm:$0xff]  ;;  %v7710_v58 = vld [vmem:[#allocation54_spill] sm:$0xff] }
 0x225   :  { %v1114_v22 = vadd.f32 1.0, %v1113_v13  ;;  %v1116_v38 = vand.u32 2147483647, %v7684_v44  ;;  %vm5919_vm14 = vcmp.lt.f32.partialorder %v1098_v53, 0.0004427343  ;;  %2233 = vlog2.f32 %v1110_v57  ;;  %v2230_v54 = vpop.eup %2229  ;;  %v7702_v57 = vld [vmem:[#allocation132_spill] sm:$0xff] }
 0x226   :  { %v7696_v31 = vsel %vm5673_vm12, %v7623_v48, %v5721_v10  ;;  %v1820_v17 = vmul.f32 %v5353_v45, %v1241_v11  ;;  %v1881_v21 = vadd.f32 %v1880_v14, %v1818_v35  ;;  %v5930_v61 = vmul.f32 0.6931472, %v2228_v7  ;;  %v7706_v7 = vld [vmem:[#allocation21_spill] sm:$0xff] }
 0x227   :  { %v1243_v43 = vadd.f32 %v7696_v31, %v7695_v60  ;;  %v1123_v50 = vadd.f32 1.0, %v1122_v37  ;;  %v1128_v53 = vadd.f32 1.0, %v7697_v28  ;;  %v1131_v3 = vmul.f32 -0.5, %v7697_v28 }
 0x228   :  { %vm5934_vm5 = vcmp.lt.f32.partialorder %v1107_v12, 0.0004427343  ;;  %2235 = vlog2.f32 %v1119_v55  ;;  %v7701_v45 = vsel %vm5694_vm1, %v7634_v42, %v5742_v51  ;;  %v1821_v48 = vmul.f32 %v5357_v9, %v1242_v32 }
 0x229   :  { %v1244_v10 = vadd.f32 %v7701_v45, %v7700_v4  ;;  %v1882_v39 = vadd.f32 %v1881_v21, %v1819_v52  ;;  %v1082_v47 = vsel %vm5849_vm8, %v5846_v29, %v5916_v33  ;;  %v5950_v12 = vmul.f32 %v7684_v44, %v1114_v22  ;;  %v7713_v22 = vld [vmem:[#allocation135_spill] sm:$0xff] }
 0x22a   :  { %v1125_v13 = vand.u32 2147483647, %v7690_v16  ;;  %v1137_v15 = vadd.f32 1.0, %v7702_v57  ;;  %v1134_v0 = vand.u32 2147483647, %v7697_v28  ;;  %v7704_v9 = vsel %vm5726_vm13, %v7660_v26, %v5792_v23  ;;  %v2232_v29 = vpop.eup %2231  ;;  %v7722_v4 = vld [vmem:[#allocation251_spill] sm:$0xff] }
 0x22b   :  { %v1245_v51 = vadd.f32 %v7704_v9, %v7703_v56  ;;  %v1822_v42 = vmul.f32 %v5361_v6, %v1243_v43  ;;  %v1883_v18 = vadd.f32 %v1882_v39, %v1820_v17  ;;  %v1091_v44 = vsel %vm5870_vm2, %v5868_v1, %v5930_v61  ;;  %v7718_v61 = vld [vmem:[#allocation55_spill] sm:$0xff] }
 0x22c   :  { %v5967_v11 = vmul.f32 %v7690_v16, %v1123_v50  ;;  %2237 = vlog2.f32 %v1128_v53  ;;  %v1132_v35 = vadd.f32 1.0, %v1131_v3  ;;  %v1146_v20 = vadd.f32 1.0, %v7705_v25  ;;  %v7721_v3 = vld [vmem:[#allocation24_spill] sm:$0xff] }
 0x22d   :  { %v7707_v6 = vsel %vm5746_vm4, %v5737_v63, %v5795_v36  ;;  %v1823_v26 = vmul.f32 %v5365_v49, %v1244_v10  ;;  %v1884_v37 = vadd.f32 %v1883_v18, %v1821_v48  ;;  %v1094_v55 = vmul.f32 0.6931472, %v2230_v54 }
 0x22e   :  { %v1246_v23 = vadd.f32 %v7707_v6, %v7706_v7  ;;  %2239 = vlog2.f32 %v1137_v15  ;;  %v1140_v1 = vmul.f32 -0.5, %v7702_v57  ;;  %v1143_v46 = vand.u32 2147483647, %v7702_v57  ;;  %v7731_v7 = vld [vmem:[#allocation48_spill] sm:$0xff] }
 0x22f   :  { %vm5979_vm12 = vcmp.lt.f32.partialorder %v1116_v38, 0.0004427343  ;;  %v1155_v5 = vadd.f32 1.0, %v7710_v58  ;;  %v7712_v63 = vsel %vm5764_vm7, %v5761_v30, %v5830_v34  ;;  %v1824_v36 = vmul.f32 %v5369_v19, %v1245_v51  ;;  %v2234_v60 = vpop.eup %2233  ;;  %v7717_v34 = vld [vmem:[#allocation271_spill] sm:$0xff] }
 0x230   :  { %v1247_v49 = vadd.f32 %v7712_v63, %v7711_v8  ;;  %v1885_v32 = vadd.f32 %v1884_v37, %v1822_v42  ;;  %v1103_v52 = vmul.f32 0.6931472, %v2232_v29  ;;  %v5992_v14 = vmul.f32 %v7697_v28, %v1132_v35  ;;  %v7730_v35 = vld [vmem:[#allocation93_spill] sm:$0xff] }
 0x231   :  { %v1149_v33 = vmul.f32 -0.5, %v7705_v25  ;;  %v1164_v38 = vadd.f32 1.0, %v7713_v22  ;;  %vm5996_vm1 = vcmp.lt.f32.partialorder %v1125_v13, 0.0004427343  ;;  %2241 = vlog2.f32 %v1146_v20  ;;  %v7725_v13 = vld [vmem:[#allocation138_spill] sm:$0xff]  ;;  %v7734_v63 = vld [vmem:[#allocation273_spill] sm:$0xff] }
 0x232   :  { %v1248_v30 = vadd.f32 %v1064_v27, %v7716_v59  ;;  %v1825_v43 = vmul.f32 %v7717_v34, %v1246_v23  ;;  %v1886_v19 = vadd.f32 %v1885_v32, %v1823_v26  ;;  %v1100_v17 = vsel %vm5919_vm14, %v5898_v24, %v1094_v55  ;;  %v2236_v28 = vpop.eup %2235  ;;  %v7732_v23 = vld [vmem:[#allocation252_spill] sm:$0xff]  ;;  %v7738_v59 = vld [vmem:[#allocation253_spill] sm:$0xff] }
 0x233   :  { %v1141_v21 = vadd.f32 1.0, %v1140_v1  ;;  %v1152_v54 = vand.u32 2147483647, %v7705_v25  ;;  %v1173_v50 = vadd.f32 1.0, %v7718_v61  ;;  %vm6007_vm13 = vcmp.lt.f32.partialorder %v1134_v0, 0.0004427343 }
 0x234   :  { %2243 = vlog2.f32 %v1155_v5  ;;  %v1249_v27 = vadd.f32 %v1073_v62, %v7721_v3  ;;  %v1826_v45 = vmul.f32 %v7722_v4, %v1247_v49  ;;  %v1887_v10 = vadd.f32 %v1886_v19, %v1824_v36  ;;  %v7726_v0 = vld [vmem:[#allocation85_spill] sm:$0xff]  ;;  %v7727_v62 = vld [vmem:[#allocation272_spill] sm:$0xff]  ;;  %v7733_v5 = vld [vmem:[#allocation26_spill] sm:$0xff] }
 0x235   :  { %v1109_v24 = vsel %vm5934_vm5, %v5901_v40, %v1103_v52  ;;  %v1150_v2 = vadd.f32 1.0, %v1149_v33  ;;  %v1158_v48 = vmul.f32 -0.5, %v7710_v58  ;;  %2245 = vlog2.f32 %v1164_v38  ;;  %v7737_v38 = vld [vmem:[#allocation49_spill] sm:$0xff] }
 0x236   :  { %vm6017_vm4 = vcmp.lt.f32.partialorder %v1143_v46, 0.0004427343  ;;  %v1182_v15 = vadd.f32 1.0, %v7725_v13  ;;  %v1250_v56 = vadd.f32 %v1082_v47, %v7726_v0  ;;  %v1827_v9 = vmul.f32 %v7727_v62, %v1248_v30  ;;  %v2238_v42 = vpop.eup %2237 }
 0x237   :  { %v1888_v51 = vadd.f32 %v1887_v10, %v1825_v43  ;;  %v1112_v18 = vmul.f32 0.6931472, %v2234_v60  ;;  %v1142_v41 = vmul.f32 %v7702_v57, %v1141_v21  ;;  %v1161_v40 = vand.u32 2147483647, %v7710_v58 }
 0x238   :  { %2247 = vlog2.f32 %v1173_v50  ;;  %vm6026_vm7 = vcmp.lt.f32.partialorder %v1152_v54, 0.0004427343  ;;  %v1191_v20 = vadd.f32 1.0, %v7730_v35  ;;  %v1251_v6 = vadd.f32 %v1091_v44, %v7731_v7  ;;  %v2240_v37 = vpop.eup %2239  ;;  %v7739_v54 = vld [vmem:[#allocation87_spill] sm:$0xff] }
 0x239   :  { %v1828_v47 = vmul.f32 %v7732_v23, %v1249_v27  ;;  %v1889_v26 = vadd.f32 %v1888_v51, %v1826_v45  ;;  %v1121_v55 = vmul.f32 0.6931472, %v2236_v28  ;;  %v1151_v1 = vmul.f32 %v7705_v25, %v1150_v2  ;;  %v7740_v28 = vld [vmem:[#allocation274_spill] sm:$0xff] }
 0x23a   :  { %v1159_v46 = vadd.f32 1.0, %v1158_v48  ;;  %v1167_v57 = vmul.f32 -0.5, %v7713_v22  ;;  %2249 = vlog2.f32 %v1182_v15  ;;  %v1252_v8 = vadd.f32 %v1100_v17, %v7733_v5  ;;  %v7744_v48 = vld [vmem:[#allocation254_spill] sm:$0xff] }
 0x23b   :  { %v1829_v49 = vmul.f32 %v7734_v63, %v1250_v56  ;;  %v1890_v36 = vadd.f32 %v1889_v26, %v1827_v9  ;;  %v1118_v44 = vsel %vm5979_vm12, %v5950_v12, %v1112_v18  ;;  %v1130_v32 = vmul.f32 0.6931472, %v2238_v42  ;;  %v2242_v33 = vpop.eup %2241  ;;  %v7745_v42 = vld [vmem:[#allocation88_spill] sm:$0xff] }
 0x23c   :  { %vm6040_vm10 = vcmp.lt.f32.partialorder %v1161_v40, 0.0004427343  ;;  %v1170_v25 = vand.u32 2147483647, %v7713_v22  ;;  %2251 = vlog2.f32 %v1191_v20  ;;  %v1253_v60 = vadd.f32 %v1109_v24, %v7737_v38  ;;  %v7743_v24 = vld [vmem:[#allocation50_spill] sm:$0xff]  ;;  %v7746_v40 = vld [vmem:[#allocation275_spill] sm:$0xff] }
 0x23d   :  { %v1830_v30 = vmul.f32 %v7738_v59, %v1251_v6  ;;  %v1891_v34 = vadd.f32 %v1890_v36, %v1828_v47  ;;  %v1127_v43 = vsel %vm5996_vm1, %v5967_v11, %v1121_v55  ;;  %v1139_v16 = vmul.f32 0.6931472, %v2240_v37  ;;  %v7749_v37 = vld [vmem:[#allocation51_spill] sm:$0xff]  ;;  %v7751_v36 = vld [vmem:[#allocation52_spill] sm:$0xff] }
 0x23e   :  { %v1160_v12 = vmul.f32 %v7710_v58, %v1159_v46  ;;  %v1176_v19 = vmul.f32 -0.5, %v7718_v61  ;;  %v2244_v17 = vpop.eup %2243  ;;  %v1168_v21 = vadd.f32 1.0, %v1167_v57  ;;  %v1254_v50 = vadd.f32 %v1118_v44, %v7739_v54  ;;  %v7753_v38 = vld [vmem:[#allocation99_spill] sm:$0xff]  ;;  %v7760_v54 = vld [vmem:[#allocation101_spill] sm:$0xff] }
 0x23f   :  { %v1831_v3 = vmul.f32 %v7740_v28, %v1252_v8  ;;  %v1892_v27 = vadd.f32 %v1891_v34, %v1829_v49  ;;  %v2246_v4 = vpop.eup %2245  ;;  %v1136_v45 = vsel %vm6007_vm13, %v5992_v14, %v1130_v32  ;;  %v1148_v10 = vmul.f32 0.6931472, %v2242_v33  ;;  %v7752_v32 = vld [vmem:[#allocation276_spill] sm:$0xff] }
 0x240   :  { %v1179_v11 = vand.u32 2147483647, %v7718_v61  ;;  %v1185_v31 = vmul.f32 -0.5, %v7725_v13  ;;  %vm6059_vm3 = vcmp.lt.f32.partialorder %v1170_v25, 0.0004427343  ;;  %v1255_v2 = vadd.f32 %v1127_v43, %v7743_v24 }
 0x241   :  { %v1832_v15 = vmul.f32 %v7744_v48, %v1253_v60  ;;  %v1893_v0 = vadd.f32 %v1892_v27, %v1830_v30  ;;  %v1145_v62 = vsel %vm6017_vm4, %v1142_v41, %v1139_v16  ;;  %v1157_v53 = vmul.f32 0.6931472, %v2244_v17  ;;  %v7754_v60 = vld [vmem:[#allocation66_spill] sm:$0xff]  ;;  %v7766_v48 = vld [vmem:[#allocation68_spill] sm:$0xff] }
 0x242   :  { %v2248_v56 = vpop.eup %2247  ;;  %v1177_v14 = vadd.f32 1.0, %v1176_v19  ;;  %v1194_v9 = vmul.f32 -0.5, %v7730_v35  ;;  %v1169_v51 = vmul.f32 %v7713_v22, %v1168_v21  ;;  %v1256_v18 = vadd.f32 %v1136_v45, %v7745_v42  ;;  %v7750_v22 = vld [vmem:[#allocation255_spill] sm:$0xff]  ;;  %v7758_v16 = vld [vmem:[#allocation90_spill] sm:$0xff]  ;;  %v7759_v19 = vld [vmem:[#allocation256_spill] sm:$0xff] }
 0x243   :  { %v1833_v20 = vmul.f32 %v7746_v40, %v1254_v50  ;;  %v1894_v7 = vadd.f32 %v1893_v0, %v1831_v3  ;;  %v1154_v6 = vsel %vm6026_vm7, %v1151_v1, %v1148_v10  ;;  %v1166_v23 = vmul.f32 0.6931472, %v2246_v4  ;;  %v7761_v50 = vld [vmem:[#allocation67_spill] sm:$0xff] }
 0x244   :  { %vm6073_vm0 = vcmp.lt.f32.partialorder %v1179_v11, 0.0004427343  ;;  %v1186_v39 = vadd.f32 1.0, %v1185_v31  ;;  %v2250_v41 = vpop.eup %2249  ;;  %v1188_v26 = vand.u32 2147483647, %v7725_v13  ;;  %v1257_v55 = vadd.f32 %v1145_v62, %v7749_v37  ;;  %v7764_v11 = vld [vmem:[#allocation277_spill] sm:$0xff] }
 0x245   :  { %v1834_v46 = vmul.f32 %v7750_v22, %v1255_v2  ;;  %v1895_v57 = vadd.f32 %v1894_v7, %v1832_v15  ;;  %v1163_v5 = vsel %vm6040_vm10, %v1160_v12, %v1157_v53  ;;  %v1175_v8 = vmul.f32 0.6931472, %v2248_v56  ;;  %v7765_v2 = vld [vmem:[#allocation102_spill] sm:$0xff] }
 0x246   :  { %v1178_v29 = vmul.f32 %v7718_v61, %v1177_v14  ;;  %v1195_v1 = vadd.f32 1.0, %v1194_v9  ;;  %v2252_v63 = vpop.eup %2251  ;;  %v1197_v49 = vand.u32 2147483647, %v7730_v35  ;;  %v1258_v44 = vadd.f32 %v1154_v6, %v7751_v36  ;;  %v7768_v62 = vld [vmem:[#allocation258_spill] sm:$0xff] }
 0x247   :  { %v1835_v25 = vmul.f32 %v7752_v32, %v1256_v18  ;;  %v1896_v33 = vadd.f32 %v1895_v57, %v1833_v20  ;;  %v7755_v59 = vmax.f32 %v7754_v60, 0.0  ;;  %v1172_v52 = vsel %vm6059_vm3, %v1169_v51, %v1166_v23  ;;  %v7770_v20 = vld [vmem:[#allocation232_spill] sm:$0xff]  ;;  %v7771_v23 = vld [vmem:[#allocation69_spill] sm:$0xff] }
 0x248   :  { %v1184_v34 = vmul.f32 0.6931472, %v2250_v41  ;;  %v1187_v43 = vmul.f32 %v7725_v13, %v1186_v39  ;;  %vm6092_vm15 = vcmp.lt.f32.partialorder %v1188_v26, 0.0004427343  ;;  %v1259_v12 = vadd.f32 %v1163_v5, %v7758_v16  ;;  %v7763_v13 = vld [vmem:[#allocation53_spill] sm:$0xff]  ;;  %v7772_v41 = vld [vmem:[#allocation139_spill] sm:$0xff] }
 0x249   :  { %v365_v30 = vsub.f32 %v7755_v59, %v7753_v38  ;;  %v1836_v17 = vmul.f32 %v7759_v19, %v1257_v55  ;;  %v1897_v21 = vadd.f32 %v1896_v33, %v1834_v46  ;;  %v7762_v28 = vmax.f32 %v7761_v50, 0.0 }
 0x24a   :  { %v1181_v27 = vsel %vm6073_vm0, %v1178_v29, %v1175_v8  ;;  %v1193_v4 = vmul.f32 0.6931472, %v2252_v63  ;;  %v1196_v45 = vmul.f32 %v7730_v35, %v1195_v1  ;;  %vm1198_vm6 = vcmp.lt.f32.partialorder %v1197_v49, 0.0004427343  ;;  %v7769_v35 = vld [vmem:[#allocation278_spill] sm:$0xff] }
 0x24b   :  { %v366_v3 = vsub.f32 %v7762_v28, %v7760_v54  ;;  %v1260_v10 = vadd.f32 %v1172_v52, %v7763_v13  ;;  %v1837_v31 = vmul.f32 %v7764_v11, %v1258_v44  ;;  %v1898_v58 = vadd.f32 %v1897_v21, %v1835_v25 }
 0x24c   :  { %v1190_v24 = vsel %vm6092_vm15, %v1187_v43, %v1184_v34  ;;  %v7767_v15 = vmax.f32 %v7766_v48, 0.0  ;;  %v1261_v56 = vadd.f32 %v1181_v27, %v365_v30  ;;  %v1838_v53 = vmul.f32 %v7768_v62, %v1259_v12 }
 0x24d   :  { %v1899_v14 = vadd.f32 %v1898_v58, %v1836_v17  ;;  %v1199_v9 = vsel %vm1198_vm6, %v1196_v45, %v1193_v4  ;;  %v1262_v51 = vadd.f32 %v1190_v24, %v366_v3  ;;  %v1839_v42 = vmul.f32 %v7769_v35, %v1260_v10 }
 0x24e   :  { %v367_v0 = vsub.f32 %v7767_v15, %v7765_v2  ;;  %v1840_v7 = vmul.f32 %v7770_v20, %v1261_v56 }
 0x24f   :  { %v1900_v18 = vadd.f32 %v1899_v14, %v1837_v31  ;;  %v1841_v47 = vmul.f32 %v7771_v23, %v1262_v51 }
 0x250   :  { %v1263_v40 = vadd.f32 %v1199_v9, %v367_v0 }
 0x251   :  { %v1901_v6 = vadd.f32 %v1900_v18, %v1838_v53 }
 0x252   :  { %v1842_v26 = vmul.f32 %v7772_v41, %v1263_v40 }
 0x253   :  { %v1902_v39 = vadd.f32 %v1901_v6, %v1839_v42 }
 0x255   :  { %v1903_v37 = vadd.f32 %v1902_v39, %v1840_v7 }
 0x257   :  { %v1904_v55 = vadd.f32 %v1903_v37, %v1841_v47 }
 0x259   :  { %v1905_v22 = vadd.f32 %v1904_v55, %v1842_v26 }
 0x25b   :  { %1907 = vst [vmem:[#allocation9] sm:$0xff] %v1905_v22 }
 0x25c   :  { %2446 = shalt.err (!%p2443_p9)
}
 0x25d   :  { %s2447_s26 = scalar_lea.hbm %s6131_s3, 128 }
 0x25e   :  { %p2448_p10 = scmp.ne.s32.totalorder %s6131_s3, %s2447_s26  ;;  %p2451_p11 = scmp.lt.u32.totalorder %s2447_s26, %s6131_s3 }
 0x260   :  { %p2453_p12 = pnand %p2451_p11, %p2448_p10 }
 0x262   :  { %2456 = shalt.err (!%p2453_p12)
}
 0x263   :  { %1917 = dma.vmem_to_hbm [thread:$0]  %s1915_s22, 128, %s6131_s3, [#allocation6]  }
 0x264   :  { %2463 = dma.done.wait [#allocation6], 128  }
 0x265   :  { %2464 = vsyncadd [#allocation6], 4294967168 }
 0x266   :  { %1921 = vsyncpa [#allocation5], 1 }
 0x267   :  { %1922 = vsyncpa [#allocation8], 1 }
 0x268   :  { %1923 = vsyncpa [#allocation6], 1 }

</bundles_post_ra>
